<compile_context>
chip_gen: v7x
topology: tpu7x:2x2x1
jax: 0.10.0
libtpu: 0.0.40
codegen_flags: <defaults>
</compile_context>

<pallas_src>
import functools
import math

import jax
import jax.numpy as jnp
from jax.experimental import pallas as pl
from jax.experimental.pallas import tpu as pltpu


_VMEM_LIMIT = 48 * 1024 * 1024      # > v5e/v6e scoped defaults, < v7x 64 MiB physical
_MAX_UNTILED_K = 4096               # contraction dims up to this stay in one K tile


# ----------------------------------------------------------------------------
# Tiling helpers
# ----------------------------------------------------------------------------

def _round_up(x, m):
    return ((x + m - 1) // m) * m


def _block(dim, max_block, align):
    """Largest multiple of `align` dividing `dim`, capped at `max_block`;
    falls back to the full dimension (a full-dim block is always legal)."""
    if dim <= max_block:
        return dim
    t = (max_block // align) * align
    while t >= align:
        if dim % t == 0:
            return t
        t -= align
    return dim


def _choose_row_tile(m, max_tile=512):
    """Row (sublane) tile + padded row count.  Prefers 128-multiple tiles with
    minimal padding; small row counts become a single 16-aligned block."""
    if m < 128:
        mp = _round_up(m, 16)
        return mp, mp
    best = None
    for t in (512, 384, 256, 128):
        if t > max_tile:
            continue
        mp = _round_up(m, t)
        if best is None or mp < best[1] or (mp == best[1] and t > best[0]):
            best = (t, mp)
    return best


def _pad_rows(x, mp):
    m = x.shape[0]
    if mp == m:
        return x
    return jnp.pad(x, ((0, mp - m), (0, 0)))


# ----------------------------------------------------------------------------
# Linear (tiled matmul) with optional fused LayerNorm prologue / ReLU / residual
# ----------------------------------------------------------------------------

def _linear_kernel(*refs, relu, has_residual, has_ln, eps):
    it = iter(refs)
    x_ref = next(it)
    w_ref = next(it)
    b_ref = next(it)
    g_ref = be_ref = r_ref = None
    if has_ln:
        g_ref = next(it)
        be_ref = next(it)
    if has_residual:
        r_ref = next(it)
    o_ref = next(it)
    acc_ref = next(it)

    x = x_ref[...]
    if has_ln:                                   # LN prologue (full row in tile)
        xf = x.astype(jnp.float32)
        mu = jnp.mean(xf, axis=-1, keepdims=True)
        var = jnp.mean(jnp.square(xf - mu), axis=-1, keepdims=True)
        x = (xf - mu) * jax.lax.rsqrt(var + eps) * g_ref[...] + be_ref[...]
    x = x.astype(jnp.bfloat16)

    @pl.when(pl.program_id(2) == 0)
    def _():
        acc_ref[...] = jnp.zeros_like(acc_ref)

    acc_ref[...] += jnp.dot(x, w_ref[...], preferred_element_type=jnp.float32)

    @pl.when(pl.program_id(2) == pl.num_programs(2) - 1)
    def _():
        out = acc_ref[...] + b_ref[...]
        if relu:
            out = jnp.maximum(out, 0.0)
        if has_residual:
            out = out + r_ref[...].astype(jnp.float32)
        o_ref[...] = out.astype(o_ref.dtype)


def linear_pallas(x2d, w, b, *, relu=False, residual=None, ln=None,
                  out_dtype=jnp.bfloat16):
    """y = [LN](x) @ w + b [+ relu] [+ residual]; activations bf16, f32 acc."""
    M, K = x2d.shape
    N = w.shape[1]

    if ln is not None and K > _MAX_UNTILED_K:
        # LN fusion needs the whole row in one K tile; fall back to standalone LN.
        x2d = layernorm_pallas(x2d, ln[0], ln[1])
        ln = None

    tm, Mp = _choose_row_tile(M)
    tn = _block(N, 512, 128)
    tk = K if K <= _MAX_UNTILED_K else _block(K, 1024, 128)

    xp = _pad_rows(x2d.astype(jnp.bfloat16), Mp)
    args = [xp, w.astype(jnp.bfloat16), b.reshape(1, N).astype(jnp.float32)]
    in_specs = [
        pl.BlockSpec((tm, tk), lambda i, j, k: (i, k)),
        pl.BlockSpec((tk, tn), lambda i, j, k: (k, j)),
        pl.BlockSpec((1, tn), lambda i, j, k: (0, j)),
    ]
    if ln is not None:
        g, be = ln
        in_specs += [pl.BlockSpec((1, K), lambda i, j, k: (0, 0)),
                     pl.BlockSpec((1, K), lambda i, j, k: (0, 0))]
        args += [g.reshape(1, K).astype(jnp.float32),
                 be.reshape(1, K).astype(jnp.float32)]
    if residual is not None:
        in_specs.append(pl.BlockSpec((tm, tn), lambda i, j, k: (i, j)))
        args.append(_pad_rows(residual.astype(jnp.bfloat16), Mp))

    out = pl.pallas_call(
        functools.partial(_linear_kernel, relu=relu,
                          has_residual=residual is not None,
                          has_ln=ln is not None, eps=1e-6),
        out_shape=jax.ShapeDtypeStruct((Mp, N), out_dtype),
        grid=(Mp // tm, N // tn, K // tk),
        in_specs=in_specs,
        out_specs=pl.BlockSpec((tm, tn), lambda i, j, k: (i, j)),
        scratch_shapes=[pltpu.VMEM((tm, tn), jnp.float32)],
        compiler_params=pltpu.CompilerParams(
            dimension_semantics=("parallel", "parallel", "arbitrary"),
            vmem_limit_bytes=_VMEM_LIMIT),
        cost_estimate=pl.CostEstimate(
            flops=int(2 * Mp * N * K), transcendentals=0,
            bytes_accessed=int(2 * (Mp * K + K * N + Mp * N))),
    )(*args)
    return out[:M] if Mp != M else out


# ----------------------------------------------------------------------------
# Standalone LayerNorm (fallback when the contraction dim is K-tiled)
# ----------------------------------------------------------------------------

def _layernorm_kernel(x_ref, g_ref, b_ref, o_ref, *, eps):
    x = x_ref[...].astype(jnp.float32)
    mu = jnp.mean(x, axis=-1, keepdims=True)
    var = jnp.mean(jnp.square(x - mu), axis=-1, keepdims=True)
    o_ref[...] = ((x - mu) * jax.lax.rsqrt(var + eps) * g_ref[...]
                  + b_ref[...]).astype(o_ref.dtype)


def layernorm_pallas(x2d, gamma, beta, eps=1e-6):
    M, D = x2d.shape
    tm, Mp = _choose_row_tile(M)
    xp = _pad_rows(x2d.astype(jnp.bfloat16), Mp)
    out = pl.pallas_call(
        functools.partial(_layernorm_kernel, eps=eps),
        out_shape=jax.ShapeDtypeStruct((Mp, D), jnp.bfloat16),
        grid=(Mp // tm,),
        in_specs=[pl.BlockSpec((tm, D), lambda i: (i, 0)),
                  pl.BlockSpec((1, D), lambda i: (0, 0)),
                  pl.BlockSpec((1, D), lambda i: (0, 0))],
        out_specs=pl.BlockSpec((tm, D), lambda i: (i, 0)),
        compiler_params=pltpu.CompilerParams(
            dimension_semantics=("parallel",)),
    )(xp, gamma.reshape(1, D).astype(jnp.float32),
      beta.reshape(1, D).astype(jnp.float32))
    return out[:M] if Mp != M else out


# ----------------------------------------------------------------------------
# Flash-style attention: grid = (B, H, q_tiles, kv_tiles), online softmax
# ----------------------------------------------------------------------------

def _flash_attn_kernel(q_ref, k_ref, v_ref, mask_ref, o_ref,
                       m_sc, l_sc, acc_sc, *, scale):
    kv = pl.program_id(3)

    @pl.when(kv == 0)
    def _():
        m_sc[...] = jnp.full_like(m_sc, -jnp.inf)
        l_sc[...] = jnp.zeros_like(l_sc)
        acc_sc[...] = jnp.zeros_like(acc_sc)

    s = jnp.dot(q_ref[...], k_ref[...].T,
                preferred_element_type=jnp.float32) * scale          # (tq, tk)
    s = jnp.where(mask_ref[...] != 0, s, -1e9)                       # masked_fill
    m_prev = m_sc[...]
    m_new = jnp.maximum(m_prev, jnp.max(s, axis=-1, keepdims=True))
    alpha = jnp.exp(m_prev - m_new)
    p = jnp.exp(s - m_new)
    l_sc[...] = alpha * l_sc[...] + jnp.sum(p, axis=-1, keepdims=True)
    acc_sc[...] = alpha * acc_sc[...] + jnp.dot(
        p.astype(jnp.bfloat16), v_ref[...], preferred_element_type=jnp.float32)
    m_sc[...] = m_new

    @pl.when(kv == pl.num_programs(3) - 1)
    def _():
        # Exact division (not approx reciprocal) to stay close to the reference.
        o_ref[...] = (acc_sc[...] / l_sc[...]).astype(o_ref.dtype)


def _run_flash(q_arr, k_arr, v_arr, mask, qkv_specs, B, H, Tq, Tkv, dk, tq, tk):
    q_spec, k_spec, v_spec = qkv_specs
    mask = mask.astype(jnp.int32)
    if mask.shape[1] == 1:          # broadcast padding mask (B, 1, Tkv)
        m_spec = pl.BlockSpec((None, 1, tk), lambda b, h, qi, ki: (b, 0, ki))
    else:                           # full (B, Tq, Tkv) mask (e.g. causal)
        m_spec = pl.BlockSpec((None, tq, tk), lambda b, h, qi, ki: (b, qi, ki))
    # TODO(synk): for known-causal masks the (B, T, T) mask stream could be
    # replaced by an in-kernel broadcasted_iota comparison vs the tile offsets.
    return pl.pallas_call(
        functools.partial(_flash_attn_kernel, scale=1.0 / math.sqrt(dk)),
        out_shape=jax.ShapeDtypeStruct((B, H, Tq, dk), jnp.bfloat16),
        grid=(B, H, Tq // tq, Tkv // tk),
        in_specs=[q_spec, k_spec, v_spec, m_spec],
        out_specs=pl.BlockSpec((None, None, tq, dk),
                               lambda b, h, qi, ki: (b, h, qi, 0)),
        scratch_shapes=[pltpu.VMEM((tq, 1), jnp.float32),
                        pltpu.VMEM((tq, 1), jnp.float32),
                        pltpu.VMEM((tq, dk), jnp.float32)],
        compiler_params=pltpu.CompilerParams(
            dimension_semantics=("parallel", "parallel", "parallel", "arbitrary"),
            vmem_limit_bytes=_VMEM_LIMIT),
    )(q_arr, k_arr, v_arr, mask)


def self_attention(qkv2d, mask, B, T, heads):
    """qkv2d: (B*T, 3*D) bf16 fused QKV projection -> context (B, H, T, dk)."""
    D = qkv2d.shape[1] // 3
    dk = D // heads
    # One XLA relayout so the kernel reads clean (tile, dk) blocks per (b, h).
    qkv = qkv2d.reshape(B, T, 3, heads, dk).transpose(0, 2, 3, 1, 4)  # (B,3,H,T,dk)
    tq = _block(T, 256, 16)
    tk = _block(T, 512, 128)
    specs = (
        pl.BlockSpec((None, None, None, tq, dk),
                     lambda b, h, qi, ki: (b, 0, h, qi, 0)),
        pl.BlockSpec((None, None, None, tk, dk),
                     lambda b, h, qi, ki: (b, 1, h, ki, 0)),
        pl.BlockSpec((None, None, None, tk, dk),
                     lambda b, h, qi, ki: (b, 2, h, ki, 0)),
    )
    return _run_flash(qkv, qkv, qkv, mask, specs, B, heads, T, T, dk, tq, tk)


def cross_attention(q2d, kv2d, mask, B, Tq, Tk, heads):
    """q2d: (B*Tq, D), kv2d: (B*Tk, 2*D) bf16 -> context (B, H, Tq, dk)."""
    D = q2d.shape[1]
    dk = D // heads
    q = q2d.reshape(B, Tq, heads, dk).transpose(0, 2, 1, 3)           # (B,H,Tq,dk)
    kv = kv2d.reshape(B, Tk, 2, heads, dk).transpose(0, 2, 3, 1, 4)   # (B,2,H,Tk,dk)
    tq = _block(Tq, 256, 16)
    tk = _block(Tk, 512, 128)
    specs = (
        pl.BlockSpec((None, None, tq, dk), lambda b, h, qi, ki: (b, h, qi, 0)),
        pl.BlockSpec((None, None, None, tk, dk),
                     lambda b, h, qi, ki: (b, 0, h, ki, 0)),
        pl.BlockSpec((None, None, None, tk, dk),
                     lambda b, h, qi, ki: (b, 1, h, ki, 0)),
    )
    return _run_flash(q, kv, kv, mask, specs, B, heads, Tq, Tk, dk, tq, tk)


# ----------------------------------------------------------------------------
# Head-concat + output projection (+ residual): reduces over heads in the grid
# ----------------------------------------------------------------------------

def _headmerge_kernel(x_ref, w_ref, b_ref, r_ref, o_ref, acc_ref):
    h = pl.program_id(3)

    @pl.when(h == 0)
    def _():
        acc_ref[...] = jnp.zeros_like(acc_ref)

    acc_ref[...] += jnp.dot(x_ref[...], w_ref[...],
                            preferred_element_type=jnp.float32)

    @pl.when(h == pl.num_programs(3) - 1)
    def _():
        out = acc_ref[...] + b_ref[...] + r_ref[...].astype(jnp.float32)
        o_ref[...] = out.astype(o_ref.dtype)


def attn_out_proj_pallas(ctx, wo, bo, residual):
    """residual + concat_heads(ctx) @ wo + bo, without transposing ctx in HBM.

    ctx: (B, H, T, dk) bf16; wo: (H*dk, N); residual: (B, T, N) bf16.
    The head axis is the (last) reduction axis of the grid, so the head-concat
    is folded into the matmul and the output store is lane-dense (N wide)."""
    B, H, T, dk = ctx.shape
    N = wo.shape[1]
    w3 = wo.astype(jnp.bfloat16).reshape(H, dk, N)
    tt = _block(T, 256, 16)
    tn = _block(N, 512, 128)
    return pl.pallas_call(
        _headmerge_kernel,
        out_shape=jax.ShapeDtypeStruct((B, T, N), jnp.bfloat16),
        grid=(B, T // tt, N // tn, H),
        in_specs=[
            pl.BlockSpec((None, None, tt, dk), lambda b, ti, j, h: (b, h, ti, 0)),
            pl.BlockSpec((None, dk, tn), lambda b, ti, j, h: (h, 0, j)),
            pl.BlockSpec((1, tn), lambda b, ti, j, h: (0, j)),
            pl.BlockSpec((None, tt, tn), lambda b, ti, j, h: (b, ti, j)),
        ],
        out_specs=pl.BlockSpec((None, tt, tn), lambda b, ti, j, h: (b, ti, j)),
        scratch_shapes=[pltpu.VMEM((tt, tn), jnp.float32)],
        compiler_params=pltpu.CompilerParams(
            dimension_semantics=("parallel", "parallel", "parallel", "arbitrary"),
            vmem_limit_bytes=_VMEM_LIMIT),
        cost_estimate=pl.CostEstimate(
            flops=int(2 * B * T * H * dk * N), transcendentals=0,
            bytes_accessed=int(2 * (B * T * H * dk + H * dk * N + 2 * B * T * N))),
    )(ctx, w3, bo.reshape(1, N).astype(jnp.float32), residual)


# ----------------------------------------------------------------------------
# Generator: fused [final LN] + vocab projection + log_softmax (two-phase LSE)
# ----------------------------------------------------------------------------

def _generator_kernel(*refs, has_ln, eps):
    it = iter(refs)
    x_ref = next(it)
    w_ref = next(it)
    b_ref = next(it)
    g_ref = be_ref = None
    if has_ln:
        g_ref = next(it)
        be_ref = next(it)
    o_ref = next(it)
    m_ref = next(it)
    l_ref = next(it)

    phase = pl.program_id(1)
    j = pl.program_id(2)

    x = x_ref[...]
    if has_ln:
        xf = x.astype(jnp.float32)
        mu = jnp.mean(xf, axis=-1, keepdims=True)
        var = jnp.mean(jnp.square(xf - mu), axis=-1, keepdims=True)
        x = (xf - mu) * jax.lax.rsqrt(var + eps) * g_ref[...] + be_ref[...]
    x = x.astype(jnp.bfloat16)

    logits = jnp.dot(x, w_ref[...], preferred_element_type=jnp.float32) + b_ref[...]

    @pl.when(jnp.logical_and(phase == 0, j == 0))
    def _():
        m_ref[...] = jnp.full_like(m_ref, -jnp.inf)
        l_ref[...] = jnp.zeros_like(l_ref)

    @pl.when(phase == 0)
    def _():
        m_prev = m_ref[...]
        m_new = jnp.maximum(m_prev, jnp.max(logits, axis=-1, keepdims=True))
        l_ref[...] = (l_ref[...] * jnp.exp(m_prev - m_new)
                      + jnp.sum(jnp.exp(logits - m_new), axis=-1, keepdims=True))
        m_ref[...] = m_new

    @pl.when(phase == 1)
    def _():
        o_ref[...] = logits - m_ref[...] - jnp.log(l_ref[...])


def generator_pallas(x2d, w, b, *, ln=None):
    """x2d: (M, D) bf16 -> (M, V) f32 log-probs."""
    M, D = x2d.shape
    V = w.shape[1]

    if ln is not None and D > _MAX_UNTILED_K:
        x2d = layernorm_pallas(x2d, ln[0], ln[1])
        ln = None

    tm, Mp = _choose_row_tile(M, max_tile=512)
    # Pad the vocab to a lane multiple so the vocab tile never degrades to the
    # full dimension; padded columns get a -1e30 bias (exp()≈0) and are sliced.
    Vp = _round_up(V, 128)
    wq = w.astype(jnp.bfloat16)
    bq = b.astype(jnp.float32)
    if Vp != V:
        wq = jnp.pad(wq, ((0, 0), (0, Vp - V)))
        bq = jnp.pad(bq, ((0, Vp - V),), constant_values=-1e30)
    tv = _block(Vp, 2048, 128)

    xp = _pad_rows(x2d.astype(jnp.bfloat16), Mp)
    args = [xp, wq, bq.reshape(1, Vp)]
    in_specs = [pl.BlockSpec((tm, D), lambda i, p, j: (i, 0)),
                pl.BlockSpec((D, tv), lambda i, p, j: (0, j)),
                pl.BlockSpec((1, tv), lambda i, p, j: (0, j))]
    if ln is not None:
        g, be = ln
        in_specs += [pl.BlockSpec((1, D), lambda i, p, j: (0, 0)),
                     pl.BlockSpec((1, D), lambda i, p, j: (0, 0))]
        args += [g.reshape(1, D).astype(jnp.float32),
                 be.reshape(1, D).astype(jnp.float32)]

    out = pl.pallas_call(
        functools.partial(_generator_kernel, has_ln=ln is not None, eps=1e-6),
        out_shape=jax.ShapeDtypeStruct((Mp, Vp), jnp.float32),
        grid=(Mp // tm, 2, Vp // tv),
        in_specs=in_specs,
        # Pin the output block to (i, 0) during phase 0 so the unwritten buffer
        # is never flushed to HBM; phase-1 step j writes (and flushes) (i, j).
        out_specs=pl.BlockSpec((tm, tv), lambda i, p, j: (i, j * p)),
        scratch_shapes=[pltpu.VMEM((tm, 1), jnp.float32),
                        pltpu.VMEM((tm, 1), jnp.float32)],
        compiler_params=pltpu.CompilerParams(
            dimension_semantics=("parallel", "arbitrary", "arbitrary"),
            vmem_limit_bytes=_VMEM_LIMIT),
        cost_estimate=pl.CostEstimate(
            flops=int(4 * Mp * Vp * D), transcendentals=int(Mp * Vp),
            bytes_accessed=int(2 * D * Vp * 2 * (Mp // tm) + 2 * Mp * D + 4 * Mp * Vp)),
    )(*args)
    return out[:M, :V]


# ----------------------------------------------------------------------------
# Transformer building blocks (plain-JAX glue around the Pallas kernels)
# ----------------------------------------------------------------------------

def positional_encoding(max_len, d_model):
    pos = jnp.arange(max_len, dtype=jnp.float32)[:, None]
    div = jnp.exp(jnp.arange(0, d_model, 2, dtype=jnp.float32)
                  * (-math.log(10000.0) / d_model))
    pe = jnp.zeros((max_len, d_model), dtype=jnp.float32)
    pe = pe.at[:, 0::2].set(jnp.sin(pos * div))
    pe = pe.at[:, 1::2].set(jnp.cos(pos * div))
    return pe


def embed(tokens, table, pe, d_model):
    # Embeddings(d_model, vocab): lut(x) * sqrt(d_model) + positional encoding.
    # TODO(synk): the embedding token gather stays in XLA (no dense Pallas map).
    B, T = tokens.shape
    x = table[tokens] * math.sqrt(d_model) + pe[None, :T, :]
    return x.astype(jnp.bfloat16)


def encoder_layer(lp, x, src_mask, heads):
    """Pre-norm residual sublayers; dropout is identity in eval mode."""
    B, T, D = x.shape
    x2d = x.reshape(B * T, D)
    # self-attention sublayer (LN fused into the QKV projection)
    qkv = linear_pallas(x2d, lp["self_attn"]["wqkv"], lp["self_attn"]["bqkv"],
                        ln=(lp["ln1_g"], lp["ln1_b"]))
    ctx = self_attention(qkv, src_mask, B, T, heads)
    x = attn_out_proj_pallas(ctx, lp["self_attn"]["wo"], lp["self_attn"]["bo"],
                             residual=x)
    # feed-forward sublayer (LN fused into W1, ReLU fused, residual fused)
    x2d = x.reshape(B * T, D)
    h = linear_pallas(x2d, lp["ffn"]["w1"], lp["ffn"]["b1"], relu=True,
                      ln=(lp["ln2_g"], lp["ln2_b"]))
    x = linear_pallas(h, lp["ffn"]["w2"], lp["ffn"]["b2"],
                      residual=x2d).reshape(B, T, D)
    return x


def decoder_layer(lp, x, memory2d, src_mask, tgt_mask, heads, enc_ln, t_src):
    B, T, D = x.shape
    x2d = x.reshape(B * T, D)
    # masked self-attention
    qkv = linear_pallas(x2d, lp["self_attn"]["wqkv"], lp["self_attn"]["bqkv"],
                        ln=(lp["ln1_g"], lp["ln1_b"]))
    ctx = self_attention(qkv, tgt_mask, B, T, heads)
    x = attn_out_proj_pallas(ctx, lp["self_attn"]["wo"], lp["self_attn"]["bo"],
                             residual=x)
    # cross-attention (final encoder LayerNorm fused into the KV projection)
    x2d = x.reshape(B * T, D)
    q = linear_pallas(x2d, lp["cross_attn"]["wq"], lp["cross_attn"]["bq"],
                      ln=(lp["ln2_g"], lp["ln2_b"]))
    kv = linear_pallas(memory2d, lp["cross_attn"]["wkv"], lp["cross_attn"]["bkv"],
                       ln=enc_ln)
    ctx = cross_attention(q, kv, src_mask, B, T, t_src, heads)
    x = attn_out_proj_pallas(ctx, lp["cross_attn"]["wo"], lp["cross_attn"]["bo"],
                             residual=x)
    # feed-forward
    x2d = x.reshape(B * T, D)
    h = linear_pallas(x2d, lp["ffn"]["w1"], lp["ffn"]["b1"], relu=True,
                      ln=(lp["ln3_g"], lp["ln3_b"]))
    x = linear_pallas(h, lp["ffn"]["w2"], lp["ffn"]["b2"],
                      residual=x2d).reshape(B, T, D)
    return x


def encoder_decoder_forward(params, src, tgt, src_mask, tgt_mask, cfg):
    d_model, heads = cfg["d_model"], cfg["heads"]
    pe = params["pe"]

    # Encoder: memory stays un-normalized in HBM; the final encoder LayerNorm
    # is fused into every decoder KV projection (same math, one fewer HBM pass).
    x = embed(src, params["src_emb"], pe, d_model)
    for lp in params["enc_layers"]:
        x = encoder_layer(lp, x, src_mask, heads)
    B, t_src, _ = x.shape
    memory2d = x.reshape(B * t_src, d_model)
    enc_ln = (params["enc_norm_g"], params["enc_norm_b"])
    # TODO(synk): the original GATEncoder returns (hx, ho); the auxiliary graph
    # output ho has no counterpart here and forward() discards it anyway.

    y = embed(tgt, params["tgt_emb"], pe, d_model)
    for lp in params["dec_layers"]:
        y = decoder_layer(lp, y, memory2d, src_mask, tgt_mask, heads,
                          enc_ln, t_src)

    Bt, t_tgt, _ = y.shape
    logp = generator_pallas(y.reshape(Bt * t_tgt, d_model),
                            params["gen_w"], params["gen_b"],
                            ln=(params["dec_norm_g"], params["dec_norm_b"]))
    return logp.reshape(Bt, t_tgt, -1)


# ----------------------------------------------------------------------------
# Deterministic parameter construction (matmul weights stored in bf16)
# ----------------------------------------------------------------------------

def init_params(key, cfg):
    d_model, d_ff = cfg["d_model"], cfg["d_ff"]
    vocab_src, vocab_tgt = cfg["vocab_src"], cfg["vocab_tgt"]
    n_layers, max_len = cfg["n_layers"], cfg["max_len"]

    keys = iter(jax.random.split(key, 256))

    def w(shape, scale=0.02, dtype=jnp.bfloat16):
        return (jax.random.normal(next(keys), shape, dtype=jnp.float32)
                * scale).astype(dtype)

    def zeros(n):
        return jnp.zeros((n,), jnp.float32)

    def ones(n):
        return jnp.ones((n,), jnp.float32)

    def self_attn_params():
        return {"wqkv": w((d_model, 3 * d_model)), "bqkv": zeros(3 * d_model),
                "wo": w((d_model, d_model)), "bo": zeros(d_model)}

    def cross_attn_params():
        return {"wq": w((d_model, d_model)), "bq": zeros(d_model),
                "wkv": w((d_model, 2 * d_model)), "bkv": zeros(2 * d_model),
                "wo": w((d_model, d_model)), "bo": zeros(d_model)}

    def ffn_params():
        return {"w1": w((d_model, d_ff)), "b1": zeros(d_ff),
                "w2": w((d_ff, d_model)), "b2": zeros(d_model)}

    enc_layers = [{"self_attn": self_attn_params(), "ffn": ffn_params(),
                   "ln1_g": ones(d_model), "ln1_b": zeros(d_model),
                   "ln2_g": ones(d_model), "ln2_b": zeros(d_model)}
                  for _ in range(n_layers)]
    dec_layers = [{"self_attn": self_attn_params(),
                   "cross_attn": cross_attn_params(), "ffn": ffn_params(),
                   "ln1_g": ones(d_model), "ln1_b": zeros(d_model),
                   "ln2_g": ones(d_model), "ln2_b": zeros(d_model),
                   "ln3_g": ones(d_model), "ln3_b": zeros(d_model)}
                  for _ in range(n_layers)]

    return {"src_emb": w((vocab_src, d_model), scale=1.0, dtype=jnp.float32),
            "tgt_emb": w((vocab_tgt, d_model), scale=1.0, dtype=jnp.float32),
            "pe": positional_encoding(max_len, d_model),
            "enc_layers": enc_layers,
            "enc_norm_g": ones(d_model), "enc_norm_b": zeros(d_model),
            "dec_layers": dec_layers,
            "dec_norm_g": ones(d_model), "dec_norm_b": zeros(d_model),
            "gen_w": w((d_model, vocab_tgt)),
            "gen_b": zeros(vocab_tgt)}


# ----------------------------------------------------------------------------
# Main
# ----------------------------------------------------------------------------

if __name__ == "__main__":
    cfg = dict(d_model=64, d_ff=128, heads=4, n_layers=2,
               vocab_src=128, vocab_tgt=128, max_len=32)
    B, T_src, T_tgt = 2, 8, 8

    key = jax.random.PRNGKey(0)
    k_param, k_src, k_tgt = jax.random.split(key, 3)

    params = init_params(k_param, cfg)

    src = jax.random.randint(k_src, (B, T_src), 0, cfg["vocab_src"], dtype=jnp.int32)
    tgt = jax.random.randint(k_tgt, (B, T_tgt), 0, cfg["vocab_tgt"], dtype=jnp.int32)

    # src_mask: (B, 1, T_src) all-ones padding mask; tgt_mask: (B, T, T) causal.
    src_mask = jnp.ones((B, 1, T_src), dtype=jnp.int32)
    tgt_mask = jnp.broadcast_to(
        jnp.tril(jnp.ones((T_tgt, T_tgt), dtype=jnp.int32))[None],
        (B, T_tgt, T_tgt))

    @jax.jit
    def fwd(params, src, tgt, src_mask, tgt_mask):
        return encoder_decoder_forward(params, src, tgt, src_mask, tgt_mask, cfg)

    out = jax.block_until_ready(fwd(params, src, tgt, src_mask, tgt_mask))

    assert out.shape == (B, T_tgt, cfg["vocab_tgt"])
    # log_softmax rows must sum to ~1 in prob space (LSE is computed in f32).
    row_sums = jnp.exp(out).sum(-1)
    assert bool(jnp.all(jnp.abs(row_sums - 1.0) < 2e-3))
    assert bool(jnp.all(jnp.isfinite(out)))
    print("KERNEL_OK")
</pallas_src>

<mosaic_0001>
module attributes {stable_mosaic.version = 11 : i64} {
  func.func @_linear_kernel(%arg0: i32, %arg1: i32, %arg2: i32, %arg3: memref<16x64xbf16, #tpu.memory_space<vmem>>, %arg4: memref<64x192xbf16, #tpu.memory_space<vmem>>, %arg5: memref<1x192xf32, #tpu.memory_space<vmem>>, %arg6: memref<1x64xf32, #tpu.memory_space<vmem>>, %arg7: memref<1x64xf32, #tpu.memory_space<vmem>>, %arg8: memref<16x192xbf16, #tpu.memory_space<vmem>>, %arg9: memref<16x192xf32, #tpu.memory_space<vmem>>) attributes {dimension_semantics = [#tpu.dimension_semantics<parallel>, #tpu.dimension_semantics<parallel>, #tpu.dimension_semantics<arbitrary>], iteration_bounds = array<i64: 1, 1, 1>, scalar_prefetch = 0 : i64, scratch_operands = 1 : i64, tpu.core_type = #tpu.core_type<tc>, window_params = [{transform_indices = @transform_0, window_bounds = array<i64: 16, 64>}, {transform_indices = @transform_1, window_bounds = array<i64: 64, 192>}, {transform_indices = @transform_2, window_bounds = array<i64: 1, 192>}, {pipeline_mode = #tpu.pipeline_mode<synchronous>, transform_indices = @transform_3, window_bounds = array<i64: 1, 64>}, {pipeline_mode = #tpu.pipeline_mode<synchronous>, transform_indices = @transform_4, window_bounds = array<i64: 1, 64>}, {transform_indices = @transform_5, window_bounds = array<i64: 16, 192>}]} {
    %c0 = arith.constant 0 : index
    %c0_0 = arith.constant 0 : index
    %0 = vector.load %arg3[%c0, %c0_0] : memref<16x64xbf16, #tpu.memory_space<vmem>>, vector<16x64xbf16>
    %1 = arith.extf %0 : vector<16x64xbf16> to vector<16x64xf32>
    %cst = arith.constant dense<0.000000e+00> : vector<16xf32>
    %2 = vector.multi_reduction <add>, %1, %cst [1] : vector<16x64xf32> to vector<16xf32>
    %3 = vector.shape_cast %2 : vector<16xf32> to vector<16x1xf32>
    %cst_1 = arith.constant 6.400000e+01 : f32
    %4 = vector.broadcast %cst_1 : f32 to vector<16x1xf32>
    %5 = arith.divf %3, %4 : vector<16x1xf32>
    %6 = vector.broadcast %5 : vector<16x1xf32> to vector<16x64xf32>
    %7 = arith.subf %1, %6 : vector<16x64xf32>
    %8 = arith.mulf %7, %7 : vector<16x64xf32>
    %cst_2 = arith.constant dense<0.000000e+00> : vector<16xf32>
    %9 = vector.multi_reduction <add>, %8, %cst_2 [1] : vector<16x64xf32> to vector<16xf32>
    %10 = vector.shape_cast %9 : vector<16xf32> to vector<16x1xf32>
    %cst_3 = arith.constant 6.400000e+01 : f32
    %11 = vector.broadcast %cst_3 : f32 to vector<16x1xf32>
    %12 = arith.divf %10, %11 : vector<16x1xf32>
    %13 = vector.broadcast %5 : vector<16x1xf32> to vector<16x64xf32>
    %14 = arith.subf %1, %13 : vector<16x64xf32>
    %cst_4 = arith.constant 9.99999997E-7 : f32
    %15 = vector.broadcast %cst_4 : f32 to vector<16x1xf32>
    %16 = arith.addf %12, %15 : vector<16x1xf32>
    %17 = math.rsqrt %16 : vector<16x1xf32>
    %18 = vector.broadcast %17 : vector<16x1xf32> to vector<16x64xf32>
    %19 = arith.mulf %14, %18 : vector<16x64xf32>
    %c0_5 = arith.constant 0 : index
    %c0_6 = arith.constant 0 : index
    %20 = vector.load %arg6[%c0_5, %c0_6] : memref<1x64xf32, #tpu.memory_space<vmem>>, vector<1x64xf32>
    %21 = vector.broadcast %20 : vector<1x64xf32> to vector<16x64xf32>
    %22 = arith.mulf %19, %21 : vector<16x64xf32>
    %c0_7 = arith.constant 0 : index
    %c0_8 = arith.constant 0 : index
    %23 = vector.load %arg7[%c0_7, %c0_8] : memref<1x64xf32, #tpu.memory_space<vmem>>, vector<1x64xf32>
    %24 = vector.broadcast %23 : vector<1x64xf32> to vector<16x64xf32>
    %25 = arith.addf %22, %24 : vector<16x64xf32>
    %26 = arith.truncf %25 : vector<16x64xf32> to vector<16x64xbf16>
    %c0_i32 = arith.constant 0 : i32
    %27 = arith.cmpi eq, %arg2, %c0_i32 : i32
    %28 = arith.extui %27 : i1 to i32
    %c0_i32_9 = arith.constant 0 : i32
    %29 = arith.cmpi ne, %28, %c0_i32_9 : i32
    scf.if %29 {
      %cst_19 = arith.constant 0.000000e+00 : f32
      %38 = vector.broadcast %cst_19 : f32 to vector<16x192xf32>
      %c0_20 = arith.constant 0 : index
      %c0_21 = arith.constant 0 : index
      %39 = vector.load %arg9[%c0_20, %c0_21] : memref<16x192xf32, #tpu.memory_space<vmem>>, vector<16x192xf32>
      tpu.vector_store %arg9[%c0_20, %c0_21], %38 {strides = array<i32>} : memref<16x192xf32, #tpu.memory_space<vmem>>, vector<16x192xf32>,
    } else {
    }
    %c0_10 = arith.constant 0 : index
    %c0_11 = arith.constant 0 : index
    %30 = vector.load %arg9[%c0_10, %c0_11] : memref<16x192xf32, #tpu.memory_space<vmem>>, vector<16x192xf32>
    %c0_12 = arith.constant 0 : index
    %c0_13 = arith.constant 0 : index
    %31 = vector.load %arg4[%c0_12, %c0_13] : memref<64x192xbf16, #tpu.memory_space<vmem>>, vector<64x192xbf16>
    %cst_14 = arith.constant dense<0.000000e+00> : vector<16x192xf32>
    %32 = tpu.matmul %26, %31, %cst_14 {dimension_numbers = #tpu.dot_dimension_numbers<[1], [0], [0], [1], [0, 0, 1, 1], [], []>} : vector<16x64xbf16>, vector<64x192xbf16>, vector<16x192xf32> -> vector<16x192xf32>
    %33 = arith.addf %30, %32 : vector<16x192xf32>
    %c0_15 = arith.constant 0 : index
    %c0_16 = arith.constant 0 : index
    %34 = vector.load %arg9[%c0_15, %c0_16] : memref<16x192xf32, #tpu.memory_space<vmem>>, vector<16x192xf32>
    tpu.vector_store %arg9[%c0_15, %c0_16], %33 {strides = array<i32>} : memref<16x192xf32, #tpu.memory_space<vmem>>, vector<16x192xf32>,
    %c0_i32_17 = arith.constant 0 : i32
    %35 = arith.cmpi eq, %arg2, %c0_i32_17 : i32
    %36 = arith.extui %35 : i1 to i32
    %c0_i32_18 = arith.constant 0 : i32
    %37 = arith.cmpi ne, %36, %c0_i32_18 : i32
    scf.if %37 {
      %c0_19 = arith.constant 0 : index
      %c0_20 = arith.constant 0 : index
      %38 = vector.load %arg9[%c0_19, %c0_20] : memref<16x192xf32, #tpu.memory_space<vmem>>, vector<16x192xf32>
      %c0_21 = arith.constant 0 : index
      %c0_22 = arith.constant 0 : index
      %39 = vector.load %arg5[%c0_21, %c0_22] : memref<1x192xf32, #tpu.memory_space<vmem>>, vector<1x192xf32>
      %40 = vector.broadcast %39 : vector<1x192xf32> to vector<16x192xf32>
      %41 = arith.addf %38, %40 : vector<16x192xf32>
      %42 = arith.truncf %41 : vector<16x192xf32> to vector<16x192xbf16>
      %c0_23 = arith.constant 0 : index
      %c0_24 = arith.constant 0 : index
      %43 = vector.load %arg8[%c0_23, %c0_24] : memref<16x192xbf16, #tpu.memory_space<vmem>>, vector<16x192xbf16>
      tpu.vector_store %arg8[%c0_23, %c0_24], %42 {strides = array<i32>} : memref<16x192xbf16, #tpu.memory_space<vmem>>, vector<16x192xbf16>,
    } else {
    }
    return
  }
  func.func @transform_0(%arg0: i32, %arg1: i32, %arg2: i32) -> (i32, i32) {
    %c0_i32 = arith.constant 0 : i32
    return %arg0, %arg2 : i32, i32
  }
  func.func @transform_1(%arg0: i32, %arg1: i32, %arg2: i32) -> (i32, i32) {
    %c0_i32 = arith.constant 0 : i32
    return %arg2, %arg1 : i32, i32
  }
  func.func @transform_2(%arg0: i32, %arg1: i32, %arg2: i32) -> (i32, i32) {
    %c0_i32 = arith.constant 0 : i32
    %c0_i32_0 = arith.constant 0 : i32
    return %c0_i32, %arg1 : i32, i32
  }
  func.func @transform_3(%arg0: i32, %arg1: i32, %arg2: i32) -> (i32, i32) {
    %c0_i32 = arith.constant 0 : i32
    %c0_i32_0 = arith.constant 0 : i32
    %c0_i32_1 = arith.constant 0 : i32
    return %c0_i32, %c0_i32_0 : i32, i32
  }
  func.func @transform_4(%arg0: i32, %arg1: i32, %arg2: i32) -> (i32, i32) {
    %c0_i32 = arith.constant 0 : i32
    %c0_i32_0 = arith.constant 0 : i32
    %c0_i32_1 = arith.constant 0 : i32
    return %c0_i32, %c0_i32_0 : i32, i32
  }
  func.func @transform_5(%arg0: i32, %arg1: i32, %arg2: i32) -> (i32, i32) {
    %c0_i32 = arith.constant 0 : i32
    return %arg0, %arg1 : i32, i32
  }
}

module attributes {stable_mosaic.version = 11 : i64} {
  func.func @_headmerge_kernel(%arg0: i32, %arg1: i32, %arg2: i32, %arg3: i32, %arg4: memref<1x1x8x16xbf16, #tpu.memory_space<vmem>>, %arg5: memref<1x16x64xbf16, #tpu.memory_space<vmem>>, %arg6: memref<1x64xf32, #tpu.memory_space<vmem>>, %arg7: memref<1x8x64xbf16, #tpu.memory_space<vmem>>, %arg8: memref<1x8x64xbf16, #tpu.memory_space<vmem>>, %arg9: memref<8x64xf32, #tpu.memory_space<vmem>>) attributes {dimension_semantics = [#tpu.dimension_semantics<parallel>, #tpu.dimension_semantics<parallel>, #tpu.dimension_semantics<parallel>, #tpu.dimension_semantics<arbitrary>], iteration_bounds = array<i64: 2, 1, 1, 4>, scalar_prefetch = 0 : i64, scratch_operands = 1 : i64, tpu.core_type = #tpu.core_type<tc>, window_params = [{transform_indices = @transform_0, window_bounds = array<i64: 1, 1, 8, 16>}, {transform_indices = @transform_1, window_bounds = array<i64: 1, 16, 64>}, {transform_indices = @transform_2, window_bounds = array<i64: 1, 64>}, {transform_indices = @transform_3, window_bounds = array<i64: 1, 8, 64>}, {transform_indices = @transform_4, window_bounds = array<i64: 1, 8, 64>}]} {
    %c0_i32 = arith.constant 0 : i32
    %0 = arith.cmpi eq, %arg3, %c0_i32 : i32
    %1 = arith.extui %0 : i1 to i32
    %c0_i32_0 = arith.constant 0 : i32
    %2 = arith.cmpi ne, %1, %c0_i32_0 : i32
    scf.if %2 {
      %cst_12 = arith.constant 0.000000e+00 : f32
      %14 = vector.broadcast %cst_12 : f32 to vector<8x64xf32>
      %c0_13 = arith.constant 0 : index
      %c0_14 = arith.constant 0 : index
      %15 = vector.load %arg9[%c0_13, %c0_14] : memref<8x64xf32, #tpu.memory_space<vmem>>, vector<8x64xf32>
      tpu.vector_store %arg9[%c0_13, %c0_14], %14 {strides = array<i32>} : memref<8x64xf32, #tpu.memory_space<vmem>>, vector<8x64xf32>,
    } else {
    }
    %c0 = arith.constant 0 : index
    %c0_1 = arith.constant 0 : index
    %3 = vector.load %arg9[%c0, %c0_1] : memref<8x64xf32, #tpu.memory_space<vmem>>, vector<8x64xf32>
    %c0_2 = arith.constant 0 : index
    %c0_3 = arith.constant 0 : index
    %c0_4 = arith.constant 0 : index
    %c0_5 = arith.constant 0 : index
    %4 = vector.load %arg4[%c0_2, %c0_3, %c0_4, %c0_5] : memref<1x1x8x16xbf16, #tpu.memory_space<vmem>>, vector<1x1x8x16xbf16>
    %5 = vector.shape_cast %4 : vector<1x1x8x16xbf16> to vector<8x16xbf16>
    %c0_6 = arith.constant 0 : index
    %c0_7 = arith.constant 0 : index
    %c0_8 = arith.constant 0 : index
    %6 = vector.load %arg5[%c0_6, %c0_7, %c0_8] : memref<1x16x64xbf16, #tpu.memory_space<vmem>>, vector<1x16x64xbf16>
    %7 = vector.shape_cast %6 : vector<1x16x64xbf16> to vector<16x64xbf16>
    %cst = arith.constant dense<0.000000e+00> : vector<8x64xf32>
    %8 = tpu.matmul %5, %7, %cst {dimension_numbers = #tpu.dot_dimension_numbers<[1], [0], [0], [1], [0, 0, 1, 1], [], []>} : vector<8x16xbf16>, vector<16x64xbf16>, vector<8x64xf32> -> vector<8x64xf32>
    %9 = arith.addf %3, %8 : vector<8x64xf32>
    %c0_9 = arith.constant 0 : index
    %c0_10 = arith.constant 0 : index
    %10 = vector.load %arg9[%c0_9, %c0_10] : memref<8x64xf32, #tpu.memory_space<vmem>>, vector<8x64xf32>
    tpu.vector_store %arg9[%c0_9, %c0_10], %9 {strides = array<i32>} : memref<8x64xf32, #tpu.memory_space<vmem>>, vector<8x64xf32>,
    %c3_i32 = arith.constant 3 : i32
    %11 = arith.cmpi eq, %arg3, %c3_i32 : i32
    %12 = arith.extui %11 : i1 to i32
    %c0_i32_11 = arith.constant 0 : i32
    %13 = arith.cmpi ne, %12, %c0_i32_11 : i32
    scf.if %13 {
      %c0_12 = arith.constant 0 : index
      %c0_13 = arith.constant 0 : index
      %14 = vector.load %arg9[%c0_12, %c0_13] : memref<8x64xf32, #tpu.memory_space<vmem>>, vector<8x64xf32>
      %c0_14 = arith.constant 0 : index
      %c0_15 = arith.constant 0 : index
      %15 = vector.load %arg6[%c0_14, %c0_15] : memref<1x64xf32, #tpu.memory_space<vmem>>, vector<1x64xf32>
      %16 = vector.broadcast %15 : vector<1x64xf32> to vector<8x64xf32>
      %17 = arith.addf %14, %16 : vector<8x64xf32>
      %c0_16 = arith.constant 0 : index
      %c0_17 = arith.constant 0 : index
      %c0_18 = arith.constant 0 : index
      %18 = vector.load %arg7[%c0_16, %c0_17, %c0_18] : memref<1x8x64xbf16, #tpu.memory_space<vmem>>, vector<1x8x64xbf16>
      %19 = vector.shape_cast %18 : vector<1x8x64xbf16> to vector<8x64xbf16>
      %20 = arith.extf %19 : vector<8x64xbf16> to vector<8x64xf32>
      %21 = arith.addf %17, %20 : vector<8x64xf32>
      %22 = arith.truncf %21 : vector<8x64xf32> to vector<8x64xbf16>
      %c0_19 = arith.constant 0 : index
      %c0_20 = arith.constant 0 : index
      %c0_21 = arith.constant 0 : index
      %23 = vector.load %arg8[%c0_19, %c0_20, %c0_21] : memref<1x8x64xbf16, #tpu.memory_space<vmem>>, vector<1x8x64xbf16>
      %24 = vector.shape_cast %23 : vector<1x8x64xbf16> to vector<8x64xbf16>
      %25 = vector.shape_cast %22 : vector<8x64xbf16> to vector<1x8x64xbf16>
      tpu.vector_store %arg8[%c0_19, %c0_20, %c0_21], %25 {strides = array<i32>} : memref<1x8x64xbf16, #tpu.memory_space<vmem>>, vector<1x8x64xbf16>,
    } else {
    }
    return
  }
  func.func @transform_0(%arg0: i32, %arg1: i32, %arg2: i32, %arg3: i32) -> (i32, i32, i32, i32) {
    %c0_i32 = arith.constant 0 : i32
    %c0_i32_0 = arith.constant 0 : i32
    return %arg0, %arg3, %arg1, %c0_i32 : i32, i32, i32, i32
  }
  func.func @transform_1(%arg0: i32, %arg1: i32, %arg2: i32, %arg3: i32) -> (i32, i32, i32) {
    %c0_i32 = arith.constant 0 : i32
    %c0_i32_0 = arith.constant 0 : i32
    return %arg3, %c0_i32, %arg2 : i32, i32, i32
  }
  func.func @transform_2(%arg0: i32, %arg1: i32, %arg2: i32, %arg3: i32) -> (i32, i32) {
    %c0_i32 = arith.constant 0 : i32
    %c0_i32_0 = arith.constant 0 : i32
    return %c0_i32, %arg2 : i32, i32
  }
  func.func @transform_3(%arg0: i32, %arg1: i32, %arg2: i32, %arg3: i32) -> (i32, i32, i32) {
    %c0_i32 = arith.constant 0 : i32
    return %arg0, %arg1, %arg2 : i32, i32, i32
  }
  func.func @transform_4(%arg0: i32, %arg1: i32, %arg2: i32, %arg3: i32) -> (i32, i32, i32) {
    %c0_i32 = arith.constant 0 : i32
    return %arg0, %arg1, %arg2 : i32, i32, i32
  }
}

module attributes {stable_mosaic.version = 11 : i64} {
  func.func @_flash_attn_kernel(%arg0: i32, %arg1: i32, %arg2: i32, %arg3: i32, %arg4: memref<1x1x1x8x16xbf16, #tpu.memory_space<vmem>>, %arg5: memref<1x1x1x8x16xbf16, #tpu.memory_space<vmem>>, %arg6: memref<1x1x1x8x16xbf16, #tpu.memory_space<vmem>>, %arg7: memref<1x8x8xi32, #tpu.memory_space<vmem>>, %arg8: memref<1x1x8x16xbf16, #tpu.memory_space<vmem>>, %arg9: memref<8x1xf32, #tpu.memory_space<vmem>>, %arg10: memref<8x1xf32, #tpu.memory_space<vmem>>, %arg11: memref<8x16xf32, #tpu.memory_space<vmem>>) attributes {dimension_semantics = [#tpu.dimension_semantics<parallel>, #tpu.dimension_semantics<parallel>, #tpu.dimension_semantics<parallel>, #tpu.dimension_semantics<arbitrary>], iteration_bounds = array<i64: 2, 4, 1, 1>, scalar_prefetch = 0 : i64, scratch_operands = 3 : i64, tpu.core_type = #tpu.core_type<tc>, window_params = [{transform_indices = @transform_0, window_bounds = array<i64: 1, 1, 1, 8, 16>}, {transform_indices = @transform_1, window_bounds = array<i64: 1, 1, 1, 8, 16>}, {transform_indices = @transform_2, window_bounds = array<i64: 1, 1, 1, 8, 16>}, {transform_indices = @transform_3, window_bounds = array<i64: 1, 8, 8>}, {transform_indices = @transform_4, window_bounds = array<i64: 1, 1, 8, 16>}]} {
    %c0_i32 = arith.constant 0 : i32
    %0 = arith.cmpi eq, %arg3, %c0_i32 : i32
    %1 = arith.extui %0 : i1 to i32
    %c0_i32_0 = arith.constant 0 : i32
    %2 = arith.cmpi ne, %1, %c0_i32_0 : i32
    scf.if %2 {
      %cst_38 = arith.constant 0xFF800000 : f32
      %45 = vector.broadcast %cst_38 : f32 to vector<8x1xf32>
      %c0_39 = arith.constant 0 : index
      %c0_40 = arith.constant 0 : index
      %46 = vector.load %arg9[%c0_39, %c0_40] : memref<8x1xf32, #tpu.memory_space<vmem>>, vector<8x1xf32>
      tpu.vector_store %arg9[%c0_39, %c0_40], %45 {strides = array<i32>} : memref<8x1xf32, #tpu.memory_space<vmem>>, vector<8x1xf32>,
      %cst_41 = arith.constant 0.000000e+00 : f32
      %47 = vector.broadcast %cst_41 : f32 to vector<8x1xf32>
      %c0_42 = arith.constant 0 : index
      %c0_43 = arith.constant 0 : index
      %48 = vector.load %arg10[%c0_42, %c0_43] : memref<8x1xf32, #tpu.memory_space<vmem>>, vector<8x1xf32>
      tpu.vector_store %arg10[%c0_42, %c0_43], %47 {strides = array<i32>} : memref<8x1xf32, #tpu.memory_space<vmem>>, vector<8x1xf32>,
      %cst_44 = arith.constant 0.000000e+00 : f32
      %49 = vector.broadcast %cst_44 : f32 to vector<8x16xf32>
      %c0_45 = arith.constant 0 : index
      %c0_46 = arith.constant 0 : index
      %50 = vector.load %arg11[%c0_45, %c0_46] : memref<8x16xf32, #tpu.memory_space<vmem>>, vector<8x16xf32>
      tpu.vector_store %arg11[%c0_45, %c0_46], %49 {strides = array<i32>} : memref<8x16xf32, #tpu.memory_space<vmem>>, vector<8x16xf32>,
    } else {
    }
    %c0 = arith.constant 0 : index
    %c0_1 = arith.constant 0 : index
    %c0_2 = arith.constant 0 : index
    %c0_3 = arith.constant 0 : index
    %c0_4 = arith.constant 0 : index
    %3 = vector.load %arg4[%c0, %c0_1, %c0_2, %c0_3, %c0_4] : memref<1x1x1x8x16xbf16, #tpu.memory_space<vmem>>, vector<1x1x1x8x16xbf16>
    %4 = vector.shape_cast %3 : vector<1x1x1x8x16xbf16> to vector<8x16xbf16>
    %c0_5 = arith.constant 0 : index
    %c0_6 = arith.constant 0 : index
    %c0_7 = arith.constant 0 : index
    %c0_8 = arith.constant 0 : index
    %c0_9 = arith.constant 0 : index
    %5 = vector.load %arg5[%c0_5, %c0_6, %c0_7, %c0_8, %c0_9] : memref<1x1x1x8x16xbf16, #tpu.memory_space<vmem>>, vector<1x1x1x8x16xbf16>
    %6 = vector.shape_cast %5 : vector<1x1x1x8x16xbf16> to vector<8x16xbf16>
    %7 = tpu.transpose %6, [1, 0] : vector<8x16xbf16> -> vector<16x8xbf16>
    %cst = arith.constant dense<0.000000e+00> : vector<8x8xf32>
    %8 = tpu.matmul %4, %7, %cst {dimension_numbers = #tpu.dot_dimension_numbers<[1], [0], [0], [1], [0, 0, 1, 1], [], []>} : vector<8x16xbf16>, vector<16x8xbf16>, vector<8x8xf32> -> vector<8x8xf32>
    %cst_10 = arith.constant 2.500000e-01 : f32
    %9 = vector.broadcast %cst_10 : f32 to vector<8x8xf32>
    %10 = arith.mulf %8, %9 : vector<8x8xf32>
    %c0_11 = arith.constant 0 : index
    %c0_12 = arith.constant 0 : index
    %c0_13 = arith.constant 0 : index
    %11 = vector.load %arg7[%c0_11, %c0_12, %c0_13] : memref<1x8x8xi32, #tpu.memory_space<vmem>>, vector<1x8x8xi32>
    %12 = vector.shape_cast %11 : vector<1x8x8xi32> to vector<8x8xi32>
    %c0_i32_14 = arith.constant 0 : i32
    %13 = vector.broadcast %c0_i32_14 : i32 to vector<8x8xi32>
    %14 = arith.cmpi ne, %12, %13 : vector<8x8xi32>
    %cst_15 = arith.constant -1.000000e+09 : f32
    %15 = vector.broadcast %cst_15 : f32 to vector<8x8xf32>
    %16 = arith.select %14, %10, %15 : vector<8x8xi1>, vector<8x8xf32>
    %c0_16 = arith.constant 0 : index
    %c0_17 = arith.constant 0 : index
    %17 = vector.load %arg9[%c0_16, %c0_17] : memref<8x1xf32, #tpu.memory_space<vmem>>, vector<8x1xf32>
    %cst_18 = arith.constant dense<0xFF800000> : vector<8xf32>
    %18 = vector.multi_reduction <maximumf>, %16, %cst_18 [1] : vector<8x8xf32> to vector<8xf32>
    %19 = vector.shape_cast %18 : vector<8xf32> to vector<8x1xf32>
    %20 = arith.maximumf %17, %19 : vector<8x1xf32>
    %21 = arith.subf %17, %20 : vector<8x1xf32>
    %22 = math.exp %21 : vector<8x1xf32>
    %23 = vector.broadcast %20 : vector<8x1xf32> to vector<8x8xf32>
    %24 = arith.subf %16, %23 : vector<8x8xf32>
    %25 = math.exp %24 : vector<8x8xf32>
    %c0_19 = arith.constant 0 : index
    %c0_20 = arith.constant 0 : index
    %26 = vector.load %arg10[%c0_19, %c0_20] : memref<8x1xf32, #tpu.memory_space<vmem>>, vector<8x1xf32>
    %27 = arith.mulf %22, %26 : vector<8x1xf32>
    %cst_21 = arith.constant dense<0.000000e+00> : vector<8xf32>
    %28 = vector.multi_reduction <add>, %25, %cst_21 [1] : vector<8x8xf32> to vector<8xf32>
    %29 = vector.shape_cast %28 : vector<8xf32> to vector<8x1xf32>
    %30 = arith.addf %27, %29 : vector<8x1xf32>
    %c0_22 = arith.constant 0 : index
    %c0_23 = arith.constant 0 : index
    %31 = vector.load %arg10[%c0_22, %c0_23] : memref<8x1xf32, #tpu.memory_space<vmem>>, vector<8x1xf32>
    tpu.vector_store %arg10[%c0_22, %c0_23], %30 {strides = array<i32>} : memref<8x1xf32, #tpu.memory_space<vmem>>, vector<8x1xf32>,
    %c0_24 = arith.constant 0 : index
    %c0_25 = arith.constant 0 : index
    %32 = vector.load %arg11[%c0_24, %c0_25] : memref<8x16xf32, #tpu.memory_space<vmem>>, vector<8x16xf32>
    %33 = vector.broadcast %22 : vector<8x1xf32> to vector<8x16xf32>
    %34 = arith.mulf %33, %32 : vector<8x16xf32>
    %35 = arith.truncf %25 : vector<8x8xf32> to vector<8x8xbf16>
    %c0_26 = arith.constant 0 : index
    %c0_27 = arith.constant 0 : index
    %c0_28 = arith.constant 0 : index
    %c0_29 = arith.constant 0 : index
    %c0_30 = arith.constant 0 : index
    %36 = vector.load %arg6[%c0_26, %c0_27, %c0_28, %c0_29, %c0_30] : memref<1x1x1x8x16xbf16, #tpu.memory_space<vmem>>, vector<1x1x1x8x16xbf16>
    %37 = vector.shape_cast %36 : vector<1x1x1x8x16xbf16> to vector<8x16xbf16>
    %cst_31 = arith.constant dense<0.000000e+00> : vector<8x16xf32>
    %38 = tpu.matmul %35, %37, %cst_31 {dimension_numbers = #tpu.dot_dimension_numbers<[1], [0], [0], [1], [0, 0, 1, 1], [], []>} : vector<8x8xbf16>, vector<8x16xbf16>, vector<8x16xf32> -> vector<8x16xf32>
    %39 = arith.addf %34, %38 : vector<8x16xf32>
    %c0_32 = arith.constant 0 : index
    %c0_33 = arith.constant 0 : index
    %40 = vector.load %arg11[%c0_32, %c0_33] : memref<8x16xf32, #tpu.memory_space<vmem>>, vector<8x16xf32>
    tpu.vector_store %arg11[%c0_32, %c0_33], %39 {strides = array<i32>} : memref<8x16xf32, #tpu.memory_space<vmem>>, vector<8x16xf32>,
    %c0_34 = arith.constant 0 : index
    %c0_35 = arith.constant 0 : index
    %41 = vector.load %arg9[%c0_34, %c0_35] : memref<8x1xf32, #tpu.memory_space<vmem>>, vector<8x1xf32>
    tpu.vector_store %arg9[%c0_34, %c0_35], %20 {strides = array<i32>} : memref<8x1xf32, #tpu.memory_space<vmem>>, vector<8x1xf32>,
    %c0_i32_36 = arith.constant 0 : i32
    %42 = arith.cmpi eq, %arg3, %c0_i32_36 : i32
    %43 = arith.extui %42 : i1 to i32
    %c0_i32_37 = arith.constant 0 : i32
    %44 = arith.cmpi ne, %43, %c0_i32_37 : i32
    scf.if %44 {
      %c0_38 = arith.constant 0 : index
      %c0_39 = arith.constant 0 : index
      %45 = vector.load %arg11[%c0_38, %c0_39] : memref<8x16xf32, #tpu.memory_space<vmem>>, vector<8x16xf32>
      %c0_40 = arith.constant 0 : index
      %c0_41 = arith.constant 0 : index
      %46 = vector.load %arg10[%c0_40, %c0_41] : memref<8x1xf32, #tpu.memory_space<vmem>>, vector<8x1xf32>
      %47 = vector.broadcast %46 : vector<8x1xf32> to vector<8x16xf32>
      %48 = arith.divf %45, %47 : vector<8x16xf32>
      %49 = arith.truncf %48 : vector<8x16xf32> to vector<8x16xbf16>
      %c0_42 = arith.constant 0 : index
      %c0_43 = arith.constant 0 : index
      %c0_44 = arith.constant 0 : index
      %c0_45 = arith.constant 0 : index
      %50 = vector.load %arg8[%c0_42, %c0_43, %c0_44, %c0_45] : memref<1x1x8x16xbf16, #tpu.memory_space<vmem>>, vector<1x1x8x16xbf16>
      %51 = vector.shape_cast %50 : vector<1x1x8x16xbf16> to vector<8x16xbf16>
      %52 = vector.shape_cast %49 : vector<8x16xbf16> to vector<1x1x8x16xbf16>
      tpu.vector_store %arg8[%c0_42, %c0_43, %c0_44, %c0_45], %52 {strides = array<i32>} : memref<1x1x8x16xbf16, #tpu.memory_space<vmem>>, vector<1x1x8x16xbf16>,
    } else {
    }
    return
  }
  func.func @transform_0(%arg0: i32, %arg1: i32, %arg2: i32, %arg3: i32) -> (i32, i32, i32, i32, i32) {
    %c0_i32 = arith.constant 0 : i32
    %c0_i32_0 = arith.constant 0 : i32
    %c0_i32_1 = arith.constant 0 : i32
    return %arg0, %c0_i32, %arg1, %arg2, %c0_i32_0 : i32, i32, i32, i32, i32
  }
  func.func @transform_1(%arg0: i32, %arg1: i32, %arg2: i32, %arg3: i32) -> (i32, i32, i32, i32, i32) {
    %c1_i32 = arith.constant 1 : i32
    %c0_i32 = arith.constant 0 : i32
    %c0_i32_0 = arith.constant 0 : i32
    return %arg0, %c1_i32, %arg1, %arg3, %c0_i32 : i32, i32, i32, i32, i32
  }
  func.func @transform_2(%arg0: i32, %arg1: i32, %arg2: i32, %arg3: i32) -> (i32, i32, i32, i32, i32) {
    %c2_i32 = arith.constant 2 : i32
    %c0_i32 = arith.constant 0 : i32
    %c0_i32_0 = arith.constant 0 : i32
    return %arg0, %c2_i32, %arg1, %arg3, %c0_i32 : i32, i32, i32, i32, i32
  }
  func.func @transform_3(%arg0: i32, %arg1: i32, %arg2: i32, %arg3: i32) -> (i32, i32, i32) {
    %c0_i32 = arith.constant 0 : i32
    return %arg0, %arg2, %arg3 : i32, i32, i32
  }
  func.func @transform_4(%arg0: i32, %arg1: i32, %arg2: i32, %arg3: i32) -> (i32, i32, i32, i32) {
    %c0_i32 = arith.constant 0 : i32
    %c0_i32_0 = arith.constant 0 : i32
    return %arg0, %arg1, %arg2, %c0_i32 : i32, i32, i32, i32
  }
}

module attributes {stable_mosaic.version = 11 : i64} {
  func.func @_linear_kernel(%arg0: i32, %arg1: i32, %arg2: i32, %arg3: memref<16x64xbf16, #tpu.memory_space<vmem>>, %arg4: memref<64x64xbf16, #tpu.memory_space<vmem>>, %arg5: memref<1x64xf32, #tpu.memory_space<vmem>>, %arg6: memref<1x64xf32, #tpu.memory_space<vmem>>, %arg7: memref<1x64xf32, #tpu.memory_space<vmem>>, %arg8: memref<16x64xbf16, #tpu.memory_space<vmem>>, %arg9: memref<16x64xf32, #tpu.memory_space<vmem>>) attributes {dimension_semantics = [#tpu.dimension_semantics<parallel>, #tpu.dimension_semantics<parallel>, #tpu.dimension_semantics<arbitrary>], iteration_bounds = array<i64: 1, 1, 1>, scalar_prefetch = 0 : i64, scratch_operands = 1 : i64, tpu.core_type = #tpu.core_type<tc>, window_params = [{transform_indices = @transform_0, window_bounds = array<i64: 16, 64>}, {transform_indices = @transform_1, window_bounds = array<i64: 64, 64>}, {transform_indices = @transform_2, window_bounds = array<i64: 1, 64>}, {pipeline_mode = #tpu.pipeline_mode<synchronous>, transform_indices = @transform_3, window_bounds = array<i64: 1, 64>}, {pipeline_mode = #tpu.pipeline_mode<synchronous>, transform_indices = @transform_4, window_bounds = array<i64: 1, 64>}, {transform_indices = @transform_5, window_bounds = array<i64: 16, 64>}]} {
    %c0 = arith.constant 0 : index
    %c0_0 = arith.constant 0 : index
    %0 = vector.load %arg3[%c0, %c0_0] : memref<16x64xbf16, #tpu.memory_space<vmem>>, vector<16x64xbf16>
    %1 = arith.extf %0 : vector<16x64xbf16> to vector<16x64xf32>
    %cst = arith.constant dense<0.000000e+00> : vector<16xf32>
    %2 = vector.multi_reduction <add>, %1, %cst [1] : vector<16x64xf32> to vector<16xf32>
    %3 = vector.shape_cast %2 : vector<16xf32> to vector<16x1xf32>
    %cst_1 = arith.constant 6.400000e+01 : f32
    %4 = vector.broadcast %cst_1 : f32 to vector<16x1xf32>
    %5 = arith.divf %3, %4 : vector<16x1xf32>
    %6 = vector.broadcast %5 : vector<16x1xf32> to vector<16x64xf32>
    %7 = arith.subf %1, %6 : vector<16x64xf32>
    %8 = arith.mulf %7, %7 : vector<16x64xf32>
    %cst_2 = arith.constant dense<0.000000e+00> : vector<16xf32>
    %9 = vector.multi_reduction <add>, %8, %cst_2 [1] : vector<16x64xf32> to vector<16xf32>
    %10 = vector.shape_cast %9 : vector<16xf32> to vector<16x1xf32>
    %cst_3 = arith.constant 6.400000e+01 : f32
    %11 = vector.broadcast %cst_3 : f32 to vector<16x1xf32>
    %12 = arith.divf %10, %11 : vector<16x1xf32>
    %13 = vector.broadcast %5 : vector<16x1xf32> to vector<16x64xf32>
    %14 = arith.subf %1, %13 : vector<16x64xf32>
    %cst_4 = arith.constant 9.99999997E-7 : f32
    %15 = vector.broadcast %cst_4 : f32 to vector<16x1xf32>
    %16 = arith.addf %12, %15 : vector<16x1xf32>
    %17 = math.rsqrt %16 : vector<16x1xf32>
    %18 = vector.broadcast %17 : vector<16x1xf32> to vector<16x64xf32>
    %19 = arith.mulf %14, %18 : vector<16x64xf32>
    %c0_5 = arith.constant 0 : index
    %c0_6 = arith.constant 0 : index
    %20 = vector.load %arg6[%c0_5, %c0_6] : memref<1x64xf32, #tpu.memory_space<vmem>>, vector<1x64xf32>
    %21 = vector.broadcast %20 : vector<1x64xf32> to vector<16x64xf32>
    %22 = arith.mulf %19, %21 : vector<16x64xf32>
    %c0_7 = arith.constant 0 : index
    %c0_8 = arith.constant 0 : index
    %23 = vector.load %arg7[%c0_7, %c0_8] : memref<1x64xf32, #tpu.memory_space<vmem>>, vector<1x64xf32>
    %24 = vector.broadcast %23 : vector<1x64xf32> to vector<16x64xf32>
    %25 = arith.addf %22, %24 : vector<16x64xf32>
    %26 = arith.truncf %25 : vector<16x64xf32> to vector<16x64xbf16>
    %c0_i32 = arith.constant 0 : i32
    %27 = arith.cmpi eq, %arg2, %c0_i32 : i32
    %28 = arith.extui %27 : i1 to i32
    %c0_i32_9 = arith.constant 0 : i32
    %29 = arith.cmpi ne, %28, %c0_i32_9 : i32
    scf.if %29 {
      %cst_19 = arith.constant 0.000000e+00 : f32
      %38 = vector.broadcast %cst_19 : f32 to vector<16x64xf32>
      %c0_20 = arith.constant 0 : index
      %c0_21 = arith.constant 0 : index
      %39 = vector.load %arg9[%c0_20, %c0_21] : memref<16x64xf32, #tpu.memory_space<vmem>>, vector<16x64xf32>
      tpu.vector_store %arg9[%c0_20, %c0_21], %38 {strides = array<i32>} : memref<16x64xf32, #tpu.memory_space<vmem>>, vector<16x64xf32>,
    } else {
    }
    %c0_10 = arith.constant 0 : index
    %c0_11 = arith.constant 0 : index
    %30 = vector.load %arg9[%c0_10, %c0_11] : memref<16x64xf32, #tpu.memory_space<vmem>>, vector<16x64xf32>
    %c0_12 = arith.constant 0 : index
    %c0_13 = arith.constant 0 : index
    %31 = vector.load %arg4[%c0_12, %c0_13] : memref<64x64xbf16, #tpu.memory_space<vmem>>, vector<64x64xbf16>
    %cst_14 = arith.constant dense<0.000000e+00> : vector<16x64xf32>
    %32 = tpu.matmul %26, %31, %cst_14 {dimension_numbers = #tpu.dot_dimension_numbers<[1], [0], [0], [1], [0, 0, 1, 1], [], []>} : vector<16x64xbf16>, vector<64x64xbf16>, vector<16x64xf32> -> vector<16x64xf32>
    %33 = arith.addf %30, %32 : vector<16x64xf32>
    %c0_15 = arith.constant 0 : index
    %c0_16 = arith.constant 0 : index
    %34 = vector.load %arg9[%c0_15, %c0_16] : memref<16x64xf32, #tpu.memory_space<vmem>>, vector<16x64xf32>
    tpu.vector_store %arg9[%c0_15, %c0_16], %33 {strides = array<i32>} : memref<16x64xf32, #tpu.memory_space<vmem>>, vector<16x64xf32>,
    %c0_i32_17 = arith.constant 0 : i32
    %35 = arith.cmpi eq, %arg2, %c0_i32_17 : i32
    %36 = arith.extui %35 : i1 to i32
    %c0_i32_18 = arith.constant 0 : i32
    %37 = arith.cmpi ne, %36, %c0_i32_18 : i32
    scf.if %37 {
      %c0_19 = arith.constant 0 : index
      %c0_20 = arith.constant 0 : index
      %38 = vector.load %arg9[%c0_19, %c0_20] : memref<16x64xf32, #tpu.memory_space<vmem>>, vector<16x64xf32>
      %c0_21 = arith.constant 0 : index
      %c0_22 = arith.constant 0 : index
      %39 = vector.load %arg5[%c0_21, %c0_22] : memref<1x64xf32, #tpu.memory_space<vmem>>, vector<1x64xf32>
      %40 = vector.broadcast %39 : vector<1x64xf32> to vector<16x64xf32>
      %41 = arith.addf %38, %40 : vector<16x64xf32>
      %42 = arith.truncf %41 : vector<16x64xf32> to vector<16x64xbf16>
      %c0_23 = arith.constant 0 : index
      %c0_24 = arith.constant 0 : index
      %43 = vector.load %arg8[%c0_23, %c0_24] : memref<16x64xbf16, #tpu.memory_space<vmem>>, vector<16x64xbf16>
      tpu.vector_store %arg8[%c0_23, %c0_24], %42 {strides = array<i32>} : memref<16x64xbf16, #tpu.memory_space<vmem>>, vector<16x64xbf16>,
    } else {
    }
    return
  }
  func.func @transform_0(%arg0: i32, %arg1: i32, %arg2: i32) -> (i32, i32) {
    %c0_i32 = arith.constant 0 : i32
    return %arg0, %arg2 : i32, i32
  }
  func.func @transform_1(%arg0: i32, %arg1: i32, %arg2: i32) -> (i32, i32) {
    %c0_i32 = arith.constant 0 : i32
    return %arg2, %arg1 : i32, i32
  }
  func.func @transform_2(%arg0: i32, %arg1: i32, %arg2: i32) -> (i32, i32) {
    %c0_i32 = arith.constant 0 : i32
    %c0_i32_0 = arith.constant 0 : i32
    return %c0_i32, %arg1 : i32, i32
  }
  func.func @transform_3(%arg0: i32, %arg1: i32, %arg2: i32) -> (i32, i32) {
    %c0_i32 = arith.constant 0 : i32
    %c0_i32_0 = arith.constant 0 : i32
    %c0_i32_1 = arith.constant 0 : i32
    return %c0_i32, %c0_i32_0 : i32, i32
  }
  func.func @transform_4(%arg0: i32, %arg1: i32, %arg2: i32) -> (i32, i32) {
    %c0_i32 = arith.constant 0 : i32
    %c0_i32_0 = arith.constant 0 : i32
    %c0_i32_1 = arith.constant 0 : i32
    return %c0_i32, %c0_i32_0 : i32, i32
  }
  func.func @transform_5(%arg0: i32, %arg1: i32, %arg2: i32) -> (i32, i32) {
    %c0_i32 = arith.constant 0 : i32
    return %arg0, %arg1 : i32, i32
  }
}

module attributes {stable_mosaic.version = 11 : i64} {
  func.func @_linear_kernel(%arg0: i32, %arg1: i32, %arg2: i32, %arg3: memref<16x64xbf16, #tpu.memory_space<vmem>>, %arg4: memref<64x128xbf16, #tpu.memory_space<vmem>>, %arg5: memref<1x128xf32, #tpu.memory_space<vmem>>, %arg6: memref<1x64xf32, #tpu.memory_space<vmem>>, %arg7: memref<1x64xf32, #tpu.memory_space<vmem>>, %arg8: memref<16x128xbf16, #tpu.memory_space<vmem>>, %arg9: memref<16x128xf32, #tpu.memory_space<vmem>>) attributes {dimension_semantics = [#tpu.dimension_semantics<parallel>, #tpu.dimension_semantics<parallel>, #tpu.dimension_semantics<arbitrary>], iteration_bounds = array<i64: 1, 1, 1>, scalar_prefetch = 0 : i64, scratch_operands = 1 : i64, tpu.core_type = #tpu.core_type<tc>, window_params = [{transform_indices = @transform_0, window_bounds = array<i64: 16, 64>}, {transform_indices = @transform_1, window_bounds = array<i64: 64, 128>}, {transform_indices = @transform_2, window_bounds = array<i64: 1, 128>}, {pipeline_mode = #tpu.pipeline_mode<synchronous>, transform_indices = @transform_3, window_bounds = array<i64: 1, 64>}, {pipeline_mode = #tpu.pipeline_mode<synchronous>, transform_indices = @transform_4, window_bounds = array<i64: 1, 64>}, {transform_indices = @transform_5, window_bounds = array<i64: 16, 128>}]} {
    %c0 = arith.constant 0 : index
    %c0_0 = arith.constant 0 : index
    %0 = vector.load %arg3[%c0, %c0_0] : memref<16x64xbf16, #tpu.memory_space<vmem>>, vector<16x64xbf16>
    %1 = arith.extf %0 : vector<16x64xbf16> to vector<16x64xf32>
    %cst = arith.constant dense<0.000000e+00> : vector<16xf32>
    %2 = vector.multi_reduction <add>, %1, %cst [1] : vector<16x64xf32> to vector<16xf32>
    %3 = vector.shape_cast %2 : vector<16xf32> to vector<16x1xf32>
    %cst_1 = arith.constant 6.400000e+01 : f32
    %4 = vector.broadcast %cst_1 : f32 to vector<16x1xf32>
    %5 = arith.divf %3, %4 : vector<16x1xf32>
    %6 = vector.broadcast %5 : vector<16x1xf32> to vector<16x64xf32>
    %7 = arith.subf %1, %6 : vector<16x64xf32>
    %8 = arith.mulf %7, %7 : vector<16x64xf32>
    %cst_2 = arith.constant dense<0.000000e+00> : vector<16xf32>
    %9 = vector.multi_reduction <add>, %8, %cst_2 [1] : vector<16x64xf32> to vector<16xf32>
    %10 = vector.shape_cast %9 : vector<16xf32> to vector<16x1xf32>
    %cst_3 = arith.constant 6.400000e+01 : f32
    %11 = vector.broadcast %cst_3 : f32 to vector<16x1xf32>
    %12 = arith.divf %10, %11 : vector<16x1xf32>
    %13 = vector.broadcast %5 : vector<16x1xf32> to vector<16x64xf32>
    %14 = arith.subf %1, %13 : vector<16x64xf32>
    %cst_4 = arith.constant 9.99999997E-7 : f32
    %15 = vector.broadcast %cst_4 : f32 to vector<16x1xf32>
    %16 = arith.addf %12, %15 : vector<16x1xf32>
    %17 = math.rsqrt %16 : vector<16x1xf32>
    %18 = vector.broadcast %17 : vector<16x1xf32> to vector<16x64xf32>
    %19 = arith.mulf %14, %18 : vector<16x64xf32>
    %c0_5 = arith.constant 0 : index
    %c0_6 = arith.constant 0 : index
    %20 = vector.load %arg6[%c0_5, %c0_6] : memref<1x64xf32, #tpu.memory_space<vmem>>, vector<1x64xf32>
    %21 = vector.broadcast %20 : vector<1x64xf32> to vector<16x64xf32>
    %22 = arith.mulf %19, %21 : vector<16x64xf32>
    %c0_7 = arith.constant 0 : index
    %c0_8 = arith.constant 0 : index
    %23 = vector.load %arg7[%c0_7, %c0_8] : memref<1x64xf32, #tpu.memory_space<vmem>>, vector<1x64xf32>
    %24 = vector.broadcast %23 : vector<1x64xf32> to vector<16x64xf32>
    %25 = arith.addf %22, %24 : vector<16x64xf32>
    %26 = arith.truncf %25 : vector<16x64xf32> to vector<16x64xbf16>
    %c0_i32 = arith.constant 0 : i32
    %27 = arith.cmpi eq, %arg2, %c0_i32 : i32
    %28 = arith.extui %27 : i1 to i32
    %c0_i32_9 = arith.constant 0 : i32
    %29 = arith.cmpi ne, %28, %c0_i32_9 : i32
    scf.if %29 {
      %cst_19 = arith.constant 0.000000e+00 : f32
      %38 = vector.broadcast %cst_19 : f32 to vector<16x128xf32>
      %c0_20 = arith.constant 0 : index
      %c0_21 = arith.constant 0 : index
      %39 = vector.load %arg9[%c0_20, %c0_21] : memref<16x128xf32, #tpu.memory_space<vmem>>, vector<16x128xf32>
      tpu.vector_store %arg9[%c0_20, %c0_21], %38 {strides = array<i32>} : memref<16x128xf32, #tpu.memory_space<vmem>>, vector<16x128xf32>,
    } else {
    }
    %c0_10 = arith.constant 0 : index
    %c0_11 = arith.constant 0 : index
    %30 = vector.load %arg9[%c0_10, %c0_11] : memref<16x128xf32, #tpu.memory_space<vmem>>, vector<16x128xf32>
    %c0_12 = arith.constant 0 : index
    %c0_13 = arith.constant 0 : index
    %31 = vector.load %arg4[%c0_12, %c0_13] : memref<64x128xbf16, #tpu.memory_space<vmem>>, vector<64x128xbf16>
    %cst_14 = arith.constant dense<0.000000e+00> : vector<16x128xf32>
    %32 = tpu.matmul %26, %31, %cst_14 {dimension_numbers = #tpu.dot_dimension_numbers<[1], [0], [0], [1], [0, 0, 1, 1], [], []>} : vector<16x64xbf16>, vector<64x128xbf16>, vector<16x128xf32> -> vector<16x128xf32>
    %33 = arith.addf %30, %32 : vector<16x128xf32>
    %c0_15 = arith.constant 0 : index
    %c0_16 = arith.constant 0 : index
    %34 = vector.load %arg9[%c0_15, %c0_16] : memref<16x128xf32, #tpu.memory_space<vmem>>, vector<16x128xf32>
    tpu.vector_store %arg9[%c0_15, %c0_16], %33 {strides = array<i32>} : memref<16x128xf32, #tpu.memory_space<vmem>>, vector<16x128xf32>,
    %c0_i32_17 = arith.constant 0 : i32
    %35 = arith.cmpi eq, %arg2, %c0_i32_17 : i32
    %36 = arith.extui %35 : i1 to i32
    %c0_i32_18 = arith.constant 0 : i32
    %37 = arith.cmpi ne, %36, %c0_i32_18 : i32
    scf.if %37 {
      %c0_19 = arith.constant 0 : index
      %c0_20 = arith.constant 0 : index
      %38 = vector.load %arg9[%c0_19, %c0_20] : memref<16x128xf32, #tpu.memory_space<vmem>>, vector<16x128xf32>
      %c0_21 = arith.constant 0 : index
      %c0_22 = arith.constant 0 : index
      %39 = vector.load %arg5[%c0_21, %c0_22] : memref<1x128xf32, #tpu.memory_space<vmem>>, vector<1x128xf32>
      %40 = vector.broadcast %39 : vector<1x128xf32> to vector<16x128xf32>
      %41 = arith.addf %38, %40 : vector<16x128xf32>
      %cst_23 = arith.constant 0.000000e+00 : f32
      %42 = vector.broadcast %cst_23 : f32 to vector<16x128xf32>
      %43 = arith.maximumf %41, %42 : vector<16x128xf32>
      %44 = arith.truncf %43 : vector<16x128xf32> to vector<16x128xbf16>
      %c0_24 = arith.constant 0 : index
      %c0_25 = arith.constant 0 : index
      %45 = vector.load %arg8[%c0_24, %c0_25] : memref<16x128xbf16, #tpu.memory_space<vmem>>, vector<16x128xbf16>
      tpu.vector_store %arg8[%c0_24, %c0_25], %44 {strides = array<i32>} : memref<16x128xbf16, #tpu.memory_space<vmem>>, vector<16x128xbf16>,
    } else {
    }
    return
  }
  func.func @transform_0(%arg0: i32, %arg1: i32, %arg2: i32) -> (i32, i32) {
    %c0_i32 = arith.constant 0 : i32
    return %arg0, %arg2 : i32, i32
  }
  func.func @transform_1(%arg0: i32, %arg1: i32, %arg2: i32) -> (i32, i32) {
    %c0_i32 = arith.constant 0 : i32
    return %arg2, %arg1 : i32, i32
  }
  func.func @transform_2(%arg0: i32, %arg1: i32, %arg2: i32) -> (i32, i32) {
    %c0_i32 = arith.constant 0 : i32
    %c0_i32_0 = arith.constant 0 : i32
    return %c0_i32, %arg1 : i32, i32
  }
  func.func @transform_3(%arg0: i32, %arg1: i32, %arg2: i32) -> (i32, i32) {
    %c0_i32 = arith.constant 0 : i32
    %c0_i32_0 = arith.constant 0 : i32
    %c0_i32_1 = arith.constant 0 : i32
    return %c0_i32, %c0_i32_0 : i32, i32
  }
  func.func @transform_4(%arg0: i32, %arg1: i32, %arg2: i32) -> (i32, i32) {
    %c0_i32 = arith.constant 0 : i32
    %c0_i32_0 = arith.constant 0 : i32
    %c0_i32_1 = arith.constant 0 : i32
    return %c0_i32, %c0_i32_0 : i32, i32
  }
  func.func @transform_5(%arg0: i32, %arg1: i32, %arg2: i32) -> (i32, i32) {
    %c0_i32 = arith.constant 0 : i32
    return %arg0, %arg1 : i32, i32
  }
}

module attributes {stable_mosaic.version = 11 : i64} {
  func.func @_linear_kernel(%arg0: i32, %arg1: i32, %arg2: i32, %arg3: memref<16x128xbf16, #tpu.memory_space<vmem>>, %arg4: memref<128x64xbf16, #tpu.memory_space<vmem>>, %arg5: memref<1x64xf32, #tpu.memory_space<vmem>>, %arg6: memref<16x64xbf16, #tpu.memory_space<vmem>>, %arg7: memref<16x64xbf16, #tpu.memory_space<vmem>>, %arg8: memref<16x64xf32, #tpu.memory_space<vmem>>) attributes {dimension_semantics = [#tpu.dimension_semantics<parallel>, #tpu.dimension_semantics<parallel>, #tpu.dimension_semantics<arbitrary>], iteration_bounds = array<i64: 1, 1, 1>, scalar_prefetch = 0 : i64, scratch_operands = 1 : i64, tpu.core_type = #tpu.core_type<tc>, window_params = [{transform_indices = @transform_0, window_bounds = array<i64: 16, 128>}, {transform_indices = @transform_1, window_bounds = array<i64: 128, 64>}, {transform_indices = @transform_2, window_bounds = array<i64: 1, 64>}, {transform_indices = @transform_3, window_bounds = array<i64: 16, 64>}, {transform_indices = @transform_4, window_bounds = array<i64: 16, 64>}]} {
    %c0 = arith.constant 0 : index
    %c0_0 = arith.constant 0 : index
    %0 = vector.load %arg3[%c0, %c0_0] : memref<16x128xbf16, #tpu.memory_space<vmem>>, vector<16x128xbf16>
    %c0_i32 = arith.constant 0 : i32
    %1 = arith.cmpi eq, %arg2, %c0_i32 : i32
    %2 = arith.extui %1 : i1 to i32
    %c0_i32_1 = arith.constant 0 : i32
    %3 = arith.cmpi ne, %2, %c0_i32_1 : i32
    scf.if %3 {
      %cst_10 = arith.constant 0.000000e+00 : f32
      %12 = vector.broadcast %cst_10 : f32 to vector<16x64xf32>
      %c0_11 = arith.constant 0 : index
      %c0_12 = arith.constant 0 : index
      %13 = vector.load %arg8[%c0_11, %c0_12] : memref<16x64xf32, #tpu.memory_space<vmem>>, vector<16x64xf32>
      tpu.vector_store %arg8[%c0_11, %c0_12], %12 {strides = array<i32>} : memref<16x64xf32, #tpu.memory_space<vmem>>, vector<16x64xf32>,
    } else {
    }
    %c0_2 = arith.constant 0 : index
    %c0_3 = arith.constant 0 : index
    %4 = vector.load %arg8[%c0_2, %c0_3] : memref<16x64xf32, #tpu.memory_space<vmem>>, vector<16x64xf32>
    %c0_4 = arith.constant 0 : index
    %c0_5 = arith.constant 0 : index
    %5 = vector.load %arg4[%c0_4, %c0_5] : memref<128x64xbf16, #tpu.memory_space<vmem>>, vector<128x64xbf16>
    %cst = arith.constant dense<0.000000e+00> : vector<16x64xf32>
    %6 = tpu.matmul %0, %5, %cst {dimension_numbers = #tpu.dot_dimension_numbers<[1], [0], [0], [1], [0, 0, 1, 1], [], []>} : vector<16x128xbf16>, vector<128x64xbf16>, vector<16x64xf32> -> vector<16x64xf32>
    %7 = arith.addf %4, %6 : vector<16x64xf32>
    %c0_6 = arith.constant 0 : index
    %c0_7 = arith.constant 0 : index
    %8 = vector.load %arg8[%c0_6, %c0_7] : memref<16x64xf32, #tpu.memory_space<vmem>>, vector<16x64xf32>
    tpu.vector_store %arg8[%c0_6, %c0_7], %7 {strides = array<i32>} : memref<16x64xf32, #tpu.memory_space<vmem>>, vector<16x64xf32>,
    %c0_i32_8 = arith.constant 0 : i32
    %9 = arith.cmpi eq, %arg2, %c0_i32_8 : i32
    %10 = arith.extui %9 : i1 to i32
    %c0_i32_9 = arith.constant 0 : i32
    %11 = arith.cmpi ne, %10, %c0_i32_9 : i32
    scf.if %11 {
      %c0_10 = arith.constant 0 : index
      %c0_11 = arith.constant 0 : index
      %12 = vector.load %arg8[%c0_10, %c0_11] : memref<16x64xf32, #tpu.memory_space<vmem>>, vector<16x64xf32>
      %c0_12 = arith.constant 0 : index
      %c0_13 = arith.constant 0 : index
      %13 = vector.load %arg5[%c0_12, %c0_13] : memref<1x64xf32, #tpu.memory_space<vmem>>, vector<1x64xf32>
      %14 = vector.broadcast %13 : vector<1x64xf32> to vector<16x64xf32>
      %15 = arith.addf %12, %14 : vector<16x64xf32>
      %c0_14 = arith.constant 0 : index
      %c0_15 = arith.constant 0 : index
      %16 = vector.load %arg6[%c0_14, %c0_15] : memref<16x64xbf16, #tpu.memory_space<vmem>>, vector<16x64xbf16>
      %17 = arith.extf %16 : vector<16x64xbf16> to vector<16x64xf32>
      %18 = arith.addf %15, %17 : vector<16x64xf32>
      %19 = arith.truncf %18 : vector<16x64xf32> to vector<16x64xbf16>
      %c0_16 = arith.constant 0 : index
      %c0_17 = arith.constant 0 : index
      %20 = vector.load %arg7[%c0_16, %c0_17] : memref<16x64xbf16, #tpu.memory_space<vmem>>, vector<16x64xbf16>
      tpu.vector_store %arg7[%c0_16, %c0_17], %19 {strides = array<i32>} : memref<16x64xbf16, #tpu.memory_space<vmem>>, vector<16x64xbf16>,
    } else {
    }
    return
  }
  func.func @transform_0(%arg0: i32, %arg1: i32, %arg2: i32) -> (i32, i32) {
    %c0_i32 = arith.constant 0 : i32
    return %arg0, %arg2 : i32, i32
  }
  func.func @transform_1(%arg0: i32, %arg1: i32, %arg2: i32) -> (i32, i32) {
    %c0_i32 = arith.constant 0 : i32
    return %arg2, %arg1 : i32, i32
  }
  func.func @transform_2(%arg0: i32, %arg1: i32, %arg2: i32) -> (i32, i32) {
    %c0_i32 = arith.constant 0 : i32
    %c0_i32_0 = arith.constant 0 : i32
    return %c0_i32, %arg1 : i32, i32
  }
  func.func @transform_3(%arg0: i32, %arg1: i32, %arg2: i32) -> (i32, i32) {
    %c0_i32 = arith.constant 0 : i32
    return %arg0, %arg1 : i32, i32
  }
  func.func @transform_4(%arg0: i32, %arg1: i32, %arg2: i32) -> (i32, i32) {
    %c0_i32 = arith.constant 0 : i32
    return %arg0, %arg1 : i32, i32
  }
}

module attributes {stable_mosaic.version = 11 : i64} {
  func.func @_flash_attn_kernel(%arg0: i32, %arg1: i32, %arg2: i32, %arg3: i32, %arg4: memref<1x1x1x8x16xbf16, #tpu.memory_space<vmem>>, %arg5: memref<1x1x1x8x16xbf16, #tpu.memory_space<vmem>>, %arg6: memref<1x1x1x8x16xbf16, #tpu.memory_space<vmem>>, %arg7: memref<1x1x8xi32, #tpu.memory_space<vmem>>, %arg8: memref<1x1x8x16xbf16, #tpu.memory_space<vmem>>, %arg9: memref<8x1xf32, #tpu.memory_space<vmem>>, %arg10: memref<8x1xf32, #tpu.memory_space<vmem>>, %arg11: memref<8x16xf32, #tpu.memory_space<vmem>>) attributes {dimension_semantics = [#tpu.dimension_semantics<parallel>, #tpu.dimension_semantics<parallel>, #tpu.dimension_semantics<parallel>, #tpu.dimension_semantics<arbitrary>], iteration_bounds = array<i64: 2, 4, 1, 1>, scalar_prefetch = 0 : i64, scratch_operands = 3 : i64, tpu.core_type = #tpu.core_type<tc>, window_params = [{transform_indices = @transform_0, window_bounds = array<i64: 1, 1, 1, 8, 16>}, {transform_indices = @transform_1, window_bounds = array<i64: 1, 1, 1, 8, 16>}, {transform_indices = @transform_2, window_bounds = array<i64: 1, 1, 1, 8, 16>}, {transform_indices = @transform_3, window_bounds = array<i64: 1, 1, 8>}, {transform_indices = @transform_4, window_bounds = array<i64: 1, 1, 8, 16>}]} {
    %c0_i32 = arith.constant 0 : i32
    %0 = arith.cmpi eq, %arg3, %c0_i32 : i32
    %1 = arith.extui %0 : i1 to i32
    %c0_i32_0 = arith.constant 0 : i32
    %2 = arith.cmpi ne, %1, %c0_i32_0 : i32
    scf.if %2 {
      %cst_38 = arith.constant 0xFF800000 : f32
      %47 = vector.broadcast %cst_38 : f32 to vector<8x1xf32>
      %c0_39 = arith.constant 0 : index
      %c0_40 = arith.constant 0 : index
      %48 = vector.load %arg9[%c0_39, %c0_40] : memref<8x1xf32, #tpu.memory_space<vmem>>, vector<8x1xf32>
      tpu.vector_store %arg9[%c0_39, %c0_40], %47 {strides = array<i32>} : memref<8x1xf32, #tpu.memory_space<vmem>>, vector<8x1xf32>,
      %cst_41 = arith.constant 0.000000e+00 : f32
      %49 = vector.broadcast %cst_41 : f32 to vector<8x1xf32>
      %c0_42 = arith.constant 0 : index
      %c0_43 = arith.constant 0 : index
      %50 = vector.load %arg10[%c0_42, %c0_43] : memref<8x1xf32, #tpu.memory_space<vmem>>, vector<8x1xf32>
      tpu.vector_store %arg10[%c0_42, %c0_43], %49 {strides = array<i32>} : memref<8x1xf32, #tpu.memory_space<vmem>>, vector<8x1xf32>,
      %cst_44 = arith.constant 0.000000e+00 : f32
      %51 = vector.broadcast %cst_44 : f32 to vector<8x16xf32>
      %c0_45 = arith.constant 0 : index
      %c0_46 = arith.constant 0 : index
      %52 = vector.load %arg11[%c0_45, %c0_46] : memref<8x16xf32, #tpu.memory_space<vmem>>, vector<8x16xf32>
      tpu.vector_store %arg11[%c0_45, %c0_46], %51 {strides = array<i32>} : memref<8x16xf32, #tpu.memory_space<vmem>>, vector<8x16xf32>,
    } else {
    }
    %c0 = arith.constant 0 : index
    %c0_1 = arith.constant 0 : index
    %c0_2 = arith.constant 0 : index
    %c0_3 = arith.constant 0 : index
    %c0_4 = arith.constant 0 : index
    %3 = vector.load %arg4[%c0, %c0_1, %c0_2, %c0_3, %c0_4] : memref<1x1x1x8x16xbf16, #tpu.memory_space<vmem>>, vector<1x1x1x8x16xbf16>
    %4 = vector.shape_cast %3 : vector<1x1x1x8x16xbf16> to vector<8x16xbf16>
    %c0_5 = arith.constant 0 : index
    %c0_6 = arith.constant 0 : index
    %c0_7 = arith.constant 0 : index
    %c0_8 = arith.constant 0 : index
    %c0_9 = arith.constant 0 : index
    %5 = vector.load %arg5[%c0_5, %c0_6, %c0_7, %c0_8, %c0_9] : memref<1x1x1x8x16xbf16, #tpu.memory_space<vmem>>, vector<1x1x1x8x16xbf16>
    %6 = vector.shape_cast %5 : vector<1x1x1x8x16xbf16> to vector<8x16xbf16>
    %7 = tpu.transpose %6, [1, 0] : vector<8x16xbf16> -> vector<16x8xbf16>
    %cst = arith.constant dense<0.000000e+00> : vector<8x8xf32>
    %8 = tpu.matmul %4, %7, %cst {dimension_numbers = #tpu.dot_dimension_numbers<[1], [0], [0], [1], [0, 0, 1, 1], [], []>} : vector<8x16xbf16>, vector<16x8xbf16>, vector<8x8xf32> -> vector<8x8xf32>
    %cst_10 = arith.constant 2.500000e-01 : f32
    %9 = vector.broadcast %cst_10 : f32 to vector<8x8xf32>
    %10 = arith.mulf %8, %9 : vector<8x8xf32>
    %c0_11 = arith.constant 0 : index
    %c0_12 = arith.constant 0 : index
    %c0_13 = arith.constant 0 : index
    %11 = vector.load %arg7[%c0_11, %c0_12, %c0_13] : memref<1x1x8xi32, #tpu.memory_space<vmem>>, vector<1x1x8xi32>
    %12 = vector.shape_cast %11 : vector<1x1x8xi32> to vector<1x8xi32>
    %c0_i32_14 = arith.constant 0 : i32
    %13 = vector.broadcast %c0_i32_14 : i32 to vector<1x8xi32>
    %14 = arith.cmpi ne, %12, %13 : vector<1x8xi32>
    %cst_15 = arith.constant -1.000000e+09 : f32
    %15 = vector.shape_cast %14 : vector<1x8xi1> to vector<1x8xi1>
    %16 = vector.broadcast %15 : vector<1x8xi1> to vector<8x8xi1>
    %17 = vector.broadcast %cst_15 : f32 to vector<8x8xf32>
    %18 = arith.select %16, %10, %17 : vector<8x8xi1>, vector<8x8xf32>
    %c0_16 = arith.constant 0 : index
    %c0_17 = arith.constant 0 : index
    %19 = vector.load %arg9[%c0_16, %c0_17] : memref<8x1xf32, #tpu.memory_space<vmem>>, vector<8x1xf32>
    %cst_18 = arith.constant dense<0xFF800000> : vector<8xf32>
    %20 = vector.multi_reduction <maximumf>, %18, %cst_18 [1] : vector<8x8xf32> to vector<8xf32>
    %21 = vector.shape_cast %20 : vector<8xf32> to vector<8x1xf32>
    %22 = arith.maximumf %19, %21 : vector<8x1xf32>
    %23 = arith.subf %19, %22 : vector<8x1xf32>
    %24 = math.exp %23 : vector<8x1xf32>
    %25 = vector.broadcast %22 : vector<8x1xf32> to vector<8x8xf32>
    %26 = arith.subf %18, %25 : vector<8x8xf32>
    %27 = math.exp %26 : vector<8x8xf32>
    %c0_19 = arith.constant 0 : index
    %c0_20 = arith.constant 0 : index
    %28 = vector.load %arg10[%c0_19, %c0_20] : memref<8x1xf32, #tpu.memory_space<vmem>>, vector<8x1xf32>
    %29 = arith.mulf %24, %28 : vector<8x1xf32>
    %cst_21 = arith.constant dense<0.000000e+00> : vector<8xf32>
    %30 = vector.multi_reduction <add>, %27, %cst_21 [1] : vector<8x8xf32> to vector<8xf32>
    %31 = vector.shape_cast %30 : vector<8xf32> to vector<8x1xf32>
    %32 = arith.addf %29, %31 : vector<8x1xf32>
    %c0_22 = arith.constant 0 : index
    %c0_23 = arith.constant 0 : index
    %33 = vector.load %arg10[%c0_22, %c0_23] : memref<8x1xf32, #tpu.memory_space<vmem>>, vector<8x1xf32>
    tpu.vector_store %arg10[%c0_22, %c0_23], %32 {strides = array<i32>} : memref<8x1xf32, #tpu.memory_space<vmem>>, vector<8x1xf32>,
    %c0_24 = arith.constant 0 : index
    %c0_25 = arith.constant 0 : index
    %34 = vector.load %arg11[%c0_24, %c0_25] : memref<8x16xf32, #tpu.memory_space<vmem>>, vector<8x16xf32>
    %35 = vector.broadcast %24 : vector<8x1xf32> to vector<8x16xf32>
    %36 = arith.mulf %35, %34 : vector<8x16xf32>
    %37 = arith.truncf %27 : vector<8x8xf32> to vector<8x8xbf16>
    %c0_26 = arith.constant 0 : index
    %c0_27 = arith.constant 0 : index
    %c0_28 = arith.constant 0 : index
    %c0_29 = arith.constant 0 : index
    %c0_30 = arith.constant 0 : index
    %38 = vector.load %arg6[%c0_26, %c0_27, %c0_28, %c0_29, %c0_30] : memref<1x1x1x8x16xbf16, #tpu.memory_space<vmem>>, vector<1x1x1x8x16xbf16>
    %39 = vector.shape_cast %38 : vector<1x1x1x8x16xbf16> to vector<8x16xbf16>
    %cst_31 = arith.constant dense<0.000000e+00> : vector<8x16xf32>
    %40 = tpu.matmul %37, %39, %cst_31 {dimension_numbers = #tpu.dot_dimension_numbers<[1], [0], [0], [1], [0, 0, 1, 1], [], []>} : vector<8x8xbf16>, vector<8x16xbf16>, vector<8x16xf32> -> vector<8x16xf32>
    %41 = arith.addf %36, %40 : vector<8x16xf32>
    %c0_32 = arith.constant 0 : index
    %c0_33 = arith.constant 0 : index
    %42 = vector.load %arg11[%c0_32, %c0_33] : memref<8x16xf32, #tpu.memory_space<vmem>>, vector<8x16xf32>
    tpu.vector_store %arg11[%c0_32, %c0_33], %41 {strides = array<i32>} : memref<8x16xf32, #tpu.memory_space<vmem>>, vector<8x16xf32>,
    %c0_34 = arith.constant 0 : index
    %c0_35 = arith.constant 0 : index
    %43 = vector.load %arg9[%c0_34, %c0_35] : memref<8x1xf32, #tpu.memory_space<vmem>>, vector<8x1xf32>
    tpu.vector_store %arg9[%c0_34, %c0_35], %22 {strides = array<i32>} : memref<8x1xf32, #tpu.memory_space<vmem>>, vector<8x1xf32>,
    %c0_i32_36 = arith.constant 0 : i32
    %44 = arith.cmpi eq, %arg3, %c0_i32_36 : i32
    %45 = arith.extui %44 : i1 to i32
    %c0_i32_37 = arith.constant 0 : i32
    %46 = arith.cmpi ne, %45, %c0_i32_37 : i32
    scf.if %46 {
      %c0_38 = arith.constant 0 : index
      %c0_39 = arith.constant 0 : index
      %47 = vector.load %arg11[%c0_38, %c0_39] : memref<8x16xf32, #tpu.memory_space<vmem>>, vector<8x16xf32>
      %c0_40 = arith.constant 0 : index
      %c0_41 = arith.constant 0 : index
      %48 = vector.load %arg10[%c0_40, %c0_41] : memref<8x1xf32, #tpu.memory_space<vmem>>, vector<8x1xf32>
      %49 = vector.broadcast %48 : vector<8x1xf32> to vector<8x16xf32>
      %50 = arith.divf %47, %49 : vector<8x16xf32>
      %51 = arith.truncf %50 : vector<8x16xf32> to vector<8x16xbf16>
      %c0_42 = arith.constant 0 : index
      %c0_43 = arith.constant 0 : index
      %c0_44 = arith.constant 0 : index
      %c0_45 = arith.constant 0 : index
      %52 = vector.load %arg8[%c0_42, %c0_43, %c0_44, %c0_45] : memref<1x1x8x16xbf16, #tpu.memory_space<vmem>>, vector<1x1x8x16xbf16>
      %53 = vector.shape_cast %52 : vector<1x1x8x16xbf16> to vector<8x16xbf16>
      %54 = vector.shape_cast %51 : vector<8x16xbf16> to vector<1x1x8x16xbf16>
      tpu.vector_store %arg8[%c0_42, %c0_43, %c0_44, %c0_45], %54 {strides = array<i32>} : memref<1x1x8x16xbf16, #tpu.memory_space<vmem>>, vector<1x1x8x16xbf16>,
    } else {
    }
    return
  }
  func.func @transform_0(%arg0: i32, %arg1: i32, %arg2: i32, %arg3: i32) -> (i32, i32, i32, i32, i32) {
    %c0_i32 = arith.constant 0 : i32
    %c0_i32_0 = arith.constant 0 : i32
    %c0_i32_1 = arith.constant 0 : i32
    return %arg0, %c0_i32, %arg1, %arg2, %c0_i32_0 : i32, i32, i32, i32, i32
  }
  func.func @transform_1(%arg0: i32, %arg1: i32, %arg2: i32, %arg3: i32) -> (i32, i32, i32, i32, i32) {
    %c1_i32 = arith.constant 1 : i32
    %c0_i32 = arith.constant 0 : i32
    %c0_i32_0 = arith.constant 0 : i32
    return %arg0, %c1_i32, %arg1, %arg3, %c0_i32 : i32, i32, i32, i32, i32
  }
  func.func @transform_2(%arg0: i32, %arg1: i32, %arg2: i32, %arg3: i32) -> (i32, i32, i32, i32, i32) {
    %c2_i32 = arith.constant 2 : i32
    %c0_i32 = arith.constant 0 : i32
    %c0_i32_0 = arith.constant 0 : i32
    return %arg0, %c2_i32, %arg1, %arg3, %c0_i32 : i32, i32, i32, i32, i32
  }
  func.func @transform_3(%arg0: i32, %arg1: i32, %arg2: i32, %arg3: i32) -> (i32, i32, i32) {
    %c0_i32 = arith.constant 0 : i32
    %c0_i32_0 = arith.constant 0 : i32
    return %arg0, %c0_i32, %arg3 : i32, i32, i32
  }
  func.func @transform_4(%arg0: i32, %arg1: i32, %arg2: i32, %arg3: i32) -> (i32, i32, i32, i32) {
    %c0_i32 = arith.constant 0 : i32
    %c0_i32_0 = arith.constant 0 : i32
    return %arg0, %arg1, %arg2, %c0_i32 : i32, i32, i32, i32
  }
}

module attributes {stable_mosaic.version = 11 : i64} {
  func.func @_linear_kernel(%arg0: i32, %arg1: i32, %arg2: i32, %arg3: memref<16x64xbf16, #tpu.memory_space<vmem>>, %arg4: memref<64x128xbf16, #tpu.memory_space<vmem>>, %arg5: memref<1x128xf32, #tpu.memory_space<vmem>>, %arg6: memref<1x64xf32, #tpu.memory_space<vmem>>, %arg7: memref<1x64xf32, #tpu.memory_space<vmem>>, %arg8: memref<16x128xbf16, #tpu.memory_space<vmem>>, %arg9: memref<16x128xf32, #tpu.memory_space<vmem>>) attributes {dimension_semantics = [#tpu.dimension_semantics<parallel>, #tpu.dimension_semantics<parallel>, #tpu.dimension_semantics<arbitrary>], iteration_bounds = array<i64: 1, 1, 1>, scalar_prefetch = 0 : i64, scratch_operands = 1 : i64, tpu.core_type = #tpu.core_type<tc>, window_params = [{transform_indices = @transform_0, window_bounds = array<i64: 16, 64>}, {transform_indices = @transform_1, window_bounds = array<i64: 64, 128>}, {transform_indices = @transform_2, window_bounds = array<i64: 1, 128>}, {pipeline_mode = #tpu.pipeline_mode<synchronous>, transform_indices = @transform_3, window_bounds = array<i64: 1, 64>}, {pipeline_mode = #tpu.pipeline_mode<synchronous>, transform_indices = @transform_4, window_bounds = array<i64: 1, 64>}, {transform_indices = @transform_5, window_bounds = array<i64: 16, 128>}]} {
    %c0 = arith.constant 0 : index
    %c0_0 = arith.constant 0 : index
    %0 = vector.load %arg3[%c0, %c0_0] : memref<16x64xbf16, #tpu.memory_space<vmem>>, vector<16x64xbf16>
    %1 = arith.extf %0 : vector<16x64xbf16> to vector<16x64xf32>
    %cst = arith.constant dense<0.000000e+00> : vector<16xf32>
    %2 = vector.multi_reduction <add>, %1, %cst [1] : vector<16x64xf32> to vector<16xf32>
    %3 = vector.shape_cast %2 : vector<16xf32> to vector<16x1xf32>
    %cst_1 = arith.constant 6.400000e+01 : f32
    %4 = vector.broadcast %cst_1 : f32 to vector<16x1xf32>
    %5 = arith.divf %3, %4 : vector<16x1xf32>
    %6 = vector.broadcast %5 : vector<16x1xf32> to vector<16x64xf32>
    %7 = arith.subf %1, %6 : vector<16x64xf32>
    %8 = arith.mulf %7, %7 : vector<16x64xf32>
    %cst_2 = arith.constant dense<0.000000e+00> : vector<16xf32>
    %9 = vector.multi_reduction <add>, %8, %cst_2 [1] : vector<16x64xf32> to vector<16xf32>
    %10 = vector.shape_cast %9 : vector<16xf32> to vector<16x1xf32>
    %cst_3 = arith.constant 6.400000e+01 : f32
    %11 = vector.broadcast %cst_3 : f32 to vector<16x1xf32>
    %12 = arith.divf %10, %11 : vector<16x1xf32>
    %13 = vector.broadcast %5 : vector<16x1xf32> to vector<16x64xf32>
    %14 = arith.subf %1, %13 : vector<16x64xf32>
    %cst_4 = arith.constant 9.99999997E-7 : f32
    %15 = vector.broadcast %cst_4 : f32 to vector<16x1xf32>
    %16 = arith.addf %12, %15 : vector<16x1xf32>
    %17 = math.rsqrt %16 : vector<16x1xf32>
    %18 = vector.broadcast %17 : vector<16x1xf32> to vector<16x64xf32>
    %19 = arith.mulf %14, %18 : vector<16x64xf32>
    %c0_5 = arith.constant 0 : index
    %c0_6 = arith.constant 0 : index
    %20 = vector.load %arg6[%c0_5, %c0_6] : memref<1x64xf32, #tpu.memory_space<vmem>>, vector<1x64xf32>
    %21 = vector.broadcast %20 : vector<1x64xf32> to vector<16x64xf32>
    %22 = arith.mulf %19, %21 : vector<16x64xf32>
    %c0_7 = arith.constant 0 : index
    %c0_8 = arith.constant 0 : index
    %23 = vector.load %arg7[%c0_7, %c0_8] : memref<1x64xf32, #tpu.memory_space<vmem>>, vector<1x64xf32>
    %24 = vector.broadcast %23 : vector<1x64xf32> to vector<16x64xf32>
    %25 = arith.addf %22, %24 : vector<16x64xf32>
    %26 = arith.truncf %25 : vector<16x64xf32> to vector<16x64xbf16>
    %c0_i32 = arith.constant 0 : i32
    %27 = arith.cmpi eq, %arg2, %c0_i32 : i32
    %28 = arith.extui %27 : i1 to i32
    %c0_i32_9 = arith.constant 0 : i32
    %29 = arith.cmpi ne, %28, %c0_i32_9 : i32
    scf.if %29 {
      %cst_19 = arith.constant 0.000000e+00 : f32
      %38 = vector.broadcast %cst_19 : f32 to vector<16x128xf32>
      %c0_20 = arith.constant 0 : index
      %c0_21 = arith.constant 0 : index
      %39 = vector.load %arg9[%c0_20, %c0_21] : memref<16x128xf32, #tpu.memory_space<vmem>>, vector<16x128xf32>
      tpu.vector_store %arg9[%c0_20, %c0_21], %38 {strides = array<i32>} : memref<16x128xf32, #tpu.memory_space<vmem>>, vector<16x128xf32>,
    } else {
    }
    %c0_10 = arith.constant 0 : index
    %c0_11 = arith.constant 0 : index
    %30 = vector.load %arg9[%c0_10, %c0_11] : memref<16x128xf32, #tpu.memory_space<vmem>>, vector<16x128xf32>
    %c0_12 = arith.constant 0 : index
    %c0_13 = arith.constant 0 : index
    %31 = vector.load %arg4[%c0_12, %c0_13] : memref<64x128xbf16, #tpu.memory_space<vmem>>, vector<64x128xbf16>
    %cst_14 = arith.constant dense<0.000000e+00> : vector<16x128xf32>
    %32 = tpu.matmul %26, %31, %cst_14 {dimension_numbers = #tpu.dot_dimension_numbers<[1], [0], [0], [1], [0, 0, 1, 1], [], []>} : vector<16x64xbf16>, vector<64x128xbf16>, vector<16x128xf32> -> vector<16x128xf32>
    %33 = arith.addf %30, %32 : vector<16x128xf32>
    %c0_15 = arith.constant 0 : index
    %c0_16 = arith.constant 0 : index
    %34 = vector.load %arg9[%c0_15, %c0_16] : memref<16x128xf32, #tpu.memory_space<vmem>>, vector<16x128xf32>
    tpu.vector_store %arg9[%c0_15, %c0_16], %33 {strides = array<i32>} : memref<16x128xf32, #tpu.memory_space<vmem>>, vector<16x128xf32>,
    %c0_i32_17 = arith.constant 0 : i32
    %35 = arith.cmpi eq, %arg2, %c0_i32_17 : i32
    %36 = arith.extui %35 : i1 to i32
    %c0_i32_18 = arith.constant 0 : i32
    %37 = arith.cmpi ne, %36, %c0_i32_18 : i32
    scf.if %37 {
      %c0_19 = arith.constant 0 : index
      %c0_20 = arith.constant 0 : index
      %38 = vector.load %arg9[%c0_19, %c0_20] : memref<16x128xf32, #tpu.memory_space<vmem>>, vector<16x128xf32>
      %c0_21 = arith.constant 0 : index
      %c0_22 = arith.constant 0 : index
      %39 = vector.load %arg5[%c0_21, %c0_22] : memref<1x128xf32, #tpu.memory_space<vmem>>, vector<1x128xf32>
      %40 = vector.broadcast %39 : vector<1x128xf32> to vector<16x128xf32>
      %41 = arith.addf %38, %40 : vector<16x128xf32>
      %42 = arith.truncf %41 : vector<16x128xf32> to vector<16x128xbf16>
      %c0_23 = arith.constant 0 : index
      %c0_24 = arith.constant 0 : index
      %43 = vector.load %arg8[%c0_23, %c0_24] : memref<16x128xbf16, #tpu.memory_space<vmem>>, vector<16x128xbf16>
      tpu.vector_store %arg8[%c0_23, %c0_24], %42 {strides = array<i32>} : memref<16x128xbf16, #tpu.memory_space<vmem>>, vector<16x128xbf16>,
    } else {
    }
    return
  }
  func.func @transform_0(%arg0: i32, %arg1: i32, %arg2: i32) -> (i32, i32) {
    %c0_i32 = arith.constant 0 : i32
    return %arg0, %arg2 : i32, i32
  }
  func.func @transform_1(%arg0: i32, %arg1: i32, %arg2: i32) -> (i32, i32) {
    %c0_i32 = arith.constant 0 : i32
    return %arg2, %arg1 : i32, i32
  }
  func.func @transform_2(%arg0: i32, %arg1: i32, %arg2: i32) -> (i32, i32) {
    %c0_i32 = arith.constant 0 : i32
    %c0_i32_0 = arith.constant 0 : i32
    return %c0_i32, %arg1 : i32, i32
  }
  func.func @transform_3(%arg0: i32, %arg1: i32, %arg2: i32) -> (i32, i32) {
    %c0_i32 = arith.constant 0 : i32
    %c0_i32_0 = arith.constant 0 : i32
    %c0_i32_1 = arith.constant 0 : i32
    return %c0_i32, %c0_i32_0 : i32, i32
  }
  func.func @transform_4(%arg0: i32, %arg1: i32, %arg2: i32) -> (i32, i32) {
    %c0_i32 = arith.constant 0 : i32
    %c0_i32_0 = arith.constant 0 : i32
    %c0_i32_1 = arith.constant 0 : i32
    return %c0_i32, %c0_i32_0 : i32, i32
  }
  func.func @transform_5(%arg0: i32, %arg1: i32, %arg2: i32) -> (i32, i32) {
    %c0_i32 = arith.constant 0 : i32
    return %arg0, %arg1 : i32, i32
  }
}

module attributes {stable_mosaic.version = 11 : i64} {
  func.func @_generator_kernel(%arg0: i32, %arg1: i32, %arg2: i32, %arg3: memref<16x64xbf16, #tpu.memory_space<vmem>>, %arg4: memref<64x128xbf16, #tpu.memory_space<vmem>>, %arg5: memref<1x128xf32, #tpu.memory_space<vmem>>, %arg6: memref<1x64xf32, #tpu.memory_space<vmem>>, %arg7: memref<1x64xf32, #tpu.memory_space<vmem>>, %arg8: memref<16x128xf32, #tpu.memory_space<vmem>>, %arg9: memref<16x1xf32, #tpu.memory_space<vmem>>, %arg10: memref<16x1xf32, #tpu.memory_space<vmem>>) attributes {dimension_semantics = [#tpu.dimension_semantics<parallel>, #tpu.dimension_semantics<arbitrary>, #tpu.dimension_semantics<arbitrary>], iteration_bounds = array<i64: 1, 2, 1>, scalar_prefetch = 0 : i64, scratch_operands = 2 : i64, tpu.core_type = #tpu.core_type<tc>, window_params = [{transform_indices = @transform_0, window_bounds = array<i64: 16, 64>}, {transform_indices = @transform_1, window_bounds = array<i64: 64, 128>}, {transform_indices = @transform_2, window_bounds = array<i64: 1, 128>}, {pipeline_mode = #tpu.pipeline_mode<synchronous>, transform_indices = @transform_3, window_bounds = array<i64: 1, 64>}, {pipeline_mode = #tpu.pipeline_mode<synchronous>, transform_indices = @transform_4, window_bounds = array<i64: 1, 64>}, {transform_indices = @transform_5, window_bounds = array<i64: 16, 128>}]} {
    %c0 = arith.constant 0 : index
    %c0_0 = arith.constant 0 : index
    %0 = vector.load %arg3[%c0, %c0_0] : memref<16x64xbf16, #tpu.memory_space<vmem>>, vector<16x64xbf16>
    %1 = arith.extf %0 : vector<16x64xbf16> to vector<16x64xf32>
    %cst = arith.constant dense<0.000000e+00> : vector<16xf32>
    %2 = vector.multi_reduction <add>, %1, %cst [1] : vector<16x64xf32> to vector<16xf32>
    %3 = vector.shape_cast %2 : vector<16xf32> to vector<16x1xf32>
    %cst_1 = arith.constant 6.400000e+01 : f32
    %4 = vector.broadcast %cst_1 : f32 to vector<16x1xf32>
    %5 = arith.divf %3, %4 : vector<16x1xf32>
    %6 = vector.broadcast %5 : vector<16x1xf32> to vector<16x64xf32>
    %7 = arith.subf %1, %6 : vector<16x64xf32>
    %8 = arith.mulf %7, %7 : vector<16x64xf32>
    %cst_2 = arith.constant dense<0.000000e+00> : vector<16xf32>
    %9 = vector.multi_reduction <add>, %8, %cst_2 [1] : vector<16x64xf32> to vector<16xf32>
    %10 = vector.shape_cast %9 : vector<16xf32> to vector<16x1xf32>
    %cst_3 = arith.constant 6.400000e+01 : f32
    %11 = vector.broadcast %cst_3 : f32 to vector<16x1xf32>
    %12 = arith.divf %10, %11 : vector<16x1xf32>
    %13 = vector.broadcast %5 : vector<16x1xf32> to vector<16x64xf32>
    %14 = arith.subf %1, %13 : vector<16x64xf32>
    %cst_4 = arith.constant 9.99999997E-7 : f32
    %15 = vector.broadcast %cst_4 : f32 to vector<16x1xf32>
    %16 = arith.addf %12, %15 : vector<16x1xf32>
    %17 = math.rsqrt %16 : vector<16x1xf32>
    %18 = vector.broadcast %17 : vector<16x1xf32> to vector<16x64xf32>
    %19 = arith.mulf %14, %18 : vector<16x64xf32>
    %c0_5 = arith.constant 0 : index
    %c0_6 = arith.constant 0 : index
    %20 = vector.load %arg6[%c0_5, %c0_6] : memref<1x64xf32, #tpu.memory_space<vmem>>, vector<1x64xf32>
    %21 = vector.broadcast %20 : vector<1x64xf32> to vector<16x64xf32>
    %22 = arith.mulf %19, %21 : vector<16x64xf32>
    %c0_7 = arith.constant 0 : index
    %c0_8 = arith.constant 0 : index
    %23 = vector.load %arg7[%c0_7, %c0_8] : memref<1x64xf32, #tpu.memory_space<vmem>>, vector<1x64xf32>
    %24 = vector.broadcast %23 : vector<1x64xf32> to vector<16x64xf32>
    %25 = arith.addf %22, %24 : vector<16x64xf32>
    %26 = arith.truncf %25 : vector<16x64xf32> to vector<16x64xbf16>
    %c0_9 = arith.constant 0 : index
    %c0_10 = arith.constant 0 : index
    %27 = vector.load %arg4[%c0_9, %c0_10] : memref<64x128xbf16, #tpu.memory_space<vmem>>, vector<64x128xbf16>
    %cst_11 = arith.constant dense<0.000000e+00> : vector<16x128xf32>
    %28 = tpu.matmul %26, %27, %cst_11 {dimension_numbers = #tpu.dot_dimension_numbers<[1], [0], [0], [1], [0, 0, 1, 1], [], []>} : vector<16x64xbf16>, vector<64x128xbf16>, vector<16x128xf32> -> vector<16x128xf32>
    %c0_12 = arith.constant 0 : index
    %c0_13 = arith.constant 0 : index
    %29 = vector.load %arg5[%c0_12, %c0_13] : memref<1x128xf32, #tpu.memory_space<vmem>>, vector<1x128xf32>
    %30 = vector.broadcast %29 : vector<1x128xf32> to vector<16x128xf32>
    %31 = arith.addf %28, %30 : vector<16x128xf32>
    %c0_i32 = arith.constant 0 : i32
    %32 = arith.cmpi eq, %arg1, %c0_i32 : i32
    %c0_i32_14 = arith.constant 0 : i32
    %33 = arith.cmpi eq, %arg2, %c0_i32_14 : i32
    %34 = arith.andi %32, %33 : i1
    %35 = arith.extui %34 : i1 to i32
    %c0_i32_15 = arith.constant 0 : i32
    %36 = arith.cmpi ne, %35, %c0_i32_15 : i32
    scf.if %36 {
      %cst_19 = arith.constant 0xFF800000 : f32
      %43 = vector.broadcast %cst_19 : f32 to vector<16x1xf32>
      %c0_20 = arith.constant 0 : index
      %c0_21 = arith.constant 0 : index
      %44 = vector.load %arg9[%c0_20, %c0_21] : memref<16x1xf32, #tpu.memory_space<vmem>>, vector<16x1xf32>
      tpu.vector_store %arg9[%c0_20, %c0_21], %43 {strides = array<i32>} : memref<16x1xf32, #tpu.memory_space<vmem>>, vector<16x1xf32>,
      %cst_22 = arith.constant 0.000000e+00 : f32
      %45 = vector.broadcast %cst_22 : f32 to vector<16x1xf32>
      %c0_23 = arith.constant 0 : index
      %c0_24 = arith.constant 0 : index
      %46 = vector.load %arg10[%c0_23, %c0_24] : memref<16x1xf32, #tpu.memory_space<vmem>>, vector<16x1xf32>
      tpu.vector_store %arg10[%c0_23, %c0_24], %45 {strides = array<i32>} : memref<16x1xf32, #tpu.memory_space<vmem>>, vector<16x1xf32>,
    } else {
    }
    %c0_i32_16 = arith.constant 0 : i32
    %37 = arith.cmpi eq, %arg1, %c0_i32_16 : i32
    %38 = arith.extui %37 : i1 to i32
    %c0_i32_17 = arith.constant 0 : i32
    %39 = arith.cmpi ne, %38, %c0_i32_17 : i32
    scf.if %39 {
      %c0_19 = arith.constant 0 : index
      %c0_20 = arith.constant 0 : index
      %43 = vector.load %arg9[%c0_19, %c0_20] : memref<16x1xf32, #tpu.memory_space<vmem>>, vector<16x1xf32>
      %cst_21 = arith.constant dense<0xFF800000> : vector<16xf32>
      %44 = vector.multi_reduction <maximumf>, %31, %cst_21 [1] : vector<16x128xf32> to vector<16xf32>
      %45 = vector.shape_cast %44 : vector<16xf32> to vector<16x1xf32>
      %46 = arith.maximumf %43, %45 : vector<16x1xf32>
      %c0_22 = arith.constant 0 : index
      %c0_23 = arith.constant 0 : index
      %47 = vector.load %arg10[%c0_22, %c0_23] : memref<16x1xf32, #tpu.memory_space<vmem>>, vector<16x1xf32>
      %48 = arith.subf %43, %46 : vector<16x1xf32>
      %49 = math.exp %48 : vector<16x1xf32>
      %50 = arith.mulf %47, %49 : vector<16x1xf32>
      %51 = vector.broadcast %46 : vector<16x1xf32> to vector<16x128xf32>
      %52 = arith.subf %31, %51 : vector<16x128xf32>
      %53 = math.exp %52 : vector<16x128xf32>
      %cst_24 = arith.constant dense<0.000000e+00> : vector<16xf32>
      %54 = vector.multi_reduction <add>, %53, %cst_24 [1] : vector<16x128xf32> to vector<16xf32>
      %55 = vector.shape_cast %54 : vector<16xf32> to vector<16x1xf32>
      %56 = arith.addf %50, %55 : vector<16x1xf32>
      %c0_25 = arith.constant 0 : index
      %c0_26 = arith.constant 0 : index
      %57 = vector.load %arg10[%c0_25, %c0_26] : memref<16x1xf32, #tpu.memory_space<vmem>>, vector<16x1xf32>
      tpu.vector_store %arg10[%c0_25, %c0_26], %56 {strides = array<i32>} : memref<16x1xf32, #tpu.memory_space<vmem>>, vector<16x1xf32>,
      %c0_27 = arith.constant 0 : index
      %c0_28 = arith.constant 0 : index
      %58 = vector.load %arg9[%c0_27, %c0_28] : memref<16x1xf32, #tpu.memory_space<vmem>>, vector<16x1xf32>
      tpu.vector_store %arg9[%c0_27, %c0_28], %46 {strides = array<i32>} : memref<16x1xf32, #tpu.memory_space<vmem>>, vector<16x1xf32>,
    } else {
    }
    %c1_i32 = arith.constant 1 : i32
    %40 = arith.cmpi eq, %arg1, %c1_i32 : i32
    %41 = arith.extui %40 : i1 to i32
    %c0_i32_18 = arith.constant 0 : i32
    %42 = arith.cmpi ne, %41, %c0_i32_18 : i32
    scf.if %42 {
      %c0_19 = arith.constant 0 : index
      %c0_20 = arith.constant 0 : index
      %43 = vector.load %arg9[%c0_19, %c0_20] : memref<16x1xf32, #tpu.memory_space<vmem>>, vector<16x1xf32>
      %44 = vector.broadcast %43 : vector<16x1xf32> to vector<16x128xf32>
      %45 = arith.subf %31, %44 : vector<16x128xf32>
      %c0_21 = arith.constant 0 : index
      %c0_22 = arith.constant 0 : index
      %46 = vector.load %arg10[%c0_21, %c0_22] : memref<16x1xf32, #tpu.memory_space<vmem>>, vector<16x1xf32>
      %47 = math.log %46 : vector<16x1xf32>
      %48 = vector.broadcast %47 : vector<16x1xf32> to vector<16x128xf32>
      %49 = arith.subf %45, %48 : vector<16x128xf32>
      %c0_23 = arith.constant 0 : index
      %c0_24 = arith.constant 0 : index
      %50 = vector.load %arg8[%c0_23, %c0_24] : memref<16x128xf32, #tpu.memory_space<vmem>>, vector<16x128xf32>
      tpu.vector_store %arg8[%c0_23, %c0_24], %49 {strides = array<i32>} : memref<16x128xf32, #tpu.memory_space<vmem>>, vector<16x128xf32>,
    } else {
    }
    return
  }
  func.func @transform_0(%arg0: i32, %arg1: i32, %arg2: i32) -> (i32, i32) {
    %c0_i32 = arith.constant 0 : i32
    %c0_i32_0 = arith.constant 0 : i32
    return %arg0, %c0_i32 : i32, i32
  }
  func.func @transform_1(%arg0: i32, %arg1: i32, %arg2: i32) -> (i32, i32) {
    %c0_i32 = arith.constant 0 : i32
    %c0_i32_0 = arith.constant 0 : i32
    return %c0_i32, %arg2 : i32, i32
  }
  func.func @transform_2(%arg0: i32, %arg1: i32, %arg2: i32) -> (i32, i32) {
    %c0_i32 = arith.constant 0 : i32
    %c0_i32_0 = arith.constant 0 : i32
    return %c0_i32, %arg2 : i32, i32
  }
  func.func @transform_3(%arg0: i32, %arg1: i32, %arg2: i32) -> (i32, i32) {
    %c0_i32 = arith.constant 0 : i32
    %c0_i32_0 = arith.constant 0 : i32
    %c0_i32_1 = arith.constant 0 : i32
    return %c0_i32, %c0_i32_0 : i32, i32
  }
  func.func @transform_4(%arg0: i32, %arg1: i32, %arg2: i32) -> (i32, i32) {
    %c0_i32 = arith.constant 0 : i32
    %c0_i32_0 = arith.constant 0 : i32
    %c0_i32_1 = arith.constant 0 : i32
    return %c0_i32, %c0_i32_0 : i32, i32
  }
  func.func @transform_5(%arg0: i32, %arg1: i32, %arg2: i32) -> (i32, i32) {
    %0 = arith.muli %arg2, %arg1 : i32
    %c0_i32 = arith.constant 0 : i32
    return %arg0, %0 : i32, i32
  }
}

module attributes {stable_mosaic.version = 11 : i64} {
  func.func @_flash_attn_kernel(%arg0: i32, %arg1: i32, %arg2: i32, %arg3: i32, %arg4: memref<1x1x8x16xbf16, #tpu.memory_space<vmem>>, %arg5: memref<1x1x1x8x16xbf16, #tpu.memory_space<vmem>>, %arg6: memref<1x1x1x8x16xbf16, #tpu.memory_space<vmem>>, %arg7: memref<1x1x8xi32, #tpu.memory_space<vmem>>, %arg8: memref<1x1x8x16xbf16, #tpu.memory_space<vmem>>, %arg9: memref<8x1xf32, #tpu.memory_space<vmem>>, %arg10: memref<8x1xf32, #tpu.memory_space<vmem>>, %arg11: memref<8x16xf32, #tpu.memory_space<vmem>>) attributes {dimension_semantics = [#tpu.dimension_semantics<parallel>, #tpu.dimension_semantics<parallel>, #tpu.dimension_semantics<parallel>, #tpu.dimension_semantics<arbitrary>], iteration_bounds = array<i64: 2, 4, 1, 1>, scalar_prefetch = 0 : i64, scratch_operands = 3 : i64, tpu.core_type = #tpu.core_type<tc>, window_params = [{transform_indices = @transform_0, window_bounds = array<i64: 1, 1, 8, 16>}, {transform_indices = @transform_1, window_bounds = array<i64: 1, 1, 1, 8, 16>}, {transform_indices = @transform_2, window_bounds = array<i64: 1, 1, 1, 8, 16>}, {transform_indices = @transform_3, window_bounds = array<i64: 1, 1, 8>}, {transform_indices = @transform_4, window_bounds = array<i64: 1, 1, 8, 16>}]} {
    %c0_i32 = arith.constant 0 : i32
    %0 = arith.cmpi eq, %arg3, %c0_i32 : i32
    %1 = arith.extui %0 : i1 to i32
    %c0_i32_0 = arith.constant 0 : i32
    %2 = arith.cmpi ne, %1, %c0_i32_0 : i32
    scf.if %2 {
      %cst_37 = arith.constant 0xFF800000 : f32
      %47 = vector.broadcast %cst_37 : f32 to vector<8x1xf32>
      %c0_38 = arith.constant 0 : index
      %c0_39 = arith.constant 0 : index
      %48 = vector.load %arg9[%c0_38, %c0_39] : memref<8x1xf32, #tpu.memory_space<vmem>>, vector<8x1xf32>
      tpu.vector_store %arg9[%c0_38, %c0_39], %47 {strides = array<i32>} : memref<8x1xf32, #tpu.memory_space<vmem>>, vector<8x1xf32>,
      %cst_40 = arith.constant 0.000000e+00 : f32
      %49 = vector.broadcast %cst_40 : f32 to vector<8x1xf32>
      %c0_41 = arith.constant 0 : index
      %c0_42 = arith.constant 0 : index
      %50 = vector.load %arg10[%c0_41, %c0_42] : memref<8x1xf32, #tpu.memory_space<vmem>>, vector<8x1xf32>
      tpu.vector_store %arg10[%c0_41, %c0_42], %49 {strides = array<i32>} : memref<8x1xf32, #tpu.memory_space<vmem>>, vector<8x1xf32>,
      %cst_43 = arith.constant 0.000000e+00 : f32
      %51 = vector.broadcast %cst_43 : f32 to vector<8x16xf32>
      %c0_44 = arith.constant 0 : index
      %c0_45 = arith.constant 0 : index
      %52 = vector.load %arg11[%c0_44, %c0_45] : memref<8x16xf32, #tpu.memory_space<vmem>>, vector<8x16xf32>
      tpu.vector_store %arg11[%c0_44, %c0_45], %51 {strides = array<i32>} : memref<8x16xf32, #tpu.memory_space<vmem>>, vector<8x16xf32>,
    } else {
    }
    %c0 = arith.constant 0 : index
    %c0_1 = arith.constant 0 : index
    %c0_2 = arith.constant 0 : index
    %c0_3 = arith.constant 0 : index
    %3 = vector.load %arg4[%c0, %c0_1, %c0_2, %c0_3] : memref<1x1x8x16xbf16, #tpu.memory_space<vmem>>, vector<1x1x8x16xbf16>
    %4 = vector.shape_cast %3 : vector<1x1x8x16xbf16> to vector<8x16xbf16>
    %c0_4 = arith.constant 0 : index
    %c0_5 = arith.constant 0 : index
    %c0_6 = arith.constant 0 : index
    %c0_7 = arith.constant 0 : index
    %c0_8 = arith.constant 0 : index
    %5 = vector.load %arg5[%c0_4, %c0_5, %c0_6, %c0_7, %c0_8] : memref<1x1x1x8x16xbf16, #tpu.memory_space<vmem>>, vector<1x1x1x8x16xbf16>
    %6 = vector.shape_cast %5 : vector<1x1x1x8x16xbf16> to vector<8x16xbf16>
    %7 = tpu.transpose %6, [1, 0] : vector<8x16xbf16> -> vector<16x8xbf16>
    %cst = arith.constant dense<0.000000e+00> : vector<8x8xf32>
    %8 = tpu.matmul %4, %7, %cst {dimension_numbers = #tpu.dot_dimension_numbers<[1], [0], [0], [1], [0, 0, 1, 1], [], []>} : vector<8x16xbf16>, vector<16x8xbf16>, vector<8x8xf32> -> vector<8x8xf32>
    %cst_9 = arith.constant 2.500000e-01 : f32
    %9 = vector.broadcast %cst_9 : f32 to vector<8x8xf32>
    %10 = arith.mulf %8, %9 : vector<8x8xf32>
    %c0_10 = arith.constant 0 : index
    %c0_11 = arith.constant 0 : index
    %c0_12 = arith.constant 0 : index
    %11 = vector.load %arg7[%c0_10, %c0_11, %c0_12] : memref<1x1x8xi32, #tpu.memory_space<vmem>>, vector<1x1x8xi32>
    %12 = vector.shape_cast %11 : vector<1x1x8xi32> to vector<1x8xi32>
    %c0_i32_13 = arith.constant 0 : i32
    %13 = vector.broadcast %c0_i32_13 : i32 to vector<1x8xi32>
    %14 = arith.cmpi ne, %12, %13 : vector<1x8xi32>
    %cst_14 = arith.constant -1.000000e+09 : f32
    %15 = vector.shape_cast %14 : vector<1x8xi1> to vector<1x8xi1>
    %16 = vector.broadcast %15 : vector<1x8xi1> to vector<8x8xi1>
    %17 = vector.broadcast %cst_14 : f32 to vector<8x8xf32>
    %18 = arith.select %16, %10, %17 : vector<8x8xi1>, vector<8x8xf32>
    %c0_15 = arith.constant 0 : index
    %c0_16 = arith.constant 0 : index
    %19 = vector.load %arg9[%c0_15, %c0_16] : memref<8x1xf32, #tpu.memory_space<vmem>>, vector<8x1xf32>
    %cst_17 = arith.constant dense<0xFF800000> : vector<8xf32>
    %20 = vector.multi_reduction <maximumf>, %18, %cst_17 [1] : vector<8x8xf32> to vector<8xf32>
    %21 = vector.shape_cast %20 : vector<8xf32> to vector<8x1xf32>
    %22 = arith.maximumf %19, %21 : vector<8x1xf32>
    %23 = arith.subf %19, %22 : vector<8x1xf32>
    %24 = math.exp %23 : vector<8x1xf32>
    %25 = vector.broadcast %22 : vector<8x1xf32> to vector<8x8xf32>
    %26 = arith.subf %18, %25 : vector<8x8xf32>
    %27 = math.exp %26 : vector<8x8xf32>
    %c0_18 = arith.constant 0 : index
    %c0_19 = arith.constant 0 : index
    %28 = vector.load %arg10[%c0_18, %c0_19] : memref<8x1xf32, #tpu.memory_space<vmem>>, vector<8x1xf32>
    %29 = arith.mulf %24, %28 : vector<8x1xf32>
    %cst_20 = arith.constant dense<0.000000e+00> : vector<8xf32>
    %30 = vector.multi_reduction <add>, %27, %cst_20 [1] : vector<8x8xf32> to vector<8xf32>
    %31 = vector.shape_cast %30 : vector<8xf32> to vector<8x1xf32>
    %32 = arith.addf %29, %31 : vector<8x1xf32>
    %c0_21 = arith.constant 0 : index
    %c0_22 = arith.constant 0 : index
    %33 = vector.load %arg10[%c0_21, %c0_22] : memref<8x1xf32, #tpu.memory_space<vmem>>, vector<8x1xf32>
    tpu.vector_store %arg10[%c0_21, %c0_22], %32 {strides = array<i32>} : memref<8x1xf32, #tpu.memory_space<vmem>>, vector<8x1xf32>,
    %c0_23 = arith.constant 0 : index
    %c0_24 = arith.constant 0 : index
    %34 = vector.load %arg11[%c0_23, %c0_24] : memref<8x16xf32, #tpu.memory_space<vmem>>, vector<8x16xf32>
    %35 = vector.broadcast %24 : vector<8x1xf32> to vector<8x16xf32>
    %36 = arith.mulf %35, %34 : vector<8x16xf32>
    %37 = arith.truncf %27 : vector<8x8xf32> to vector<8x8xbf16>
    %c0_25 = arith.constant 0 : index
    %c0_26 = arith.constant 0 : index
    %c0_27 = arith.constant 0 : index
    %c0_28 = arith.constant 0 : index
    %c0_29 = arith.constant 0 : index
    %38 = vector.load %arg6[%c0_25, %c0_26, %c0_27, %c0_28, %c0_29] : memref<1x1x1x8x16xbf16, #tpu.memory_space<vmem>>, vector<1x1x1x8x16xbf16>
    %39 = vector.shape_cast %38 : vector<1x1x1x8x16xbf16> to vector<8x16xbf16>
    %cst_30 = arith.constant dense<0.000000e+00> : vector<8x16xf32>
    %40 = tpu.matmul %37, %39, %cst_30 {dimension_numbers = #tpu.dot_dimension_numbers<[1], [0], [0], [1], [0, 0, 1, 1], [], []>} : vector<8x8xbf16>, vector<8x16xbf16>, vector<8x16xf32> -> vector<8x16xf32>
    %41 = arith.addf %36, %40 : vector<8x16xf32>
    %c0_31 = arith.constant 0 : index
    %c0_32 = arith.constant 0 : index
    %42 = vector.load %arg11[%c0_31, %c0_32] : memref<8x16xf32, #tpu.memory_space<vmem>>, vector<8x16xf32>
    tpu.vector_store %arg11[%c0_31, %c0_32], %41 {strides = array<i32>} : memref<8x16xf32, #tpu.memory_space<vmem>>, vector<8x16xf32>,
    %c0_33 = arith.constant 0 : index
    %c0_34 = arith.constant 0 : index
    %43 = vector.load %arg9[%c0_33, %c0_34] : memref<8x1xf32, #tpu.memory_space<vmem>>, vector<8x1xf32>
    tpu.vector_store %arg9[%c0_33, %c0_34], %22 {strides = array<i32>} : memref<8x1xf32, #tpu.memory_space<vmem>>, vector<8x1xf32>,
    %c0_i32_35 = arith.constant 0 : i32
    %44 = arith.cmpi eq, %arg3, %c0_i32_35 : i32
    %45 = arith.extui %44 : i1 to i32
    %c0_i32_36 = arith.constant 0 : i32
    %46 = arith.cmpi ne, %45, %c0_i32_36 : i32
    scf.if %46 {
      %c0_37 = arith.constant 0 : index
      %c0_38 = arith.constant 0 : index
      %47 = vector.load %arg11[%c0_37, %c0_38] : memref<8x16xf32, #tpu.memory_space<vmem>>, vector<8x16xf32>
      %c0_39 = arith.constant 0 : index
      %c0_40 = arith.constant 0 : index
      %48 = vector.load %arg10[%c0_39, %c0_40] : memref<8x1xf32, #tpu.memory_space<vmem>>, vector<8x1xf32>
      %49 = vector.broadcast %48 : vector<8x1xf32> to vector<8x16xf32>
      %50 = arith.divf %47, %49 : vector<8x16xf32>
      %51 = arith.truncf %50 : vector<8x16xf32> to vector<8x16xbf16>
      %c0_41 = arith.constant 0 : index
      %c0_42 = arith.constant 0 : index
      %c0_43 = arith.constant 0 : index
      %c0_44 = arith.constant 0 : index
      %52 = vector.load %arg8[%c0_41, %c0_42, %c0_43, %c0_44] : memref<1x1x8x16xbf16, #tpu.memory_space<vmem>>, vector<1x1x8x16xbf16>
      %53 = vector.shape_cast %52 : vector<1x1x8x16xbf16> to vector<8x16xbf16>
      %54 = vector.shape_cast %51 : vector<8x16xbf16> to vector<1x1x8x16xbf16>
      tpu.vector_store %arg8[%c0_41, %c0_42, %c0_43, %c0_44], %54 {strides = array<i32>} : memref<1x1x8x16xbf16, #tpu.memory_space<vmem>>, vector<1x1x8x16xbf16>,
    } else {
    }
    return
  }
  func.func @transform_0(%arg0: i32, %arg1: i32, %arg2: i32, %arg3: i32) -> (i32, i32, i32, i32) {
    %c0_i32 = arith.constant 0 : i32
    %c0_i32_0 = arith.constant 0 : i32
    return %arg0, %arg1, %arg2, %c0_i32 : i32, i32, i32, i32
  }
  func.func @transform_1(%arg0: i32, %arg1: i32, %arg2: i32, %arg3: i32) -> (i32, i32, i32, i32, i32) {
    %c0_i32 = arith.constant 0 : i32
    %c0_i32_0 = arith.constant 0 : i32
    %c0_i32_1 = arith.constant 0 : i32
    return %arg0, %c0_i32, %arg1, %arg3, %c0_i32_0 : i32, i32, i32, i32, i32
  }
  func.func @transform_2(%arg0: i32, %arg1: i32, %arg2: i32, %arg3: i32) -> (i32, i32, i32, i32, i32) {
    %c1_i32 = arith.constant 1 : i32
    %c0_i32 = arith.constant 0 : i32
    %c0_i32_0 = arith.constant 0 : i32
    return %arg0, %c1_i32, %arg1, %arg3, %c0_i32 : i32, i32, i32, i32, i32
  }
  func.func @transform_3(%arg0: i32, %arg1: i32, %arg2: i32, %arg3: i32) -> (i32, i32, i32) {
    %c0_i32 = arith.constant 0 : i32
    %c0_i32_0 = arith.constant 0 : i32
    return %arg0, %c0_i32, %arg3 : i32, i32, i32
  }
  func.func @transform_4(%arg0: i32, %arg1: i32, %arg2: i32, %arg3: i32) -> (i32, i32, i32, i32) {
    %c0_i32 = arith.constant 0 : i32
    %c0_i32_0 = arith.constant 0 : i32
    return %arg0, %arg1, %arg2, %c0_i32 : i32, i32, i32, i32
  }
}

</mosaic_0001>

<bundles_post_ra>
// kernel: fwd.39
= control target key start
LH: loop header
LB: loop body
LE: loop exit
PB: predicated region body
PF: predicated region fallthrough
CT: control target
= control target key end

     0   :  { %vm25_vm0 = vcmask 523264   ;;  %v267_v23 = vmov 0   ;;  %v268_v24 = vmov 0.0   ;;  %v195_v42 = vlaneseq  ;;  %s350_s0 = inlined_call_operand.vmem [shape: bf16[16,64], index: 0, kind: input, shape index: {}]   ;;  %s351_s1 = inlined_call_operand.vmem [shape: bf16[64,192], index: 1, kind: input, shape index: {}]   ;;  %s352_s3 = inlined_call_operand.vmem [shape: f32[1,64], index: 3, kind: input, shape index: {}]   ;;  %s353_s4 = inlined_call_operand.vmem [shape: f32[1,64], index: 4, kind: input, shape index: {}]   ;;  %s354_s2 = inlined_call_operand.vmem [shape: f32[1,192], index: 2, kind: input, shape index: {}]   ;;  %s355_s5 = inlined_call_operand.vmem [shape: bf16[16,192], index: 5, kind: output, shape index: {}]  }
   0x1   :  { %v246_v0 = vld [vmem:[%s350_s0] sm:$0xff]   ;;  %v254_v17 = vld [vmem:[%s351_s1 + $0x14] ss:$8 sps:$4 sm:$0xff]   ;;  %v256_v18 = vld [vmem:[%s351_s1 + $0x10] ss:$8 sps:$4 sm:$0xff]   ;;  %167 = vmatprep.mubr.bf16.mxu0 %v267_v23  ;;  %77 = vst.msk [vmem:[#allocation2 + $0x8] sm:$0xff] %vm25_vm0, %v268_v24 }
   0x2   :  { %v247_v1 = vunpack.c.l.bf16 %v246_v0  ;;  %v248_v2 = vunpack.c.h.bf16 %v246_v0  ;;  %v251_v15 = vld [vmem:[%s351_s1 + $0x4] ss:$8 sps:$4 sm:$0xff]   ;;  %v253_v16 = vld [vmem:[%s351_s1] ss:$8 sps:$4 sm:$0xff]   ;;  %v260_v21 = vld [vmem:[%s351_s1 + $0x34] ss:$8 sps:$4 sm:$0xff]  }
   0x3   :  { %135 = vmatprep.subr.bf16.mxu0 %v251_v15  ;;  %v257_v19 = vld [vmem:[%s351_s1 + $0x24] ss:$8 sps:$4 sm:$0xff]   ;;  %v259_v20 = vld [vmem:[%s351_s1 + $0x20] ss:$8 sps:$4 sm:$0xff]   ;;  %v262_v22 = vld [vmem:[%s351_s1 + $0x30] ss:$8 sps:$4 sm:$0xff]  }
   0x4   :  { %v26_v3 = vsel %vm25_vm0, %v247_v1, 0.0  ;;  %v29_v4 = vsel %vm25_vm0, %v248_v2, 0.0  ;;  %136 = vmatpush1.bf16.msra.mxu0 %v253_v16  ;;  %79 = vst.msk [vmem:[#allocation2 + $0x18] sm:$0xff] %vm25_vm0, %v268_v24  ;;  %v230_v33 = vld [vmem:[%s352_s3] ss:$0 sm:$0xff]  ;;  %v196_v45 = vshrl.u32 %v195_v42, 7 }
   0x5   :  { %27 = vadd.xlane.f32.xlu0 %v26_v3  ;;  %137 = vmatprep.subr.bf16.mxu0 %v254_v17  ;;  %v231_v37 = vld [vmem:[%s353_s4] ss:$0 sm:$0xff]  ;;  %vm221_vm1 = vcmask 1043456   ;;  %vm222_vm2 = vcmask 523268  }
   0x6   :  { %v197_v51 = vsub.s32 0, %v196_v45  ;;  %v201_v52 = vsub.s32 1, %v196_v45  ;;  %v193_v54 = vld [vmem:[%s354_s2] sm:$0x3]  ;;  %vm223_vm3 = vmor %vm222_vm2, %vm221_vm1 }
   0x8   :  { %138 = vmatpush1.bf16.msra.mxu0 %v256_v18  ;;  %v81_v43 = vld [vmem:[#allocation2 + $0x8] sm:$0xff]  ;;  %v198_v55 = vrot.slane %v193_v54, %v197_v51  ;;  %v202_v56 = vrot.slane %v193_v54, %v201_v52 }
   0x9   :  { %30 = vadd.xlane.f32.xlu0 %v29_v4  ;;  %139 = vmatprep.subr.bf16.mxu0 %v257_v19 }
   0xb   :  { %v83_v47 = vld [vmem:[#allocation2 + $0x18] sm:$0xff] }
   0xc   :  { %140 = vmatpush1.bf16.msra.mxu0 %v259_v20 }
   0xd   :  { %141 = vmatprep.subr.bf16.mxu0 %v260_v21 }
  0x10   :  { %142 = vmatpush1.bf16.msra.mxu0 %v262_v22 }
  0x92   :  { %v28_v5 = vpop.xlane.xlu0 %27 }
  0x93   :  { %v33_v6 = vmul.f32 0.015625, %v28_v5 }
  0x95   :  { %v35_v7 = vsub.f32 %v247_v1, %v33_v6 }
  0x96   :  { %v31_v8 = vpop.xlane.xlu0 %30 }
  0x97   :  { %v34_v9 = vmul.f32 0.015625, %v31_v8  ;;  %v37_v10 = vmul.f32 %v35_v7, %v35_v7 }
  0x99   :  { %v36_v11 = vsub.f32 %v248_v2, %v34_v9  ;;  %v39_v12 = vsel %vm25_vm0, %v37_v10, 0.0 }
  0x9a   :  { %40 = vadd.xlane.f32.xlu1 %v39_v12 }
  0x9b   :  { %v38_v13 = vmul.f32 %v36_v11, %v36_v11 }
  0x9d   :  { %v42_v14 = vsel %vm25_vm0, %v38_v13, 0.0 }
  0x9e   :  { %43 = vadd.xlane.f32.xlu1 %v42_v14 }
 0x127   :  { %v41_v25 = vpop.xlane.xlu1 %40 }
 0x128   :  { %v45_v26 = vmul.f32 0.015625, %v41_v25 }
 0x12a   :  { %v47_v27 = vadd.f32 1e-06, %v45_v26 }
 0x12b   :  { %v44_v28 = vpop.xlane.xlu1 %43 }
 0x12c   :  { %263 = vrsqrt.f32 %v47_v27  ;;  %v46_v29 = vmul.f32 0.015625, %v44_v28 }
 0x12e   :  { %v48_v30 = vadd.f32 1e-06, %v46_v29 }
 0x130   :  { %265 = vrsqrt.f32 %v48_v30 }
 0x136   :  { %v264_v31 = vpop.eup %263 }
 0x137   :  { %v51_v32 = vmul.f32 %v264_v31, %v35_v7 }
 0x139   :  { %v60_v36 = vmul.f32 %v230_v33, %v51_v32 }
 0x13a   :  { %v266_v34 = vpop.eup %265 }
 0x13b   :  { %v52_v35 = vmul.f32 %v266_v34, %v36_v11  ;;  %v69_v39 = vadd.f32 %v231_v37, %v60_v36 }
 0x13d   :  { %v61_v38 = vmul.f32 %v230_v33, %v52_v35 }
 0x13f   :  { %v70_v40 = vadd.f32 %v231_v37, %v61_v38 }
 0x141   :  { %v71_v41 = vpack.c.bf16 %v70_v40, %v69_v39 }
 0x143   :  { %240 = vmatmul.mubr.msk.bf16.vlgmr.msra.gmra.mrb[0].mxu0 %vm25_vm0, %v71_v41 }
 0x216   :  { %v169_v44 = vpop.f32.mrb[0].mxu0 }
 0x217   :  { %v171_v46 = vpop.f32.mrb[1].mxu0  ;;  %v205_v58 = vadd.f32 %v198_v55, %v169_v44 }
 0x218   :  { %v179_v48 = vadd.f32 %v171_v46, %v81_v43  ;;  %v173_v49 = vpop.f32.mrb[2].mxu0 }
 0x219   :  { %v175_v50 = vpop.f32.mrb[3].mxu0  ;;  %v207_v62 = vadd.f32 %v198_v55, %v173_v49 }
 0x21a   :  { %183 = vst.msk [vmem:[#allocation2 + $0x8] sm:$0xff] %vm25_vm0, %v179_v48  ;;  %v181_v53 = vadd.f32 %v175_v50, %v83_v47 }
 0x21c   :  { %185 = vst.msk [vmem:[#allocation2 + $0x18] sm:$0xff] %vm25_vm0, %v181_v53 }
 0x221   :  { %v190_v57 = vld [vmem:[#allocation2 + $0x8] sm:$0xff] }
 0x222   :  { %v206_v59 = vadd.f32 %v202_v56, %v190_v57 }
 0x223   :  { %v192_v60 = vld [vmem:[#allocation2 + $0x18] sm:$0xff] }
 0x224   :  { %v243_v61 = vpack.c.bf16 %v206_v59, %v205_v58  ;;  %v208_v63 = vadd.f32 %v202_v56, %v192_v60 }
 0x226   :  { %224 = vst.msk [vmem:[%s355_s5] sm:$0xff] %vm223_vm3, %v243_v61  ;;  %v244_v0 = vpack.c.bf16 %v208_v63, %v207_v62 }
 0x228   :  { %225 = vst.msk [vmem:[%s355_s5 + $0x8] sm:$0xff] %vm223_vm3, %v244_v0 }

// kernel: fwd.41
= control target key start
LH: loop header
LB: loop body
LE: loop exit
PB: predicated region body
PF: predicated region fallthrough
CT: control target
= control target key end

     0   :  { %s715_s15 = smov 0   ;;  %s717_s16 = smov 0   ;;  %s791_s0 = inlined_call_operand.vmem [shape: bf16[2,4,8,16], index: 0, kind: input, shape index: {}]   ;;  %s792_s1 = inlined_call_operand.vmem [shape: bf16[4,16,64], index: 1, kind: input, shape index: {}]   ;;  %s793_s2 = inlined_call_operand.vmem [shape: f32[1,64], index: 2, kind: input, shape index: {}]   ;;  %s794_s3 = inlined_call_operand.vmem [shape: bf16[2,8,64], index: 3, kind: input, shape index: {}]   ;;  %s795_s4 = inlined_call_operand.vmem [shape: bf16[2,8,64], index: 4, kind: output, shape index: {}]  }
   0x1   :  { %s719_s17 = smov 0   ;;  %s721_s18 = smov 0  }
   0x2   :  { %s723_s19 = smov 0  }
   0x3 LB: > { %s29_s20 = sadd.s32 1, %s677_s17  ;;  %s40_s21 = sadd.s32 1, %s681_s18  ;;  %s685_s19 = sphi %s723_s19, %s14_s19   ;;  %s681_s18 = sphi %s721_s18, %s799_s18   ;;  %s677_s17 = sphi %s719_s17, %s798_s17   ;;  %s673_s16 = sphi %s717_s16, %s797_s16   ;;  %s669_s15 = sphi %s715_s15, %s796_s15  }
   0x4   : > { %p30_p0 = scmp.ge.s32.totalorder %s29_s20, 4  ;;  %p580_p1 = scmp.ge.s32.totalorder %s685_s19, 1 }
   0x5   : > { %p244_p2 = scmp.lt.s32.totalorder %s685_s19, 9 }
   0x6   : > { %s801_s20 = smov (%p30_p0, %s29_s20), 0  ;;  %s803_s21 = smov (!%p30_p0, %s40_s21), %s681_s18 }
   0x7   : > { %p245_p3 = pnand %p580_p1, %p244_p2  ;;  %p42_p4 = scmp.ge.s32.totalorder %s803_s21, 2 }
   0x8   : > { %p302_p5 = scmp.lt.s32.totalorder (!%p245_p3), %s673_s16, 1  ;;  %p304_p6 = scmp.lt.s32.totalorder (!%p245_p3), %s669_s15, 3 }
   0x9   : > { %s805_s21 = smov (%p42_p4, %s803_s21), 0  ;;  %248 = sbr.rel (%p245_p3) target bundleno = 257 (0x101), region = 36 }
   0xa   : > { %p587_p7 = scmp.ne.s32.totalorder (!%p245_p3), %s669_s15, 0 }
  0x10   : > { %s807_s16 = smov (!%p302_p5, %s673_s16), 1  ;;  %348 = sbr.rel (%p587_p7) target bundleno = 23 (0x17), region = 40 }
  0x11   : > { %s305_s22 = scalar_select %p304_p6, %s669_s15, 3 }
  0x12   : > { %s749_s23 = sshll.u32 %s807_s16, 2  ;;  %vm349_vm0 = vcmask (!%p587_p7), 523264   ;;  %v687_v0 = vmov (!%p587_p7), 0.0  }
  0x13   : > { %s310_s24 = sadd.s32 %s749_s23, %s305_s22  ;;  %s594_s25 = sshll.u32 %s305_s22, 3  ;;  %350 = vst.msk [vmem:[#allocation2] sm:$0xff] (!%p587_p7), %vm349_vm0, %v687_v0 }
  0x14   : > { %s582_s26 = sshll.u32 %s310_s24, 2  ;;  %s320_s29 = scalar_lea.vmem %s792_s1, %s594_s25 }
  0x15   : > { %s312_s6 = scalar_lea.vmem %s791_s0, %s582_s26  ;;  %s333_s9 = scalar_lea.vmem %s794_s3, %s749_s23 }
  0x16   : > { %s343_s12 = scalar_lea.vmem %s795_s4, %s749_s23 }
  0x17 PF: > { %v646_v1 = vld [vmem:[%s320_s29] sm:$0xff]   ;;  %v688_v2 = vmov 0.0   ;;  %vm689_vm1 = vmmov 0   ;;  %vm361_vm2 = vcmask 130048   ;;  %vm406_vm3 = vcmask 523264   ;;  %p590_p8 = scmp.ne.s32.totalorder %s669_s15, 3 }
  0x18   : > { %597 = vmatprep.subr.bf16.mxu0 %v688_v2  ;;  %599 = vmatprep.mubr.msk.bf16.mxu0 %vm689_vm1, %v688_v2  ;;  %v352_v3 = vld [vmem:[%s312_s6] sm:$0xf]  ;;  %vm425_vm4 = vcmask (!%p590_p8), 519168  }
  0x19   : > { %598 = vmatpush3.bf16.msra.mxu0 %v646_v1  ;;  %v591_v11 = vld [vmem:[%s793_s2] ss:$0 sm:$0xff] (!%p590_p8) }
  0x1a   : > { %v351_v4 = vld [vmem:[#allocation2] sm:$0xff] }
  0x1b   : > { %v421_v12 = vld [vmem:[%s333_s9] sm:$0xf] (!%p590_p8) }
  0x1c   : > { %600 = vmatmul.mubr.msk.bf16.vlgmr.msra.gmra.mrb[0].mxu0 %vm361_vm2, %v352_v3  ;;  %v422_v14 = vunpack.c.l.bf16 (!%p590_p8), %v421_v12 }
  0xec   : > { %411 = sbr.rel (%p590_p8) target bundleno = 257 (0x101), region = 44 }
  0xef   : > { %v399_v5 = vpop.f32.mrb[0].mxu0 }
  0xf0   : > { %v405_v6 = vadd.f32 %v399_v5, %v351_v4  ;;  %v601_v7 = vpop.f32.mrb[1].mxu0 }
  0xf1   : > { %v402_v8 = vpop.f32.mrb[2].mxu0 }
  0xf2   : > { %407 = vst.msk [vmem:[#allocation2] sm:$0xff] %vm406_vm3, %v405_v6  ;;  %v602_v9 = vpop.f32.mrb[3].mxu0 }
  0xf9   : > { %v412_v10 = vld [vmem:[#allocation2] sm:$0xff] }
  0xfa   : > { %v420_v13 = vadd.f32 %v591_v11, %v412_v10 }
  0xfc   : > { %v423_v15 = vadd.f32 %v422_v14, %v420_v13 }
  0xfe   : > { %v424_v16 = vpack.c.bf16 %v423_v15, %v423_v15 }
 0x100   : > { %426 = vst.msk [vmem:[%s343_s12] sm:$0xf] %vm425_vm4, %v424_v16 }
 0x101 PF: > { %s14_s19 = sadd.s32 1, %s685_s19   ;;  %s796_s15 = smov %s677_s17 }
 0x102   : > { %p11_p9 = scmp.ge.s32.totalorder %s14_s19, 10   ;;  %s797_s16 = smov %s681_s18 }
 0x103   : > { %s798_s17 = smov %s801_s20  ;;  %s799_s18 = smov %s805_s21 }
 0x104   :  { %13 = sbr.rel (!%p11_p9) target bundleno = 3 (0x3), region = 83 }

// kernel: fwd.40
= control target key start
LH: loop header
LB: loop body
LE: loop exit
PB: predicated region body
PF: predicated region fallthrough
CT: control target
= control target key end

     0   :  { %s879_s15 = smov 0   ;;  %s881_s16 = smov 0   ;;  %s964_s0 = inlined_call_operand.vmem [shape: bf16[2,3,4,8,16], index: 0, kind: input, shape index: {}, may-alias: {0,1,2}]   ;;  %s965_s1 = inlined_call_operand.vmem [shape: bf16[2,3,4,8,16], index: 1, kind: input, shape index: {}, may-alias: {0,1,2}]   ;;  %s966_s2 = inlined_call_operand.vmem [shape: bf16[2,3,4,8,16], index: 2, kind: input, shape index: {}, may-alias: {0,1,2}]   ;;  %s967_s3 = inlined_call_operand.vmem [shape: s32[2,8,8], index: 3, kind: input, shape index: {}]   ;;  %s968_s4 = inlined_call_operand.vmem [shape: bf16[2,4,8,16], index: 4, kind: output, shape index: {}]  }
   0x1   :  { %s883_s17 = smov 0   ;;  %s885_s18 = smov 0  }
   0x2   :  { %s887_s19 = smov 0  }
   0x3 LB: > { %s36_s20 = sadd.s32 1, %s840_s17  ;;  %s40_s21 = sadd.s32 1, %s844_s18  ;;  %s848_s19 = sphi %s887_s19, %s14_s19   ;;  %s844_s18 = sphi %s885_s18, %s972_s18   ;;  %s840_s17 = sphi %s883_s17, %s971_s17   ;;  %s836_s16 = sphi %s881_s16, %s970_s16   ;;  %s832_s15 = sphi %s879_s15, %s969_s15  }
   0x4   : > { %p38_p0 = scmp.ge.s32.totalorder %s36_s20, 4  ;;  %p728_p1 = scmp.ge.s32.totalorder %s848_s19, 1 }
   0x5   : > { %p263_p2 = scmp.lt.s32.totalorder %s848_s19, 9 }
   0x6   : > { %s974_s20 = smov (%p38_p0, %s36_s20), 0  ;;  %s976_s21 = smov (!%p38_p0, %s40_s21), %s844_s18 }
   0x7   : > { %p264_p3 = pnand %p728_p1, %p263_p2  ;;  %p42_p4 = scmp.ge.s32.totalorder %s976_s21, 2 }
   0x8   : > { %p335_p5 = scmp.lt.s32.totalorder (!%p264_p3), %s836_s16, 1  ;;  %p337_p6 = scmp.lt.s32.totalorder (!%p264_p3), %s832_s15, 3  ;;  %vm399_vm0 = vcmask (!%p264_p3), 130048   ;;  %v850_v0 = vmov (!%p264_p3), 0.0   ;;  %vm851_vm1 = vmmov (!%p264_p3), 0   ;;  %vm396_vm2 = vcmask (!%p264_p3), 7168  }
   0x9   : > { %s978_s21 = smov (%p42_p4, %s976_s21), 0  ;;  %267 = sbr.rel (%p264_p3) target bundleno = 831 (0x33f), region = 36 }
   0xa   : > { %745 = vmatprep.subr.bf16.mxu0 (!%p264_p3), %v850_v0  ;;  %400 = vst.msk [vmem:[#allocation4] sm:$0xff] (!%p264_p3), %vm399_vm0, %v850_v0  ;;  %747 = vmatprep.mubr.msk.bf16.mxu0 (!%p264_p3), %vm851_vm1, %v850_v0  ;;  %v852_v4 = vmov (!%p264_p3), -inf   ;;  %vm455_vm4 = vcmask (!%p264_p3), 64512   ;;  %v853_v13 = vmov (!%p264_p3), 0   ;;  %vm491_vm5 = vcmask (!%p264_p3), 1043456  }
   0xb   : > { %751 = vmatprep.subr.bf16.mxu1 (!%p264_p3), %v850_v0  ;;  %753 = vmatprep.mubr.msk.bf16.mxu1 (!%p264_p3), %vm851_vm1, %v850_v0  ;;  %397 = vst.msk [vmem:[#allocation2] sm:$0xff] (!%p264_p3), %vm396_vm2, %v852_v4  ;;  %398 = vst.msk [vmem:[#allocation3] sm:$0xff] (!%p264_p3), %vm396_vm2, %v850_v0  ;;  %vm551_vm6 = vcmask (!%p264_p3), 125952  }
   0xc   : > { %802 = vset.pattern.permute.xlu0 (!%p264_p3), %v853_v13  ;;  %803 = vset.pattern.permute.xlu1 (!%p264_p3), %v853_v13 }
  0x10   : > { %s980_s16 = smov (!%p335_p5, %s836_s16), 1  ;;  %s982_s15 = smov (!%p337_p6, %s832_s15), 3 }
  0x11   : > { %s757_s22 = smul.u32 12, %s980_s16  ;;  %s732_s5 = sshll.u32 %s980_s16, 3  ;;  %v479_v33 = vld [vmem:[#allocation4] sm:$0xff] }
  0x12   : > { %s379_s8 = scalar_lea.vmem %s967_s3, %s732_s5  ;;  %v454_v14 = vld [vmem:[#allocation2] sm:$0xff]  ;;  %v471_v28 = vld [vmem:[#allocation3] sm:$0xff]  ;;  %s733_s12 = sshll.u32 %s980_s16, 2 }
  0x13   : > { %s343_s23 = sadd.s32 %s757_s22, %s982_s15  ;;  %v451_v5 = vld [vmem:[%s379_s8] sm:$0xff]  ;;  %s388_s13 = sadd.s32 %s733_s12, %s982_s15 }
  0x14   : > { %s916_s24 = sshll.u32 %s343_s23, 2  ;;  %vm452_vm3 = vcmp.ne.s32.totalorder %v451_v5, 0  ;;  %s734_s14 = sshll.u32 %s388_s13, 2 }
  0x15   : > { %s642_s27 = scalar_lea.vmem %s965_s1, %s916_s24  ;;  %s345_s30 = scalar_lea.vmem %s964_s0, %s916_s24 }
  0x16   : > { %v735_v1 = vld [vmem:[%s642_s27 + $0x10] sm:$0xf]  ;;  %v401_v3 = vld [vmem:[%s345_s30] sm:$0xf]  ;;  %s648_s11 = scalar_lea.vmem %s966_s2, %s916_s24  ;;  %s390_s24 = scalar_lea.vmem %s968_s4, %s734_s14 }
  0x17   : > { %v408_v2 = vsel %vm399_vm0, %v735_v1, 0  ;;  %v737_v18 = vld [vmem:[%s648_s11 + $0x20] sm:$0xf] }
  0x18   : > { %746 = vmatpush3.bf16.xpose.msra.mxu0 %v408_v2  ;;  %v493_v19 = vsel %vm491_vm5, %v737_v18, 0 }
  0x19   : > { %752 = vmatpush3.bf16.msra.mxu1 %v493_v19 }
  0x1f   : > { %748 = vmatmul.mubr.msk.bf16.vlgmr.msra.gmra.mrb[0].mxu0 %vm399_vm0, %v401_v3 }
  0xf2   : > { %v444_v6 = vpop.f32.mrb[0].mxu0 }
  0xf3   : > { %v450_v7 = vmul.f32 0.25, %v444_v6  ;;  %v749_v8 = vpop.f32.mrb[1].mxu0 }
  0xf4   : > { %v447_v9 = vpop.f32.mrb[2].mxu0 }
  0xf5   : > { %v750_v10 = vpop.f32.mrb[3].mxu0  ;;  %v453_v11 = vsel %vm452_vm3, %v450_v7, -1e+09 }
  0xf6   : > { %v456_v12 = vsel %vm455_vm4, %v453_v11, -inf }
  0xf7   : > { %457 = vmax.xlane.f32.xlu0 %v456_v12 }
 0x184   : > { %v458_v15 = vpop.xlane.xlu0 %457 }
 0x185   : > { %v459_v16 = vmax.f32 %v454_v14, %v458_v15 }
 0x187   : > { %v460_v17 = vsub.f32 %v454_v14, %v459_v16  ;;  %537 = vst.msk [vmem:[#allocation2] sm:$0xff] %vm396_vm2, %v459_v16  ;;  %465 = vperm.xlu0 %802, %v459_v16  }
 0x189   : > { %v461_v26 = vmul.f32 1.442695, %v460_v17 }
 0x206   : > { %v466_v20 = vpop.permute.xlu0 %465 }
 0x207   : > { %v468_v21 = vsub.f32 %v453_v11, %v466_v20 }
 0x209   : > { %v469_v22 = vmul.f32 1.442695, %v468_v21 }
 0x20b   : > { %804 = vpow2.f32 %v469_v22 }
 0x20c   : > { %806 = vpow2.f32 %v461_v26 }
 0x215   : > { %v805_v23 = vpop.eup %804 }
 0x216   : > { %v473_v24 = vsel %vm455_vm4, %v805_v23, 0.0  ;;  %v486_v25 = vpack.c.bf16 %v805_v23, %v805_v23  ;;  %v807_v27 = vpop.eup %806 }
 0x217   : > { %474 = vadd.xlane.f32.xlu1 %v473_v24  ;;  %v472_v29 = vmul.f32 %v807_v27, %v471_v28 }
 0x218   : > { %754 = vmatmul.mubr.msk.bf16.vlgmr.msra.gmra.mrb[0].mxu1 %vm455_vm4, %v486_v25 }
 0x228   : > { %482 = vperm.xlu1 %803, %v807_v27  }
 0x2a4   : > { %v475_v30 = vpop.xlane.xlu1 %474 }
 0x2a5   : > { %v476_v31 = vadd.f32 %v475_v30, %v472_v29 }
 0x2a7   : > { %478 = vst.msk [vmem:[#allocation3] sm:$0xff] %vm396_vm2, %v476_v31 }
 0x2a8   : > { %v483_v34 = vpop.permute.xlu1 %482 }
 0x2a9   : > { %v485_v35 = vmul.f32 %v483_v34, %v479_v33 }
 0x2ae   : > { %v542_v32 = vld [vmem:[#allocation3] sm:$0xff] }
 0x2af   : > { %545 = vperm.xlu1 %803, %v542_v32  }
 0x2eb   : > { %v529_v36 = vpop.f32.mrb[0].mxu1 }
 0x2ec   : > { %v535_v37 = vadd.f32 %v529_v36, %v485_v35  ;;  %v755_v38 = vpop.f32.mrb[1].mxu1 }
 0x2ed   : > { %v532_v39 = vpop.f32.mrb[2].mxu1 }
 0x2ee   : > { %536 = vst.msk [vmem:[#allocation4] sm:$0xff] %vm399_vm0, %v535_v37  ;;  %v756_v40 = vpop.f32.mrb[3].mxu1 }
 0x2f5   : > { %v541_v43 = vld [vmem:[#allocation4] sm:$0xff] }
 0x32e   : > { %v546_v41 = vpop.permute.xlu1 %545 }
 0x32f   : > { %808 = vrcp.f32 %v546_v41 }
 0x339   : > { %v809_v42 = vpop.eup %808 }
 0x33a   : > { %v549_v44 = vmul.f32 %v809_v42, %v541_v43 }
 0x33c   : > { %v550_v45 = vpack.c.bf16 %v549_v44, %v549_v44 }
 0x33e   : > { %552 = vst.msk [vmem:[%s390_s24] sm:$0xf] %vm551_vm6, %v550_v45 }
 0x33f PF: > { %s14_s19 = sadd.s32 1, %s848_s19   ;;  %s969_s15 = smov %s840_s17 }
 0x340   : > { %p11_p7 = scmp.ge.s32.totalorder %s14_s19, 10   ;;  %s970_s16 = smov %s844_s18 }
 0x341   : > { %s971_s17 = smov %s974_s20  ;;  %s972_s18 = smov %s978_s21 }
 0x342   :  { %13 = sbr.rel (!%p11_p7) target bundleno = 3 (0x3), region = 83 }

// kernel: fwd.42
= control target key start
LH: loop header
LB: loop body
LE: loop exit
PB: predicated region body
PF: predicated region fallthrough
CT: control target
= control target key end

     0   :  { %vm25_vm0 = vcmask 523264   ;;  %v232_v16 = vmov 0.0   ;;  %vm233_vm1 = vmmov 0   ;;  %vm182_vm2 = vcmask 519168   ;;  %s303_s0 = inlined_call_operand.vmem [shape: bf16[16,64], index: 0, kind: input, shape index: {}]   ;;  %s304_s1 = inlined_call_operand.vmem [shape: bf16[64,64], index: 1, kind: input, shape index: {}]   ;;  %s305_s3 = inlined_call_operand.vmem [shape: f32[1,64], index: 3, kind: input, shape index: {}]   ;;  %s306_s4 = inlined_call_operand.vmem [shape: f32[1,64], index: 4, kind: input, shape index: {}]   ;;  %s307_s2 = inlined_call_operand.vmem [shape: f32[1,64], index: 2, kind: input, shape index: {}]   ;;  %s308_s5 = inlined_call_operand.vmem [shape: bf16[16,64], index: 5, kind: output, shape index: {}]  }
   0x1   :  { %v202_v0 = vld [vmem:[%s303_s0] sm:$0xff]   ;;  %210 = vmatprep.subr.bf16.mxu0 %v232_v16  ;;  %76 = vst.msk [vmem:[#allocation2] sm:$0xff] %vm25_vm0, %v232_v16  ;;  %77 = vst.msk [vmem:[#allocation2 + $0x8] sm:$0xff] %vm25_vm0, %v232_v16  ;;  %v225_v17 = vld [vmem:[%s304_s1 + $0x8] sm:$0xff]   ;;  %218 = vmatprep.mubr.msk.bf16.mxu0 %vm233_vm1, %v232_v16 }
   0x2   :  { %v203_v1 = vunpack.c.l.bf16 %v202_v0  ;;  %v204_v2 = vunpack.c.h.bf16 %v202_v0  ;;  %v224_v15 = vld [vmem:[%s304_s1] sm:$0xff]   ;;  %v226_v18 = vld [vmem:[%s304_s1 + $0x10] sm:$0xff]   ;;  %v227_v19 = vld [vmem:[%s304_s1 + $0x18] sm:$0xff]  }
   0x3   :  { %211 = vmatpush3.bf16.msra.mxu0 %v224_v15  ;;  %v189_v28 = vld [vmem:[%s305_s3] ss:$0 sm:$0xff] }
   0x4   :  { %v26_v3 = vsel %vm25_vm0, %v203_v1, 0.0  ;;  %v29_v4 = vsel %vm25_vm0, %v204_v2, 0.0  ;;  %212 = vmatprep.subr.bf16.mxu0 %v232_v16  ;;  %v190_v32 = vld [vmem:[%s306_s4] ss:$0 sm:$0xff] }
   0x5   :  { %27 = vadd.xlane.f32.xlu0 %v26_v3  ;;  %v196_v45 = vld [vmem:[%s307_s2] ss:$0 sm:$0xff] }
   0x7   :  { %213 = vmatpush3.bf16.msra.mxu0 %v225_v17 }
   0x8   :  { %214 = vmatprep.subr.bf16.mxu0 %v232_v16  ;;  %v78_v37 = vld [vmem:[#allocation2] sm:$0xff]  ;;  %v79_v39 = vld [vmem:[#allocation2 + $0x8] sm:$0xff] }
   0x9   :  { %30 = vadd.xlane.f32.xlu0 %v29_v4 }
   0xb   :  { %215 = vmatpush3.bf16.msra.mxu0 %v226_v18 }
   0xc   :  { %216 = vmatprep.subr.bf16.mxu0 %v232_v16 }
   0xf   :  { %217 = vmatpush3.bf16.msra.mxu0 %v227_v19 }
  0x92   :  { %v28_v5 = vpop.xlane.xlu0 %27 }
  0x93   :  { %v33_v6 = vmul.f32 0.015625, %v28_v5 }
  0x95   :  { %v35_v7 = vsub.f32 %v203_v1, %v33_v6 }
  0x96   :  { %v31_v8 = vpop.xlane.xlu0 %30 }
  0x97   :  { %v34_v9 = vmul.f32 0.015625, %v31_v8  ;;  %v37_v10 = vmul.f32 %v35_v7, %v35_v7 }
  0x99   :  { %v36_v11 = vsub.f32 %v204_v2, %v34_v9  ;;  %v39_v12 = vsel %vm25_vm0, %v37_v10, 0.0 }
  0x9a   :  { %40 = vadd.xlane.f32.xlu1 %v39_v12 }
  0x9b   :  { %v38_v13 = vmul.f32 %v36_v11, %v36_v11 }
  0x9d   :  { %v42_v14 = vsel %vm25_vm0, %v38_v13, 0.0 }
  0x9e   :  { %43 = vadd.xlane.f32.xlu1 %v42_v14 }
 0x127   :  { %v41_v20 = vpop.xlane.xlu1 %40 }
 0x128   :  { %v45_v21 = vmul.f32 0.015625, %v41_v20 }
 0x12a   :  { %v47_v22 = vadd.f32 1e-06, %v45_v21 }
 0x12b   :  { %v44_v23 = vpop.xlane.xlu1 %43 }
 0x12c   :  { %228 = vrsqrt.f32 %v47_v22  ;;  %v46_v24 = vmul.f32 0.015625, %v44_v23 }
 0x12e   :  { %v48_v25 = vadd.f32 1e-06, %v46_v24 }
 0x130   :  { %230 = vrsqrt.f32 %v48_v25 }
 0x136   :  { %v229_v26 = vpop.eup %228 }
 0x137   :  { %v51_v27 = vmul.f32 %v229_v26, %v35_v7 }
 0x139   :  { %v60_v31 = vmul.f32 %v189_v28, %v51_v27 }
 0x13a   :  { %v231_v29 = vpop.eup %230 }
 0x13b   :  { %v52_v30 = vmul.f32 %v231_v29, %v36_v11  ;;  %v69_v34 = vadd.f32 %v190_v32, %v60_v31 }
 0x13d   :  { %v61_v33 = vmul.f32 %v189_v28, %v52_v30 }
 0x13f   :  { %v70_v35 = vadd.f32 %v190_v32, %v61_v33 }
 0x141   :  { %v71_v36 = vpack.c.bf16 %v70_v35, %v69_v34 }
 0x143   :  { %219 = vmatmul.mubr.msk.bf16.vlgmr.msra.gmra.mrb[0].mxu0 %vm25_vm0, %v71_v36 }
 0x216   :  { %v149_v38 = vpop.f32.mrb[0].mxu0 }
 0x217   :  { %v156_v40 = vadd.f32 %v149_v38, %v78_v37  ;;  %v220_v41 = vpop.f32.mrb[1].mxu0 }
 0x218   :  { %v152_v42 = vpop.f32.mrb[2].mxu0 }
 0x219   :  { %158 = vst.msk [vmem:[#allocation2] sm:$0xff] %vm25_vm0, %v156_v40  ;;  %v157_v43 = vadd.f32 %v152_v42, %v79_v39  ;;  %v221_v44 = vpop.f32.mrb[3].mxu0 }
 0x21b   :  { %159 = vst.msk [vmem:[#allocation2 + $0x8] sm:$0xff] %vm25_vm0, %v157_v43 }
 0x220   :  { %v163_v46 = vld [vmem:[#allocation2] sm:$0xff] }
 0x221   :  { %v172_v47 = vadd.f32 %v196_v45, %v163_v46 }
 0x222   :  { %v164_v48 = vld [vmem:[#allocation2 + $0x8] sm:$0xff] }
 0x223   :  { %v199_v49 = vpack.c.bf16 %v172_v47, %v172_v47  ;;  %v173_v50 = vadd.f32 %v196_v45, %v164_v48 }
 0x225   :  { %183 = vst.msk [vmem:[%s308_s5] sm:$0xf] %vm182_vm2, %v199_v49  ;;  %v200_v51 = vpack.c.bf16 %v173_v50, %v173_v50 }
 0x227   :  { %184 = vst.msk [vmem:[%s308_s5 + $0x4] sm:$0xf] %vm182_vm2, %v200_v51 }

// kernel: fwd.32
= control target key start
LH: loop header
LB: loop body
LE: loop exit
PB: predicated region body
PF: predicated region fallthrough
CT: control target
= control target key end

     0   :  { %vm25_vm0 = vcmask 523264   ;;  %v238_v16 = vmov 0.0   ;;  %vm239_vm1 = vmmov 0   ;;  %s302_s0 = inlined_call_operand.vmem [shape: bf16[16,64], index: 0, kind: input, shape index: {}]   ;;  %s303_s1 = inlined_call_operand.vmem [shape: bf16[64,128], index: 1, kind: input, shape index: {}]   ;;  %s304_s3 = inlined_call_operand.vmem [shape: f32[1,64], index: 3, kind: input, shape index: {}]   ;;  %s305_s4 = inlined_call_operand.vmem [shape: f32[1,64], index: 4, kind: input, shape index: {}]   ;;  %s306_s2 = inlined_call_operand.vmem [shape: f32[1,128], index: 2, kind: input, shape index: {}]   ;;  %s307_s5 = inlined_call_operand.vmem [shape: bf16[16,128], index: 5, kind: output, shape index: {}]  }
   0x1   :  { %v203_v0 = vld [vmem:[%s302_s0] sm:$0xff]   ;;  %216 = vmatprep.subr.bf16.mxu0 %v238_v16  ;;  %v231_v17 = vld [vmem:[%s303_s1 + $0x8] sm:$0xff]   ;;  %v232_v18 = vld [vmem:[%s303_s1 + $0x10] sm:$0xff]   ;;  %224 = vmatprep.mubr.msk.bf16.mxu0 %vm239_vm1, %v238_v16 }
   0x2   :  { %v204_v1 = vunpack.c.l.bf16 %v203_v0  ;;  %v205_v2 = vunpack.c.h.bf16 %v203_v0  ;;  %v230_v15 = vld [vmem:[%s303_s1] sm:$0xff]   ;;  %v233_v19 = vld [vmem:[%s303_s1 + $0x18] sm:$0xff]  }
   0x3   :  { %217 = vmatpush3.bf16.msra.mxu0 %v230_v15  ;;  %v190_v28 = vld [vmem:[%s304_s3] ss:$0 sm:$0xff] }
   0x4   :  { %v26_v3 = vsel %vm25_vm0, %v204_v1, 0.0  ;;  %v29_v4 = vsel %vm25_vm0, %v205_v2, 0.0  ;;  %218 = vmatprep.subr.bf16.mxu0 %v238_v16  ;;  %v191_v32 = vld [vmem:[%s305_s4] ss:$0 sm:$0xff] }
   0x5   :  { %27 = vadd.xlane.f32.xlu0 %v26_v3  ;;  %v197_v37 = vld [vmem:[%s306_s2] ss:$0 sm:$0xff] }
   0x7   :  { %219 = vmatpush3.bf16.msra.mxu0 %v231_v17 }
   0x8   :  { %220 = vmatprep.subr.bf16.mxu0 %v238_v16 }
   0x9   :  { %30 = vadd.xlane.f32.xlu0 %v29_v4 }
   0xb   :  { %221 = vmatpush3.bf16.msra.mxu0 %v232_v18 }
   0xc   :  { %222 = vmatprep.subr.bf16.mxu0 %v238_v16 }
   0xf   :  { %223 = vmatpush3.bf16.msra.mxu0 %v233_v19 }
  0x92   :  { %v28_v5 = vpop.xlane.xlu0 %27 }
  0x93   :  { %v33_v6 = vmul.f32 0.015625, %v28_v5 }
  0x95   :  { %v35_v7 = vsub.f32 %v204_v1, %v33_v6 }
  0x96   :  { %v31_v8 = vpop.xlane.xlu0 %30 }
  0x97   :  { %v34_v9 = vmul.f32 0.015625, %v31_v8  ;;  %v37_v10 = vmul.f32 %v35_v7, %v35_v7 }
  0x99   :  { %v36_v11 = vsub.f32 %v205_v2, %v34_v9  ;;  %v39_v12 = vsel %vm25_vm0, %v37_v10, 0.0 }
  0x9a   :  { %40 = vadd.xlane.f32.xlu1 %v39_v12 }
  0x9b   :  { %v38_v13 = vmul.f32 %v36_v11, %v36_v11 }
  0x9d   :  { %v42_v14 = vsel %vm25_vm0, %v38_v13, 0.0 }
  0x9e   :  { %43 = vadd.xlane.f32.xlu1 %v42_v14 }
 0x127   :  { %v41_v20 = vpop.xlane.xlu1 %40 }
 0x128   :  { %v45_v21 = vmul.f32 0.015625, %v41_v20 }
 0x12a   :  { %v47_v22 = vadd.f32 1e-06, %v45_v21 }
 0x12b   :  { %v44_v23 = vpop.xlane.xlu1 %43 }
 0x12c   :  { %234 = vrsqrt.f32 %v47_v22  ;;  %v46_v24 = vmul.f32 0.015625, %v44_v23 }
 0x12e   :  { %v48_v25 = vadd.f32 1e-06, %v46_v24 }
 0x130   :  { %236 = vrsqrt.f32 %v48_v25 }
 0x136   :  { %v235_v26 = vpop.eup %234 }
 0x137   :  { %v51_v27 = vmul.f32 %v235_v26, %v35_v7 }
 0x139   :  { %v60_v31 = vmul.f32 %v190_v28, %v51_v27 }
 0x13a   :  { %v237_v29 = vpop.eup %236 }
 0x13b   :  { %v52_v30 = vmul.f32 %v237_v29, %v36_v11  ;;  %v69_v34 = vadd.f32 %v191_v32, %v60_v31 }
 0x13d   :  { %v61_v33 = vmul.f32 %v190_v28, %v52_v30 }
 0x13f   :  { %v70_v35 = vadd.f32 %v191_v32, %v61_v33 }
 0x141   :  { %v71_v36 = vpack.c.bf16 %v70_v35, %v69_v34 }
 0x143   :  { %225 = vmatmul.mubr.msk.bf16.vlgmr.msra.gmra.mrb[0].mxu0 %vm25_vm0, %v71_v36 }
 0x216   :  { %v149_v38 = vpop.f32.mrb[0].mxu0 }
 0x217   :  { %v172_v39 = vadd.f32 %v197_v37, %v149_v38  ;;  %v226_v40 = vpop.f32.mrb[1].mxu0 }
 0x218   :  { %v152_v41 = vpop.f32.mrb[2].mxu0 }
 0x219   :  { %v173_v42 = vadd.f32 %v197_v37, %v152_v41  ;;  %v227_v43 = vpop.f32.mrb[3].mxu0  ;;  %v174_v44 = vmax.f32 %v172_v39, 0.0 }
 0x21b   :  { %v175_v45 = vmax.f32 %v173_v42, 0.0 }
 0x21d   :  { %v209_v46 = vpack.c.bf16 %v175_v45, %v174_v44 }
 0x21f   :  { %210 = vst [vmem:[%s307_s5] sm:$0xff] %v209_v46  }

// kernel: fwd.33
= control target key start
LH: loop header
LB: loop body
LE: loop exit
PB: predicated region body
PF: predicated region fallthrough
CT: control target
= control target key end

     0   :  { %vm24_vm0 = vcmask 523264   ;;  %v238_v0 = vmov 0.0   ;;  %vm239_vm1 = vmmov 0   ;;  %vm173_vm2 = vcmask 519168   ;;  %s308_s1 = inlined_call_operand.vmem [shape: bf16[128,64], index: 1, kind: input, shape index: {}]   ;;  %s309_s0 = inlined_call_operand.vmem [shape: bf16[16,128], index: 0, kind: input, shape index: {}]   ;;  %s310_s3 = inlined_call_operand.vmem [shape: bf16[16,64], index: 3, kind: input, shape index: {}]   ;;  %s311_s2 = inlined_call_operand.vmem [shape: f32[1,64], index: 2, kind: input, shape index: {}]   ;;  %s312_s4 = inlined_call_operand.vmem [shape: bf16[16,64], index: 4, kind: output, shape index: {}]  }
   0x1   :  { %207 = vmatprep.subr.bf16.mxu0 %v238_v0  ;;  %v229_v1 = vld [vmem:[%s308_s1] sm:$0xff]   ;;  %223 = vmatprep.mubr.msk.bf16.mxu0 %vm239_vm1, %v238_v0  ;;  %25 = vst.msk [vmem:[#allocation2] sm:$0xff] %vm24_vm0, %v238_v0  ;;  %26 = vst.msk [vmem:[#allocation2 + $0x8] sm:$0xff] %vm24_vm0, %v238_v0  ;;  %v230_v2 = vld [vmem:[%s308_s1 + $0x8] sm:$0xff]  }
   0x2   :  { %208 = vmatpush3.bf16.msra.mxu0 %v229_v1  ;;  %v231_v3 = vld [vmem:[%s308_s1 + $0x10] sm:$0xff]   ;;  %v232_v4 = vld [vmem:[%s308_s1 + $0x18] sm:$0xff]   ;;  %v233_v5 = vld [vmem:[%s308_s1 + $0x20] sm:$0xff]  }
   0x3   :  { %209 = vmatprep.subr.bf16.mxu0 %v238_v0  ;;  %v234_v6 = vld [vmem:[%s308_s1 + $0x28] sm:$0xff]   ;;  %v235_v7 = vld [vmem:[%s308_s1 + $0x30] sm:$0xff]   ;;  %v236_v8 = vld [vmem:[%s308_s1 + $0x38] sm:$0xff]  }
   0x4   :  { %v237_v9 = vld [vmem:[%s309_s0] sm:$0xff]  }
   0x5   :  { %v195_v18 = vld [vmem:[%s310_s3] sm:$0xff]  }
   0x6   :  { %210 = vmatpush3.bf16.msra.mxu0 %v230_v2  ;;  %v189_v19 = vld [vmem:[%s311_s2] ss:$0 sm:$0xff]  ;;  %v196_v20 = vunpack.c.l.bf16 %v195_v18  ;;  %v197_v23 = vunpack.c.h.bf16 %v195_v18 }
   0x7   :  { %211 = vmatprep.subr.bf16.mxu0 %v238_v0 }
   0x8   :  { %v27_v10 = vld [vmem:[#allocation2] sm:$0xff]  ;;  %v28_v12 = vld [vmem:[#allocation2 + $0x8] sm:$0xff] }
   0xa   :  { %212 = vmatpush3.bf16.msra.mxu0 %v231_v3 }
   0xb   :  { %213 = vmatprep.subr.bf16.mxu0 %v238_v0 }
   0xe   :  { %214 = vmatpush3.bf16.msra.mxu0 %v232_v4 }
   0xf   :  { %215 = vmatprep.subr.bf16.mxu0 %v238_v0 }
  0x12   :  { %216 = vmatpush3.bf16.msra.mxu0 %v233_v5 }
  0x13   :  { %217 = vmatprep.subr.bf16.mxu0 %v238_v0 }
  0x16   :  { %218 = vmatpush3.bf16.msra.mxu0 %v234_v6 }
  0x17   :  { %219 = vmatprep.subr.bf16.mxu0 %v238_v0 }
  0x1a   :  { %220 = vmatpush3.bf16.msra.mxu0 %v235_v7 }
  0x1b   :  { %221 = vmatprep.subr.bf16.mxu0 %v238_v0 }
  0x1e   :  { %222 = vmatpush3.bf16.msra.mxu0 %v236_v8 }
  0x21   :  { %224 = vmatmul.mubr.bf16.vlgmr.msra.gmra.mrb[0].mxu0 %v237_v9 }
  0xf4   :  { %v133_v11 = vpop.f32.mrb[0].mxu0 }
  0xf5   :  { %v140_v13 = vadd.f32 %v133_v11, %v27_v10  ;;  %v225_v14 = vpop.f32.mrb[1].mxu0 }
  0xf6   :  { %v136_v15 = vpop.f32.mrb[2].mxu0 }
  0xf7   :  { %143 = vst.msk [vmem:[#allocation2] sm:$0xff] %vm24_vm0, %v140_v13  ;;  %v141_v16 = vadd.f32 %v136_v15, %v28_v12  ;;  %v226_v17 = vpop.f32.mrb[3].mxu0 }
  0xf9   :  { %144 = vst.msk [vmem:[#allocation2 + $0x8] sm:$0xff] %vm24_vm0, %v141_v16 }
  0xfe   :  { %v148_v21 = vld [vmem:[#allocation2] sm:$0xff] }
  0xff   :  { %v157_v22 = vadd.f32 %v189_v19, %v148_v21 }
 0x100   :  { %v149_v24 = vld [vmem:[#allocation2 + $0x8] sm:$0xff] }
 0x101   :  { %v163_v25 = vadd.f32 %v196_v20, %v157_v22  ;;  %v158_v26 = vadd.f32 %v189_v19, %v149_v24 }
 0x103   :  { %v192_v27 = vpack.c.bf16 %v163_v25, %v163_v25  ;;  %v164_v28 = vadd.f32 %v197_v23, %v158_v26 }
 0x105   :  { %174 = vst.msk [vmem:[%s312_s4] sm:$0xf] %vm173_vm2, %v192_v27  ;;  %v193_v29 = vpack.c.bf16 %v164_v28, %v164_v28 }
 0x107   :  { %175 = vst.msk [vmem:[%s312_s4 + $0x4] sm:$0xf] %vm173_vm2, %v193_v29 }

// kernel: fwd.30
= control target key start
LH: loop header
LB: loop body
LE: loop exit
PB: predicated region body
PF: predicated region fallthrough
CT: control target
= control target key end

     0   :  { %s864_s15 = smov 0   ;;  %s866_s16 = smov 0   ;;  %s949_s0 = inlined_call_operand.vmem [shape: bf16[2,3,4,8,16], index: 0, kind: input, shape index: {}, may-alias: {0,1,2}]   ;;  %s950_s1 = inlined_call_operand.vmem [shape: bf16[2,3,4,8,16], index: 1, kind: input, shape index: {}, may-alias: {0,1,2}]   ;;  %s951_s2 = inlined_call_operand.vmem [shape: bf16[2,3,4,8,16], index: 2, kind: input, shape index: {}, may-alias: {0,1,2}]   ;;  %s952_s3 = inlined_call_operand.vmem [shape: s32[2,1,8], index: 3, kind: input, shape index: {}]   ;;  %s953_s4 = inlined_call_operand.vmem [shape: bf16[2,4,8,16], index: 4, kind: output, shape index: {}]  }
   0x1   :  { %s868_s17 = smov 0   ;;  %s870_s18 = smov 0  }
   0x2   :  { %s872_s19 = smov 0  }
   0x3 LB: > { %s36_s20 = sadd.s32 1, %s825_s17  ;;  %s40_s21 = sadd.s32 1, %s829_s18  ;;  %s833_s19 = sphi %s872_s19, %s14_s19   ;;  %s829_s18 = sphi %s870_s18, %s957_s18   ;;  %s825_s17 = sphi %s868_s17, %s956_s17   ;;  %s821_s16 = sphi %s866_s16, %s955_s16   ;;  %s817_s15 = sphi %s864_s15, %s954_s15  }
   0x4   : > { %p38_p0 = scmp.ge.s32.totalorder %s36_s20, 4  ;;  %p714_p1 = scmp.ge.s32.totalorder %s833_s19, 1 }
   0x5   : > { %p257_p2 = scmp.lt.s32.totalorder %s833_s19, 9 }
   0x6   : > { %s959_s20 = smov (%p38_p0, %s36_s20), 0  ;;  %s961_s21 = smov (!%p38_p0, %s40_s21), %s829_s18 }
   0x7   : > { %p258_p3 = pnand %p714_p1, %p257_p2  ;;  %p42_p4 = scmp.ge.s32.totalorder %s961_s21, 2 }
   0x8   : > { %p325_p5 = scmp.lt.s32.totalorder (!%p258_p3), %s821_s16, 1  ;;  %p327_p6 = scmp.lt.s32.totalorder (!%p258_p3), %s817_s15, 3  ;;  %vm385_vm0 = vcmask (!%p258_p3), 130048   ;;  %v835_v0 = vmov (!%p258_p3), 0.0   ;;  %vm836_vm1 = vmmov (!%p258_p3), 0   ;;  %v837_v4 = vmov (!%p258_p3), 0  }
   0x9   : > { %s963_s21 = smov (%p42_p4, %s961_s21), 0  ;;  %261 = sbr.rel (%p258_p3) target bundleno = 831 (0x33f), region = 36 }
   0xa   : > { %730 = vmatprep.subr.bf16.mxu0 (!%p258_p3), %v835_v0  ;;  %386 = vst.msk [vmem:[#allocation4] sm:$0xff] (!%p258_p3), %vm385_vm0, %v835_v0  ;;  %732 = vmatprep.mubr.msk.bf16.mxu0 (!%p258_p3), %vm836_vm1, %v835_v0  ;;  %vm382_vm2 = vcmask (!%p258_p3), 7168   ;;  %v838_v5 = vmov (!%p258_p3), -inf   ;;  %v440_v6 = vlaneseq (!%p258_p3)  ;;  %vm447_vm5 = vcmask (!%p258_p3), 64512  }
   0xb   : > { %736 = vmatprep.subr.bf16.mxu1 (!%p258_p3), %v835_v0  ;;  %738 = vmatprep.mubr.msk.bf16.mxu1 (!%p258_p3), %vm836_vm1, %v835_v0  ;;  %383 = vst.msk [vmem:[#allocation2] sm:$0xff] (!%p258_p3), %vm382_vm2, %v838_v5  ;;  %384 = vst.msk [vmem:[#allocation3] sm:$0xff] (!%p258_p3), %vm382_vm2, %v835_v0  ;;  %vm483_vm6 = vcmask (!%p258_p3), 1043456   ;;  %vm543_vm7 = vcmask (!%p258_p3), 125952  }
   0xc   : > { %787 = vset.pattern.permute.xlu0 (!%p258_p3), %v837_v4  ;;  %788 = vset.pattern.permute.xlu1 (!%p258_p3), %v837_v4  ;;  %v441_v8 = vshrl.u32 (!%p258_p3), %v440_v6, 7 }
   0xe   : > { %v442_v9 = vsub.s32 (!%p258_p3), 0, %v441_v8 }
  0x10   : > { %s965_s16 = smov (!%p325_p5, %s821_s16), 1  ;;  %s967_s15 = smov (!%p327_p6, %s817_s15), 3 }
  0x11   : > { %s742_s22 = smul.u32 12, %s965_s16  ;;  %s365_s7 = scalar_lea.vmem %s952_s3, %s965_s16  ;;  %v471_v38 = vld [vmem:[#allocation4] sm:$0xff] }
  0x12   : > { %v437_v7 = vld [vmem:[%s365_s7] sm:$0x1]  ;;  %v463_v33 = vld [vmem:[#allocation3] sm:$0xff]  ;;  %s718_s11 = sshll.u32 %s965_s16, 2 }
  0x13   : > { %s333_s23 = sadd.s32 %s742_s22, %s967_s15  ;;  %vm438_vm3 = vcmp.ne.s32.totalorder %v437_v7, 0  ;;  %v446_v19 = vld [vmem:[#allocation2] sm:$0xff]  ;;  %s374_s12 = sadd.s32 %s718_s11, %s967_s15 }
  0x14   : > { %s901_s24 = sshll.u32 %s333_s23, 2  ;;  %v439_v10 = vsel %vm438_vm3, 1, %v837_v4  ;;  %s719_s13 = sshll.u32 %s374_s12, 2 }
  0x15   : > { %s630_s27 = scalar_lea.vmem %s950_s1, %s901_s24  ;;  %s335_s30 = scalar_lea.vmem %s949_s0, %s901_s24  ;;  %v443_v11 = vrot.slane %v439_v10, %v442_v9 }
  0x16   : > { %v720_v1 = vld [vmem:[%s630_s27 + $0x10] sm:$0xf]  ;;  %v387_v3 = vld [vmem:[%s335_s30] sm:$0xf]  ;;  %s636_s10 = scalar_lea.vmem %s951_s2, %s901_s24  ;;  %s376_s23 = scalar_lea.vmem %s953_s4, %s719_s13 }
  0x17   : > { %v394_v2 = vsel %vm385_vm0, %v720_v1, 0  ;;  %vm444_vm4 = vcmp.eq.s32.totalorder %v443_v11, 1  ;;  %v722_v23 = vld [vmem:[%s636_s10 + $0x20] sm:$0xf] }
  0x18   : > { %731 = vmatpush3.bf16.xpose.msra.mxu0 %v394_v2  ;;  %v485_v24 = vsel %vm483_vm6, %v722_v23, 0 }
  0x19   : > { %737 = vmatpush3.bf16.msra.mxu1 %v485_v24 }
  0x1f   : > { %733 = vmatmul.mubr.msk.bf16.vlgmr.msra.gmra.mrb[0].mxu0 %vm385_vm0, %v387_v3 }
  0xf2   : > { %v430_v12 = vpop.f32.mrb[0].mxu0 }
  0xf3   : > { %v436_v13 = vmul.f32 0.25, %v430_v12  ;;  %v734_v14 = vpop.f32.mrb[1].mxu0 }
  0xf4   : > { %v433_v15 = vpop.f32.mrb[2].mxu0 }
  0xf5   : > { %v735_v16 = vpop.f32.mrb[3].mxu0  ;;  %v445_v17 = vsel %vm444_vm4, %v436_v13, -1e+09 }
  0xf6   : > { %v448_v18 = vsel %vm447_vm5, %v445_v17, -inf }
  0xf7   : > { %449 = vmax.xlane.f32.xlu0 %v448_v18 }
 0x184   : > { %v450_v20 = vpop.xlane.xlu0 %449 }
 0x185   : > { %v451_v21 = vmax.f32 %v446_v19, %v450_v20 }
 0x187   : > { %v452_v22 = vsub.f32 %v446_v19, %v451_v21  ;;  %529 = vst.msk [vmem:[#allocation2] sm:$0xff] %vm382_vm2, %v451_v21  ;;  %457 = vperm.xlu0 %787, %v451_v21  }
 0x189   : > { %v453_v31 = vmul.f32 1.442695, %v452_v22 }
 0x206   : > { %v458_v25 = vpop.permute.xlu0 %457 }
 0x207   : > { %v460_v26 = vsub.f32 %v445_v17, %v458_v25 }
 0x209   : > { %v461_v27 = vmul.f32 1.442695, %v460_v26 }
 0x20b   : > { %789 = vpow2.f32 %v461_v27 }
 0x20c   : > { %791 = vpow2.f32 %v453_v31 }
 0x215   : > { %v790_v28 = vpop.eup %789 }
 0x216   : > { %v465_v29 = vsel %vm447_vm5, %v790_v28, 0.0  ;;  %v478_v30 = vpack.c.bf16 %v790_v28, %v790_v28  ;;  %v792_v32 = vpop.eup %791 }
 0x217   : > { %466 = vadd.xlane.f32.xlu1 %v465_v29  ;;  %v464_v34 = vmul.f32 %v792_v32, %v463_v33 }
 0x218   : > { %739 = vmatmul.mubr.msk.bf16.vlgmr.msra.gmra.mrb[0].mxu1 %vm447_vm5, %v478_v30 }
 0x228   : > { %474 = vperm.xlu1 %788, %v792_v32  }
 0x2a4   : > { %v467_v35 = vpop.xlane.xlu1 %466 }
 0x2a5   : > { %v468_v36 = vadd.f32 %v467_v35, %v464_v34 }
 0x2a7   : > { %470 = vst.msk [vmem:[#allocation3] sm:$0xff] %vm382_vm2, %v468_v36 }
 0x2a8   : > { %v475_v39 = vpop.permute.xlu1 %474 }
 0x2a9   : > { %v477_v40 = vmul.f32 %v475_v39, %v471_v38 }
 0x2ae   : > { %v534_v37 = vld [vmem:[#allocation3] sm:$0xff] }
 0x2af   : > { %537 = vperm.xlu1 %788, %v534_v37  }
 0x2eb   : > { %v521_v41 = vpop.f32.mrb[0].mxu1 }
 0x2ec   : > { %v527_v42 = vadd.f32 %v521_v41, %v477_v40  ;;  %v740_v43 = vpop.f32.mrb[1].mxu1 }
 0x2ed   : > { %v524_v44 = vpop.f32.mrb[2].mxu1 }
 0x2ee   : > { %528 = vst.msk [vmem:[#allocation4] sm:$0xff] %vm385_vm0, %v527_v42  ;;  %v741_v45 = vpop.f32.mrb[3].mxu1 }
 0x2f5   : > { %v533_v48 = vld [vmem:[#allocation4] sm:$0xff] }
 0x32e   : > { %v538_v46 = vpop.permute.xlu1 %537 }
 0x32f   : > { %793 = vrcp.f32 %v538_v46 }
 0x339   : > { %v794_v47 = vpop.eup %793 }
 0x33a   : > { %v541_v49 = vmul.f32 %v794_v47, %v533_v48 }
 0x33c   : > { %v542_v50 = vpack.c.bf16 %v541_v49, %v541_v49 }
 0x33e   : > { %544 = vst.msk [vmem:[%s376_s23] sm:$0xf] %vm543_vm7, %v542_v50 }
 0x33f PF: > { %s14_s19 = sadd.s32 1, %s833_s19   ;;  %s954_s15 = smov %s825_s17 }
 0x340   : > { %p11_p7 = scmp.ge.s32.totalorder %s14_s19, 10   ;;  %s955_s16 = smov %s829_s18 }
 0x341   : > { %s956_s17 = smov %s959_s20  ;;  %s957_s18 = smov %s963_s21 }
 0x342   :  { %13 = sbr.rel (!%p11_p7) target bundleno = 3 (0x3), region = 83 }

// kernel: fwd.43
= control target key start
LH: loop header
LB: loop body
LE: loop exit
PB: predicated region body
PF: predicated region fallthrough
CT: control target
= control target key end

     0   :  { %vm25_vm0 = vcmask 523264   ;;  %v236_v16 = vmov 0.0   ;;  %vm237_vm1 = vmmov 0   ;;  %s300_s0 = inlined_call_operand.vmem [shape: bf16[16,64], index: 0, kind: input, shape index: {}]   ;;  %s301_s1 = inlined_call_operand.vmem [shape: bf16[64,128], index: 1, kind: input, shape index: {}]   ;;  %s302_s3 = inlined_call_operand.vmem [shape: f32[1,64], index: 3, kind: input, shape index: {}]   ;;  %s303_s4 = inlined_call_operand.vmem [shape: f32[1,64], index: 4, kind: input, shape index: {}]   ;;  %s304_s2 = inlined_call_operand.vmem [shape: f32[1,128], index: 2, kind: input, shape index: {}]   ;;  %s305_s5 = inlined_call_operand.vmem [shape: bf16[16,128], index: 5, kind: output, shape index: {}]  }
   0x1   :  { %v201_v0 = vld [vmem:[%s300_s0] sm:$0xff]   ;;  %214 = vmatprep.subr.bf16.mxu0 %v236_v16  ;;  %v229_v17 = vld [vmem:[%s301_s1 + $0x8] sm:$0xff]   ;;  %v230_v18 = vld [vmem:[%s301_s1 + $0x10] sm:$0xff]   ;;  %222 = vmatprep.mubr.msk.bf16.mxu0 %vm237_vm1, %v236_v16 }
   0x2   :  { %v202_v1 = vunpack.c.l.bf16 %v201_v0  ;;  %v203_v2 = vunpack.c.h.bf16 %v201_v0  ;;  %v228_v15 = vld [vmem:[%s301_s1] sm:$0xff]   ;;  %v231_v19 = vld [vmem:[%s301_s1 + $0x18] sm:$0xff]  }
   0x3   :  { %215 = vmatpush3.bf16.msra.mxu0 %v228_v15  ;;  %v188_v28 = vld [vmem:[%s302_s3] ss:$0 sm:$0xff] }
   0x4   :  { %v26_v3 = vsel %vm25_vm0, %v202_v1, 0.0  ;;  %v29_v4 = vsel %vm25_vm0, %v203_v2, 0.0  ;;  %216 = vmatprep.subr.bf16.mxu0 %v236_v16  ;;  %v189_v32 = vld [vmem:[%s303_s4] ss:$0 sm:$0xff] }
   0x5   :  { %27 = vadd.xlane.f32.xlu0 %v26_v3  ;;  %v195_v38 = vld [vmem:[%s304_s2] ss:$0 sm:$0xff] }
   0x7   :  { %217 = vmatpush3.bf16.msra.mxu0 %v229_v17 }
   0x8   :  { %218 = vmatprep.subr.bf16.mxu0 %v236_v16 }
   0x9   :  { %30 = vadd.xlane.f32.xlu0 %v29_v4 }
   0xb   :  { %219 = vmatpush3.bf16.msra.mxu0 %v230_v18 }
   0xc   :  { %220 = vmatprep.subr.bf16.mxu0 %v236_v16 }
   0xf   :  { %221 = vmatpush3.bf16.msra.mxu0 %v231_v19 }
  0x92   :  { %v28_v5 = vpop.xlane.xlu0 %27 }
  0x93   :  { %v33_v6 = vmul.f32 0.015625, %v28_v5 }
  0x95   :  { %v35_v7 = vsub.f32 %v202_v1, %v33_v6 }
  0x96   :  { %v31_v8 = vpop.xlane.xlu0 %30 }
  0x97   :  { %v34_v9 = vmul.f32 0.015625, %v31_v8  ;;  %v37_v10 = vmul.f32 %v35_v7, %v35_v7 }
  0x99   :  { %v36_v11 = vsub.f32 %v203_v2, %v34_v9  ;;  %v39_v12 = vsel %vm25_vm0, %v37_v10, 0.0 }
  0x9a   :  { %40 = vadd.xlane.f32.xlu1 %v39_v12 }
  0x9b   :  { %v38_v13 = vmul.f32 %v36_v11, %v36_v11 }
  0x9d   :  { %v42_v14 = vsel %vm25_vm0, %v38_v13, 0.0 }
  0x9e   :  { %43 = vadd.xlane.f32.xlu1 %v42_v14 }
 0x127   :  { %v41_v20 = vpop.xlane.xlu1 %40 }
 0x128   :  { %v45_v21 = vmul.f32 0.015625, %v41_v20 }
 0x12a   :  { %v47_v22 = vadd.f32 1e-06, %v45_v21 }
 0x12b   :  { %v44_v23 = vpop.xlane.xlu1 %43 }
 0x12c   :  { %232 = vrsqrt.f32 %v47_v22  ;;  %v46_v24 = vmul.f32 0.015625, %v44_v23 }
 0x12e   :  { %v48_v25 = vadd.f32 1e-06, %v46_v24 }
 0x130   :  { %234 = vrsqrt.f32 %v48_v25 }
 0x136   :  { %v233_v26 = vpop.eup %232 }
 0x137   :  { %v51_v27 = vmul.f32 %v233_v26, %v35_v7 }
 0x139   :  { %v60_v31 = vmul.f32 %v188_v28, %v51_v27 }
 0x13a   :  { %v235_v29 = vpop.eup %234 }
 0x13b   :  { %v52_v30 = vmul.f32 %v235_v29, %v36_v11  ;;  %v69_v34 = vadd.f32 %v189_v32, %v60_v31 }
 0x13d   :  { %v61_v33 = vmul.f32 %v188_v28, %v52_v30 }
 0x13f   :  { %v70_v35 = vadd.f32 %v189_v32, %v61_v33 }
 0x141   :  { %v71_v36 = vpack.c.bf16 %v70_v35, %v69_v34 }
 0x143   :  { %223 = vmatmul.mubr.msk.bf16.vlgmr.msra.gmra.mrb[0].mxu0 %vm25_vm0, %v71_v36 }
 0x216   :  { %v149_v37 = vpop.f32.mrb[0].mxu0 }
 0x217   :  { %v224_v39 = vpop.f32.mrb[1].mxu0  ;;  %v172_v41 = vadd.f32 %v195_v38, %v149_v37 }
 0x218   :  { %v152_v40 = vpop.f32.mrb[2].mxu0 }
 0x219   :  { %v173_v42 = vadd.f32 %v195_v38, %v152_v40  ;;  %v225_v43 = vpop.f32.mrb[3].mxu0 }
 0x21b   :  { %v207_v44 = vpack.c.bf16 %v173_v42, %v172_v41 }
 0x21d   :  { %208 = vst [vmem:[%s305_s5] sm:$0xff] %v207_v44  }

// kernel: fwd.44
= control target key start
LH: loop header
LB: loop body
LE: loop exit
PB: predicated region body
PF: predicated region fallthrough
CT: control target
= control target key end

     0   :  { %s859_s15 = smov 0   ;;  %s861_s16 = smov 0   ;;  %s944_s0 = inlined_call_operand.vmem [shape: bf16[2,4,8,16], index: 0, kind: input, shape index: {}]   ;;  %s945_s1 = inlined_call_operand.vmem [shape: bf16[2,2,4,8,16], index: 1, kind: input, shape index: {}, may-alias: {1,2}]   ;;  %s946_s2 = inlined_call_operand.vmem [shape: bf16[2,2,4,8,16], index: 2, kind: input, shape index: {}, may-alias: {1,2}]   ;;  %s947_s3 = inlined_call_operand.vmem [shape: s32[2,1,8], index: 3, kind: input, shape index: {}]   ;;  %s948_s4 = inlined_call_operand.vmem [shape: bf16[2,4,8,16], index: 4, kind: output, shape index: {}]  }
   0x1   :  { %s863_s17 = smov 0   ;;  %s865_s18 = smov 0  }
   0x2   :  { %s867_s19 = smov 0  }
   0x3 LB: > { %s36_s20 = sadd.s32 1, %s820_s17  ;;  %s40_s21 = sadd.s32 1, %s824_s18  ;;  %s828_s19 = sphi %s867_s19, %s14_s19   ;;  %s824_s18 = sphi %s865_s18, %s952_s18   ;;  %s820_s17 = sphi %s863_s17, %s951_s17   ;;  %s816_s16 = sphi %s861_s16, %s950_s16   ;;  %s812_s15 = sphi %s859_s15, %s949_s15  }
   0x4   : > { %p38_p0 = scmp.ge.s32.totalorder %s36_s20, 4  ;;  %p708_p1 = scmp.ge.s32.totalorder %s828_s19, 1 }
   0x5   : > { %p256_p2 = scmp.lt.s32.totalorder %s828_s19, 9 }
   0x6   : > { %s954_s20 = smov (%p38_p0, %s36_s20), 0  ;;  %s956_s21 = smov (!%p38_p0, %s40_s21), %s824_s18 }
   0x7   : > { %p257_p3 = pnand %p708_p1, %p256_p2  ;;  %p42_p4 = scmp.ge.s32.totalorder %s956_s21, 2 }
   0x8   : > { %p323_p5 = scmp.lt.s32.totalorder (!%p257_p3), %s816_s16, 1  ;;  %p325_p6 = scmp.lt.s32.totalorder (!%p257_p3), %s812_s15, 3  ;;  %vm382_vm0 = vcmask (!%p257_p3), 130048   ;;  %v830_v0 = vmov (!%p257_p3), 0.0   ;;  %vm831_vm1 = vmmov (!%p257_p3), 0   ;;  %v832_v4 = vmov (!%p257_p3), 0  }
   0x9   : > { %s958_s21 = smov (%p42_p4, %s956_s21), 0  ;;  %260 = sbr.rel (%p257_p3) target bundleno = 830 (0x33e), region = 36 }
   0xa   : > { %726 = vmatprep.subr.bf16.mxu0 (!%p257_p3), %v830_v0  ;;  %383 = vst.msk [vmem:[#allocation4] sm:$0xff] (!%p257_p3), %vm382_vm0, %v830_v0  ;;  %728 = vmatprep.mubr.msk.bf16.mxu0 (!%p257_p3), %vm831_vm1, %v830_v0  ;;  %vm379_vm2 = vcmask (!%p257_p3), 7168   ;;  %v833_v5 = vmov (!%p257_p3), -inf   ;;  %v437_v6 = vlaneseq (!%p257_p3)  ;;  %vm444_vm5 = vcmask (!%p257_p3), 64512  }
   0xb   : > { %732 = vmatprep.subr.bf16.mxu1 (!%p257_p3), %v830_v0  ;;  %734 = vmatprep.mubr.msk.bf16.mxu1 (!%p257_p3), %vm831_vm1, %v830_v0  ;;  %380 = vst.msk [vmem:[#allocation2] sm:$0xff] (!%p257_p3), %vm379_vm2, %v833_v5  ;;  %381 = vst.msk [vmem:[#allocation3] sm:$0xff] (!%p257_p3), %vm379_vm2, %v830_v0  ;;  %vm480_vm6 = vcmask (!%p257_p3), 1043456   ;;  %vm540_vm7 = vcmask (!%p257_p3), 125952  }
   0xc   : > { %782 = vset.pattern.permute.xlu0 (!%p257_p3), %v832_v4  ;;  %783 = vset.pattern.permute.xlu1 (!%p257_p3), %v832_v4  ;;  %v438_v8 = vshrl.u32 (!%p257_p3), %v437_v6, 7 }
   0xe   : > { %v439_v9 = vsub.s32 (!%p257_p3), 0, %v438_v8 }
  0x10   : > { %s960_s16 = smov (!%p323_p5, %s816_s16), 1  ;;  %s962_s15 = smov (!%p325_p6, %s812_s15), 3 }
  0x11   : > { %s711_s22 = sshll.u32 %s960_s16, 3  ;;  %s709_s23 = sshll.u32 %s960_s16, 2  ;;  %v468_v38 = vld [vmem:[#allocation4] sm:$0xff] }
  0x12   : > { %s890_s24 = sadd.s32 %s711_s22, %s962_s15  ;;  %s892_s25 = sadd.s32 %s709_s23, %s962_s15  ;;  %v443_v19 = vld [vmem:[#allocation2] sm:$0xff]  ;;  %v460_v33 = vld [vmem:[#allocation3] sm:$0xff] }
  0x13   : > { %s712_s26 = sshll.u32 %s890_s24, 2  ;;  %s710_s30 = sshll.u32 %s892_s25, 2 }
  0x14   : > { %s344_s29 = scalar_lea.vmem %s945_s1, %s712_s26  ;;  %s333_s7 = scalar_lea.vmem %s944_s0, %s710_s30 }
  0x15   : > { %v385_v1 = vld [vmem:[%s344_s29] sm:$0xf]  ;;  %s362_s10 = scalar_lea.vmem %s947_s3, %s960_s16  ;;  %s630_s13 = scalar_lea.vmem %s946_s2, %s712_s26 }
  0x16   : > { %v391_v2 = vsel %vm382_vm0, %v385_v1, 0  ;;  %v384_v3 = vld [vmem:[%s333_s7] sm:$0xf]  ;;  %v718_v23 = vld [vmem:[%s630_s13 + $0x10] sm:$0xf]  ;;  %s373_s16 = scalar_lea.vmem %s948_s4, %s710_s30 }
  0x17   : > { %727 = vmatpush3.bf16.xpose.msra.mxu0 %v391_v2  ;;  %v434_v7 = vld [vmem:[%s362_s10] sm:$0x1]  ;;  %v482_v24 = vsel %vm480_vm6, %v718_v23, 0 }
  0x18   : > { %vm435_vm3 = vcmp.ne.s32.totalorder %v434_v7, 0  ;;  %733 = vmatpush3.bf16.msra.mxu1 %v482_v24 }
  0x19   : > { %v436_v10 = vsel %vm435_vm3, 1, %v832_v4 }
  0x1a   : > { %v440_v11 = vrot.slane %v436_v10, %v439_v9 }
  0x1c   : > { %vm441_vm4 = vcmp.eq.s32.totalorder %v440_v11, 1 }
  0x1e   : > { %729 = vmatmul.mubr.msk.bf16.vlgmr.msra.gmra.mrb[0].mxu0 %vm382_vm0, %v384_v3 }
  0xf1   : > { %v427_v12 = vpop.f32.mrb[0].mxu0 }
  0xf2   : > { %v433_v13 = vmul.f32 0.25, %v427_v12  ;;  %v730_v14 = vpop.f32.mrb[1].mxu0 }
  0xf3   : > { %v430_v15 = vpop.f32.mrb[2].mxu0 }
  0xf4   : > { %v731_v16 = vpop.f32.mrb[3].mxu0  ;;  %v442_v17 = vsel %vm441_vm4, %v433_v13, -1e+09 }
  0xf5   : > { %v445_v18 = vsel %vm444_vm5, %v442_v17, -inf }
  0xf6   : > { %446 = vmax.xlane.f32.xlu0 %v445_v18 }
 0x183   : > { %v447_v20 = vpop.xlane.xlu0 %446 }
 0x184   : > { %v448_v21 = vmax.f32 %v443_v19, %v447_v20 }
 0x186   : > { %v449_v22 = vsub.f32 %v443_v19, %v448_v21  ;;  %526 = vst.msk [vmem:[#allocation2] sm:$0xff] %vm379_vm2, %v448_v21  ;;  %454 = vperm.xlu0 %782, %v448_v21  }
 0x188   : > { %v450_v31 = vmul.f32 1.442695, %v449_v22 }
 0x205   : > { %v455_v25 = vpop.permute.xlu0 %454 }
 0x206   : > { %v457_v26 = vsub.f32 %v442_v17, %v455_v25 }
 0x208   : > { %v458_v27 = vmul.f32 1.442695, %v457_v26 }
 0x20a   : > { %784 = vpow2.f32 %v458_v27 }
 0x20b   : > { %786 = vpow2.f32 %v450_v31 }
 0x214   : > { %v785_v28 = vpop.eup %784 }
 0x215   : > { %v462_v29 = vsel %vm444_vm5, %v785_v28, 0.0  ;;  %v475_v30 = vpack.c.bf16 %v785_v28, %v785_v28  ;;  %v787_v32 = vpop.eup %786 }
 0x216   : > { %463 = vadd.xlane.f32.xlu1 %v462_v29  ;;  %v461_v34 = vmul.f32 %v787_v32, %v460_v33 }
 0x217   : > { %735 = vmatmul.mubr.msk.bf16.vlgmr.msra.gmra.mrb[0].mxu1 %vm444_vm5, %v475_v30 }
 0x227   : > { %471 = vperm.xlu1 %783, %v787_v32  }
 0x2a3   : > { %v464_v35 = vpop.xlane.xlu1 %463 }
 0x2a4   : > { %v465_v36 = vadd.f32 %v464_v35, %v461_v34 }
 0x2a6   : > { %467 = vst.msk [vmem:[#allocation3] sm:$0xff] %vm379_vm2, %v465_v36 }
 0x2a7   : > { %v472_v39 = vpop.permute.xlu1 %471 }
 0x2a8   : > { %v474_v40 = vmul.f32 %v472_v39, %v468_v38 }
 0x2ad   : > { %v531_v37 = vld [vmem:[#allocation3] sm:$0xff] }
 0x2ae   : > { %534 = vperm.xlu1 %783, %v531_v37  }
 0x2ea   : > { %v518_v41 = vpop.f32.mrb[0].mxu1 }
 0x2eb   : > { %v524_v42 = vadd.f32 %v518_v41, %v474_v40  ;;  %v736_v43 = vpop.f32.mrb[1].mxu1 }
 0x2ec   : > { %v521_v44 = vpop.f32.mrb[2].mxu1 }
 0x2ed   : > { %525 = vst.msk [vmem:[#allocation4] sm:$0xff] %vm382_vm0, %v524_v42  ;;  %v737_v45 = vpop.f32.mrb[3].mxu1 }
 0x2f4   : > { %v530_v48 = vld [vmem:[#allocation4] sm:$0xff] }
 0x32d   : > { %v535_v46 = vpop.permute.xlu1 %534 }
 0x32e   : > { %788 = vrcp.f32 %v535_v46 }
 0x338   : > { %v789_v47 = vpop.eup %788 }
 0x339   : > { %v538_v49 = vmul.f32 %v789_v47, %v530_v48 }
 0x33b   : > { %v539_v50 = vpack.c.bf16 %v538_v49, %v538_v49 }
 0x33d   : > { %541 = vst.msk [vmem:[%s373_s16] sm:$0xf] %vm540_vm7, %v539_v50 }
 0x33e PF: > { %s14_s19 = sadd.s32 1, %s828_s19   ;;  %s949_s15 = smov %s820_s17 }
 0x33f   : > { %p11_p7 = scmp.ge.s32.totalorder %s14_s19, 10   ;;  %s950_s16 = smov %s824_s18 }
 0x340   : > { %s951_s17 = smov %s954_s20  ;;  %s952_s18 = smov %s958_s21 }
 0x341   :  { %13 = sbr.rel (!%p11_p7) target bundleno = 3 (0x3), region = 83 }

// kernel: fwd.57
= control target key start
LH: loop header
LB: loop body
LE: loop exit
PB: predicated region body
PF: predicated region fallthrough
CT: control target
= control target key end

     0   :  { %10 = vsyncpa [#allocation5], 0  ;;  %s943_s0 = inlined_call_operand.vmem [shape: bf16[16,64], index: 0, kind: input, shape index: {}]   ;;  %s944_s1 = inlined_call_operand.vmem [shape: bf16[64,128], index: 1, kind: input, shape index: {}]   ;;  %s945_s2 = inlined_call_operand.vmem [shape: f32[1,128], index: 2, kind: input, shape index: {}]   ;;  %s946_s3 = inlined_call_operand.vmem [shape: f32[1,64], index: 3, kind: input, shape index: {}]   ;;  %s947_s4 = inlined_call_operand.vmem [shape: f32[1,64], index: 4, kind: input, shape index: {}]   ;;  %s948_s5 = inlined_call_operand.hbm [shape: f32[16,128], index: 5, kind: output, shape index: {}]  }
   0x1   :  { %12 = vsyncpa [#allocation5 + $0x1], 0  ;;  %s839_s18 = smov 0   ;;  %s841_s19 = smov 0  }
   0x2   :  { %s843_s20 = smov 0  }
   0x3 LB: > { %s634_s21 = sadd.s32 4294967295, %s798_s20   ;;  %s635_s22 = sadd.s32 4294967294, %s798_s20   ;;  %s798_s20 = sphi %s843_s20, %s18_s20   ;;  %s794_s19 = sphi %s841_s19, %s951_s19   ;;  %s790_s18 = sphi %s839_s18, %s950_s18  }
   0x4   : > { %s33_s23 = sadd.s32 1, %s794_s19  ;;  %p640_p0 = scmp.ge.s32.totalorder %s798_s20, 1 }
   0x5   : > { %p35_p1 = scmp.ge.s32.totalorder %s33_s23, 2  ;;  %p231_p2 = scmp.lt.s32.totalorder %s798_s20, 3 }
   0x7   : > { %s953_s23 = smov (%p35_p1, %s33_s23), 0  ;;  %p232_p3 = pnand %p640_p0, %p231_p2 }
   0x8   : > { %v658_v0 = vld [vmem:[%s943_s0] sm:$0xff] (!%p232_p3)   ;;  %vm286_vm0 = vcmask (!%p232_p3), 523264   ;;  %v800_v16 = vmov (!%p232_p3), 0.0   ;;  %v723_v17 = vld [vmem:[%s944_s1 + $0x8] sm:$0xff] (!%p232_p3)   ;;  %v724_v18 = vld [vmem:[%s944_s1 + $0x10] sm:$0xff] (!%p232_p3)   ;;  %vm801_vm1 = vmmov (!%p232_p3), 0  }
   0x9   : > { %235 = sbr.rel (%p232_p3) target bundleno = 1157 (0x485), region = 40  ;;  %v659_v1 = vunpack.c.l.bf16 (!%p232_p3), %v658_v0  ;;  %v660_v2 = vunpack.c.h.bf16 (!%p232_p3), %v658_v0  ;;  %v722_v15 = vld [vmem:[%s944_s1] sm:$0xff] (!%p232_p3)   ;;  %666 = vmatprep.subr.bf16.mxu0 (!%p232_p3), %v800_v16  ;;  %v725_v19 = vld [vmem:[%s944_s1 + $0x18] sm:$0xff] (!%p232_p3)   ;;  %674 = vmatprep.mubr.msk.bf16.mxu0 (!%p232_p3), %vm801_vm1, %v800_v16  ;;  %p416_p4 = scmp.eq.s32.totalorder (!%p232_p3), %s790_s18, 0 }
   0xa   : > { %667 = vmatpush3.bf16.msra.mxu0 (!%p232_p3), %v722_v15  ;;  %v641_v28 = vld [vmem:[%s946_s3] ss:$0 sm:$0xff] (!%p232_p3) }
   0xb   : > { %v287_v3 = vsel (!%p232_p3), %vm286_vm0, %v659_v1, 0.0  ;;  %v290_v4 = vsel (!%p232_p3), %vm286_vm0, %v660_v2, 0.0  ;;  %668 = vmatprep.subr.bf16.mxu0 (!%p232_p3), %v800_v16  ;;  %v642_v32 = vld [vmem:[%s947_s4] ss:$0 sm:$0xff] (!%p232_p3) }
   0xc   : > { %288 = vadd.xlane.f32.xlu0 (!%p232_p3), %v287_v3  ;;  %v643_v37 = vld [vmem:[%s945_s2] ss:$0 sm:$0xff] (!%p232_p3) }
   0xe   : > { %669 = vmatpush3.bf16.msra.mxu0 (!%p232_p3), %v723_v17 }
   0xf   : > { %670 = vmatprep.subr.bf16.mxu0 (!%p232_p3), %v800_v16 }
  0x10   : > { %291 = vadd.xlane.f32.xlu0 %v290_v4  ;;  %vm422_vm2 = vcmask (%p416_p4), 7168   ;;  %v802_v44 = vmov (%p416_p4), -inf   ;;  %v803_v45 = vmov (%p416_p4), 0.0  }
  0x11   : > { %423 = vst.msk [vmem:[#allocation2] sm:$0xff] (%p416_p4), %vm422_vm2, %v802_v44  ;;  %424 = vst.msk [vmem:[#allocation2 + $0x8] sm:$0xff] (%p416_p4), %vm422_vm2, %v802_v44 }
  0x12   : > { %671 = vmatpush3.bf16.msra.mxu0 %v724_v18  ;;  %425 = vst.msk [vmem:[#allocation3] sm:$0xff] (%p416_p4), %vm422_vm2, %v803_v45  ;;  %426 = vst.msk [vmem:[#allocation3 + $0x8] sm:$0xff] (%p416_p4), %vm422_vm2, %v803_v45 }
  0x13   : > { %672 = vmatprep.subr.bf16.mxu0 %v800_v16 }
  0x16   : > { %673 = vmatpush3.bf16.msra.mxu0 %v725_v19 }
  0x99   : > { %v289_v5 = vpop.xlane.xlu0 %288 }
  0x9a   : > { %v294_v6 = vmul.f32 0.015625, %v289_v5 }
  0x9c   : > { %v296_v7 = vsub.f32 %v659_v1, %v294_v6 }
  0x9d   : > { %v292_v8 = vpop.xlane.xlu0 %291 }
  0x9e   : > { %v295_v9 = vmul.f32 0.015625, %v292_v8  ;;  %v298_v10 = vmul.f32 %v296_v7, %v296_v7 }
  0xa0   : > { %v297_v11 = vsub.f32 %v660_v2, %v295_v9  ;;  %v300_v12 = vsel %vm286_vm0, %v298_v10, 0.0 }
  0xa1   : > { %301 = vadd.xlane.f32.xlu1 %v300_v12 }
  0xa2   : > { %v299_v13 = vmul.f32 %v297_v11, %v297_v11 }
  0xa4   : > { %v303_v14 = vsel %vm286_vm0, %v299_v13, 0.0 }
  0xa5   : > { %304 = vadd.xlane.f32.xlu1 %v303_v14 }
 0x12e   : > { %v302_v20 = vpop.xlane.xlu1 %301 }
 0x12f   : > { %v306_v21 = vmul.f32 0.015625, %v302_v20 }
 0x131   : > { %v308_v22 = vadd.f32 1e-06, %v306_v21 }
 0x132   : > { %v305_v23 = vpop.xlane.xlu1 %304 }
 0x133   : > { %726 = vrsqrt.f32 %v308_v22  ;;  %v307_v24 = vmul.f32 0.015625, %v305_v23 }
 0x135   : > { %v309_v25 = vadd.f32 1e-06, %v307_v24 }
 0x137   : > { %728 = vrsqrt.f32 %v309_v25 }
 0x13d   : > { %v727_v26 = vpop.eup %726 }
 0x13e   : > { %v312_v27 = vmul.f32 %v727_v26, %v296_v7 }
 0x140   : > { %v321_v31 = vmul.f32 %v641_v28, %v312_v27 }
 0x141   : > { %v729_v29 = vpop.eup %728 }
 0x142   : > { %v313_v30 = vmul.f32 %v729_v29, %v297_v11  ;;  %v330_v34 = vadd.f32 %v642_v32, %v321_v31 }
 0x144   : > { %v322_v33 = vmul.f32 %v641_v28, %v313_v30 }
 0x146   : > { %v331_v35 = vadd.f32 %v642_v32, %v322_v33 }
 0x148   : > { %v332_v36 = vpack.c.bf16 %v331_v35, %v330_v34 }
 0x14a   : > { %675 = vmatmul.mubr.msk.bf16.vlgmr.msra.gmra.mrb[0].mxu0 %vm286_vm0, %v332_v36 }
 0x21a   : > { %421 = sbr.rel (!%p416_p4) target bundleno = 545 (0x221), region = 44 }
 0x21d   : > { %v409_v38 = vpop.f32.mrb[0].mxu0 }
 0x21e   : > { %v891_v39 = vadd.f32 %v643_v37, %v409_v38  ;;  %v676_v40 = vpop.f32.mrb[1].mxu0 }
 0x21f   : > { %v412_v41 = vpop.f32.mrb[2].mxu0 }
 0x220   : > { %v893_v42 = vadd.f32 %v643_v37, %v412_v41  ;;  %v677_v43 = vpop.f32.mrb[3].mxu0 }
 0x221 PF: > { %p650_p5 = scmp.ne.s32.totalorder %s790_s18, 0 }
 0x222   : > { %432 = vmax.xlane.f32.xlu0 (!%p650_p5), %v891_v39  ;;  %v804_v46 = vmov (!%p650_p5), 0   ;;  %v430_v47 = vld [vmem:[#allocation2] sm:$0xff] (!%p650_p5)  ;;  %vm470_vm3 = vcmask (!%p650_p5), 7168   ;;  %v431_v50 = vld [vmem:[#allocation2 + $0x8] sm:$0xff] (!%p650_p5)  ;;  %v438_v2 = vld [vmem:[#allocation3] sm:$0xff] (!%p650_p5) }
 0x223   : > { %429 = sbr.rel (%p650_p5) target bundleno = 982 (0x3d6), region = 48  ;;  %730 = vset.pattern.permute.xlu1 (!%p650_p5), %v804_v46  ;;  %731 = vset.pattern.permute.xlu0 (!%p650_p5), %v804_v46  ;;  %v439_v6 = vld [vmem:[#allocation3 + $0x8] sm:$0xff] (!%p650_p5) }
 0x226   : > { %434 = vmax.xlane.f32.xlu0 (!%p650_p5), %v893_v42 }
 0x2af   : > { %v433_v48 = vpop.xlane.xlu0 %432 }
 0x2b0   : > { %v436_v49 = vmax.f32 %v430_v47, %v433_v48 }
 0x2b2   : > { %v440_v51 = vsub.f32 %v430_v47, %v436_v49  ;;  %473 = vst.msk [vmem:[#allocation2] sm:$0xff] %vm470_vm3, %v436_v49  ;;  %450 = vperm.xlu1 %730, %v436_v49  }
 0x2b3   : > { %v435_v52 = vpop.xlane.xlu0 %434 }
 0x2b4   : > { %v437_v53 = vmax.f32 %v431_v50, %v435_v52  ;;  %v442_v63 = vmul.f32 1.442695, %v440_v51 }
 0x2b6   : > { %v441_v54 = vsub.f32 %v431_v50, %v437_v53  ;;  %474 = vst.msk [vmem:[#allocation2 + $0x8] sm:$0xff] %vm470_vm3, %v437_v53  ;;  %455 = vperm.xlu1 %730, %v437_v53  }
 0x2b8   : > { %v444_v0 = vmul.f32 1.442695, %v441_v54 }
 0x331   : > { %v451_v55 = vpop.permute.xlu1 %450 }
 0x332   : > { %v458_v56 = vsub.f32 %v891_v39, %v451_v55 }
 0x334   : > { %v460_v57 = vmul.f32 1.442695, %v458_v56 }
 0x335   : > { %v456_v58 = vpop.permute.xlu1 %455 }
 0x336   : > { %732 = vpow2.f32 %v460_v57  ;;  %v459_v59 = vsub.f32 %v893_v42, %v456_v58 }
 0x338   : > { %v462_v60 = vmul.f32 1.442695, %v459_v59 }
 0x33a   : > { %734 = vpow2.f32 %v462_v60 }
 0x33b   : > { %736 = vpow2.f32 %v442_v63 }
 0x33c   : > { %738 = vpow2.f32 %v444_v0 }
 0x340   : > { %v733_v61 = vpop.eup %732 }
 0x341   : > { %464 = vadd.xlane.f32.xlu0 %v733_v61 }
 0x344   : > { %v735_v62 = vpop.eup %734 }
 0x345   : > { %466 = vadd.xlane.f32.xlu1 %v735_v62  ;;  %v737_v1 = vpop.eup %736 }
 0x346   : > { %v446_v3 = vmul.f32 %v737_v1, %v438_v2  ;;  %v739_v4 = vpop.eup %738 }
 0x347   : > { %v447_v8 = vmul.f32 %v739_v4, %v439_v6 }
 0x3ce   : > { %v465_v5 = vpop.xlane.xlu0 %464 }
 0x3cf   : > { %v468_v7 = vadd.f32 %v465_v5, %v446_v3 }
 0x3d1   : > { %471 = vst.msk [vmem:[#allocation3] sm:$0xff] %vm470_vm3, %v468_v7 }
 0x3d2   : > { %v467_v9 = vpop.xlane.xlu1 %466 }
 0x3d3   : > { %v469_v10 = vadd.f32 %v467_v9, %v447_v8 }
 0x3d5   : > { %472 = vst.msk [vmem:[#allocation3 + $0x8] sm:$0xff] %vm470_vm3, %v469_v10 }
 0x3d6 PF: > { %p651_p6 = scmp.ne.s32.totalorder %s790_s18, 1 }
 0x3d7   : > { %v479_v11 = vld [vmem:[#allocation2] sm:$0xff] (!%p651_p6)  ;;  %v805_v13 = vmov (!%p651_p6), 0   ;;  %v480_v15 = vld [vmem:[#allocation2 + $0x8] sm:$0xff] (!%p651_p6) }
 0x3d8   : > { %478 = sbr.rel (%p651_p6) target bundleno = 1133 (0x46d), region = 52  ;;  %v493_v12 = vld [vmem:[#allocation3] sm:$0xff] (!%p651_p6)  ;;  %740 = vset.pattern.permute.xlu0 (!%p651_p6), %v805_v13  ;;  %741 = vset.pattern.permute.xlu1 (!%p651_p6), %v805_v13 }
 0x3d9   : > { %742 = vlog2.f32 (!%p651_p6), %v493_v12  ;;  %483 = vperm.xlu0 (!%p651_p6), %740, %v479_v11  }
 0x3dc   : > { %v494_v14 = vld [vmem:[#allocation3 + $0x8] sm:$0xff] (!%p651_p6) }
 0x3dd   : > { %744 = vlog2.f32 (!%p651_p6), %v494_v14  ;;  %488 = vperm.xlu0 (!%p651_p6), %740, %v480_v15  }
 0x3e3   : > { %v743_v16 = vpop.eup %742 }
 0x3e4   : > { %v496_v18 = vmul.f32 0.6931472, %v743_v16 }
 0x3e6   : > { %501 = vperm.xlu1 %741, %v496_v18  }
 0x3e7   : > { %v745_v17 = vpop.eup %744 }
 0x3e8   : > { %v498_v19 = vmul.f32 0.6931472, %v745_v17 }
 0x3ea   : > { %506 = vperm.xlu1 %741, %v498_v19  }
 0x458   : > { %v484_v20 = vpop.permute.xlu0 %483 }
 0x459   : > { %v491_v21 = vsub.f32 %v891_v39, %v484_v20 }
 0x45c   : > { %v489_v22 = vpop.permute.xlu0 %488 }
 0x45d   : > { %v492_v25 = vsub.f32 %v893_v42, %v489_v22 }
 0x465   : > { %v502_v23 = vpop.permute.xlu1 %501 }
 0x466   : > { %v509_v24 = vsub.f32 %v491_v21, %v502_v23 }
 0x468   : > { %511 = vst [vmem:[#allocation4] sm:$0xff] %v509_v24 }
 0x469   : > { %v507_v26 = vpop.permute.xlu1 %506 }
 0x46a   : > { %v510_v27 = vsub.f32 %v492_v25, %v507_v26 }
 0x46c   : > { %512 = vst [vmem:[#allocation4 + $0x8] sm:$0xff] %v510_v27 }
 0x46d PF: > { %p909_p7 = scmp.eq.s32.totalorder %s634_s21, 1  ;;  %s806_s16 = smov [#allocation4]  }
 0x46e   : > { %s529_s17 = sshll.u32 %s806_s16, 4  ;;  %s530_s17 = int_to_ptr.vmem [resolvable:$true] %s529_s17 }
 0x46f   : > { %s746_s18 = scalar_lea.vmem %s530_s17, 256  ;;  %s752_s24 = scalar_lea.vmem %s530_s17, 512 }
 0x470   : > { %p747_p8 = scmp.ne.s32.totalorder %s530_s17, %s746_s18  ;;  %p753_p11 = scmp.lt.s32.totalorder %s530_s17, %s530_s17 }
 0x471   : > { %p754_p12 = scmp.lt.s32.totalorder %s752_s24, %s746_s18 }
 0x472   : > { %p748_p9 = pnand %p747_p8, %p909_p7 }
 0x473   : > { %p755_p13 = por %p754_p12, %p753_p11 }
 0x474   : > { %p749_p10 = pneg %p748_p9 }
 0x476   : > { %p756_p0 = pnand %p755_p13, %p749_p10 }
 0x478   : > { %759 = shalt.err (!%p756_p0)
}
 0x479   : > { %s760_s26 = scalar_lea.hbm %s948_s5, 256 }
 0x47a   : > { %p761_p1 = scmp.ne.s32.totalorder %s948_s5, %s760_s26  ;;  %p766_p4 = scmp.lt.u32.totalorder %s760_s26, %s948_s5 }
 0x47c   : > { %p762_p2 = pnand %p761_p1, %p909_p7 }
 0x47e   : > { %p763_p3 = pneg %p762_p2 }
 0x480   : > { %p768_p5 = pnand %p766_p4, %p763_p3 }
 0x482   : > { %771 = shalt.err (!%p768_p5)
}
 0x483   : > { %s807_s6 = smov 128   ;;  %s808_s7 = smov 8  }
 0x484   : > { %679 = dma.vmem_to_hbm [thread:$0]  (%p909_p7), %s530_s17, 256, %s948_s5, [#allocation5], %s807_s6, %s807_s6, %s808_s7  }
 0x485 PF: > { %p687_p6 = scmp.ge.s32.totalorder %s798_s20, 2  ;;  %p688_p8 = scmp.eq.s32.totalorder %s635_s22, 1 }
 0x487   : > { %p683_p9 = pnand %p688_p8, %p687_p6 }
 0x489   : > { %785 = dma.done.wait (!%p683_p9), [#allocation5], 256  }
 0x48a   : > { %787 = vsyncadd (!%p683_p9), [#allocation5], 4294967040  ;;  %s18_s20 = sadd.s32 1, %s798_s20   ;;  %s950_s18 = smov %s794_s19 }
 0x48b   : > { %p15_p10 = scmp.ge.s32.totalorder %s18_s20, 4   ;;  %s951_s19 = smov %s953_s23 }
 0x48d   :  { %17 = sbr.rel (!%p15_p10) target bundleno = 3 (0x3), region = 93 }
 0x494   :  { %550 = vsyncpa [#allocation5], 1 }
 0x495   :  { %552 = vsyncpa [#allocation5 + $0x1], 1 }

</bundles_post_ra>
